<compile_context>
chip_gen: v7x
topology: tpu7x:2x2x1
jax: 0.10.0
libtpu: 0.0.40
codegen_flags: <defaults>
</compile_context>

<pallas_src>
import numpy as np

import jax
import jax.numpy as jnp
from jax.experimental import pallas as pl
from jax.experimental.pallas import tpu as pltpu


def _round_up(n, m):
    return ((n + m - 1) // m) * m


# ---------------------------------------------------------------------------
# Fused forward-pass kernel (one block of `bb` images per grid step)
# ---------------------------------------------------------------------------

def _lenet_kernel(x_ref, c1w_ref, c1b_ref, c2w_ref, c2b_ref,
                  fc1w_ref, fc1b_ref, fc2w_ref, fc2b_ref,
                  ow_ref, ob_ref, o_ref):
    bb = x_ref.shape[0]
    xi = x_ref[...]                                             # (bb, 28, 28)

    # ---- conv1: 5 banded MXU matmuls, batch stacked into M = bb*24 ---------
    acc = None
    for ky in range(5):
        lhs = xi[:, ky:ky + 24, :].reshape(bb * 24, 28)
        d = jnp.dot(lhs, c1w_ref[ky], preferred_element_type=jnp.float32)
        acc = d if acc is None else acc + d
    a1 = jnp.maximum(acc + c1b_ref[...], 0.0)                   # (bb*24, 144)

    # ---- max-pool 2x2 (layer 1) --------------------------------------------
    # H direction: one adjacent-row max over the whole slab (valid pooled rows
    # are the even ones; odd rows are never read by valid conv2 outputs).
    n1 = bb * 24
    a1e = jnp.concatenate([a1, a1[0:1, :]], axis=0)             # (bb*24+1, 144)
    ph = jnp.maximum(a1e[0:n1, :], a1e[1:n1 + 1, :])            # (bb*24, 144)
    # W direction: one 6-lane shifted max; the /2 lane decimation is folded
    # into zero rows of the conv2 band matrices (built host-side).
    pw = jnp.maximum(ph[:, 0:138], ph[:, 6:144])                # (bb*24, 138)
    pw = pw.reshape(bb, 24, 138)

    # ---- conv2: 5 banded MXU matmuls on the H-dilated grid, M = bb*16 ------
    # Row r of each image's 16-row output is valid only for even r (= 2*h).
    acc2 = None
    for ky in range(5):
        lhs = pw[:, 2 * ky:2 * ky + 16, :].reshape(bb * 16, 138)
        d = jnp.dot(lhs, c2w_ref[ky], preferred_element_type=jnp.float32)
        acc2 = d if acc2 is None else acc2 + d
    a2 = jnp.maximum(acc2 + c2b_ref[...], 0.0)                  # (bb*16, 96)

    # ---- max-pool 2x2 (layer 2), still on the dilated row grid -------------
    n2 = bb * 16
    a2e = jnp.concatenate([a2, a2[0:14, :]], axis=0)            # (bb*16+14, 96)
    th = jnp.maximum(a2e[0:n2 + 12, :], a2e[2:n2 + 14, :])      # (bb*16+12, 96)
    tw = jnp.maximum(th[:, 0:84], th[:, 12:96])                 # (bb*16+12, 84)

    # ---- flatten + fc1 as 4 banded dots (NCHW permutation + W decimation ---
    # ---- are folded into the zero-expanded fc1 weight, built host-side) ----
    f1 = None
    for hp in range(4):
        d = jnp.dot(tw[4 * hp:4 * hp + n2, :], fc1w_ref[hp],
                    preferred_element_type=jnp.float32)
        f1 = d if f1 is None else f1 + d
    f1 = jnp.maximum(f1 + fc1b_ref[...], 0.0)                   # (bb*16, 120)

    # ---- fc2 + ReLU, out + softmax (computed on all dilated rows; only ------
    # ---- rows 16*i are valid and the wrapper strides them out) -------------
    f2 = jnp.maximum(jnp.dot(f1, fc2w_ref[...],
                             preferred_element_type=jnp.float32) + fc2b_ref[...], 0.0)
    logits = jnp.dot(f2, ow_ref[...],
                     preferred_element_type=jnp.float32) + ob_ref[...]
    logits = logits - jnp.max(logits, axis=-1, keepdims=True)
    e = jnp.exp(logits)
    probs = e * pl.reciprocal(jnp.sum(e, axis=-1, keepdims=True), approx=True)
    o_ref[...] = probs.astype(o_ref.dtype)                      # (bb*16, 10)


def lenet_forward(x_nchw, kp, block_b=64):
    """x_nchw: (B, 1, 28, 28) f32 -> softmax probabilities (B, 10) f32."""
    B = x_nchw.shape[0]
    x = x_nchw.reshape(B, 28, 28).astype(jnp.float32)

    bb = block_b if B >= block_b else _round_up(B, 8)   # images per grid step
    Bp = _round_up(B, bb)
    if Bp != B:
        x = jnp.pad(x, ((0, Bp - B), (0, 0), (0, 0)))

    c2 = lambda b: (0, 0)
    c3 = lambda b: (0, 0, 0)
    out = pl.pallas_call(
        _lenet_kernel,
        out_shape=jax.ShapeDtypeStruct((Bp * 16, 10), jnp.float32),
        grid=(Bp // bb,),
        in_specs=[
            pl.BlockSpec((bb, 28, 28), lambda b: (b, 0, 0)),   # image block
            pl.BlockSpec((5, 28, 144), c3),                    # conv1 bands
            pl.BlockSpec((1, 144), c2),                        # conv1 bias (lane-tiled)
            pl.BlockSpec((5, 138, 96), c3),                    # conv2 bands (zero-expanded)
            pl.BlockSpec((1, 96), c2),                         # conv2 bias (lane-tiled)
            pl.BlockSpec((4, 84, 120), c3),                    # fc1 (zero-expanded, permuted)
            pl.BlockSpec((1, 120), c2),
            pl.BlockSpec((120, 60), c2),                       # fc2
            pl.BlockSpec((1, 60), c2),
            pl.BlockSpec((60, 10), c2),                        # out
            pl.BlockSpec((1, 10), c2),
        ],
        out_specs=pl.BlockSpec((bb * 16, 10), lambda b: (b, 0)),
        compiler_params=pltpu.CompilerParams(
            dimension_semantics=("parallel",)),
    )(x, kp["b1w"], kp["b1b"], kp["b2w"], kp["b2b"],
      kp["fc1w"], kp["fc1b"], kp["fc2w"], kp["fc2b"],
      kp["outw"], kp["outb"])
    # Row 16*i of the kernel output holds image i's probabilities.
    return out[::16][:B]


@jax.jit
def network_forward(x, kp):
    return lenet_forward(x, kp)


# ---------------------------------------------------------------------------
# Parameter generation (PyTorch layout) and host-side repacking
# ---------------------------------------------------------------------------

def init_torch_params(key):
    """Deterministic synthetic init, PyTorch-default-style U(-1/sqrt(fan_in), +)."""
    ks = jax.random.split(key, 10)

    def uni(k, shape, fan_in):
        bound = 1.0 / float(fan_in) ** 0.5
        return jax.random.uniform(k, shape, jnp.float32, -bound, bound)

    return {
        "conv1_w": uni(ks[0], (6, 1, 5, 5), 25),
        "conv1_b": uni(ks[1], (6,), 25),
        "conv2_w": uni(ks[2], (12, 6, 5, 5), 150),
        "conv2_b": uni(ks[3], (12,), 150),
        "fc1_w": uni(ks[4], (120, 192), 192),
        "fc1_b": uni(ks[5], (120,), 192),
        "fc2_w": uni(ks[6], (60, 120), 120),
        "fc2_b": uni(ks[7], (60,), 120),
        "out_w": uni(ks[8], (10, 60), 60),
        "out_b": uni(ks[9], (10,), 60),
    }


def _conv_band(weight, w_in, in_lanes, group_stride):
    """Banded matrices so a valid KxK conv on lane-major (group(wi)*Ci + ci) row
    slabs becomes:  out[h, wo*Co+co] = sum_ky (in[h+ky, :] @ band[ky])[wo*Co+co].
    `group_stride` > 1 leaves zero rows for discarded (W-pool) lane groups, so
    the width decimation rides along with the matmul."""
    w = np.asarray(weight, np.float32)             # (Co, Ci, K, K)
    co_n, ci_n, kh, kw = w.shape
    w_out = w_in - kw + 1
    band = np.zeros((kh, in_lanes, w_out * co_n), np.float32)
    for ky in range(kh):
        for wo in range(w_out):
            for kx in range(kw):
                g = group_stride * (wo + kx)
                band[ky, g * ci_n:(g + 1) * ci_n, wo * co_n:(wo + 1) * co_n] = \
                    w[:, :, ky, kx].T
    return band


def pack_params(p):
    """Repack torch-layout params into the fused kernel's layouts (done once)."""
    # fc1: input slab lane order is 24*w + c (w = pooled width, c = channel) for
    # each of the 4 pooled rows h; torch feature order is c*16 + h*4 + w.
    # Lanes for odd (discarded) width groups stay zero.
    fc1_t = np.asarray(p["fc1_w"], np.float32)     # (120, 192)
    fc1_k = np.zeros((4, 84, 120), np.float32)
    for h in range(4):
        for w in range(4):
            for c in range(12):
                fc1_k[h, 24 * w + c, :] = fc1_t[:, c * 16 + h * 4 + w]

    kp = {
        "b1w": _conv_band(p["conv1_w"], 28, 28, 1),                          # (5, 28, 144)
        "b1b": np.tile(np.asarray(p["conv1_b"], np.float32), 24)[None, :],   # (1, 144)
        "b2w": _conv_band(p["conv2_w"], 12, 138, 2),                         # (5, 138, 96)
        "b2b": np.tile(np.asarray(p["conv2_b"], np.float32), 8)[None, :],    # (1, 96)
        "fc1w": fc1_k,                                                       # (4, 84, 120)
        "fc1b": np.asarray(p["fc1_b"], np.float32)[None, :],                 # (1, 120)
        "fc2w": np.asarray(p["fc2_w"], np.float32).T.copy(),                 # (120, 60)
        "fc2b": np.asarray(p["fc2_b"], np.float32)[None, :],                 # (1, 60)
        "outw": np.asarray(p["out_w"], np.float32).T.copy(),                 # (60, 10)
        "outb": np.asarray(p["out_b"], np.float32)[None, :],                 # (1, 10)
    }
    return {k: jnp.asarray(v) for k, v in kp.items()}


# ---------------------------------------------------------------------------
# Pure-JAX reference (mirrors the PyTorch module) for a correctness check
# ---------------------------------------------------------------------------

def reference_forward(x, p):
    hp = jax.lax.Precision.HIGHEST
    dn = ("NCHW", "OIHW", "NCHW")
    y = jax.lax.conv_general_dilated(x, p["conv1_w"], (1, 1), "VALID",
                                     dimension_numbers=dn, precision=hp)
    y = jax.nn.relu(y + p["conv1_b"][None, :, None, None])
    y = jax.lax.reduce_window(y, -jnp.inf, jax.lax.max, (1, 1, 2, 2), (1, 1, 2, 2), "VALID")
    y = jax.lax.conv_general_dilated(y, p["conv2_w"], (1, 1), "VALID",
                                     dimension_numbers=dn, precision=hp)
    y = jax.nn.relu(y + p["conv2_b"][None, :, None, None])
    y = jax.lax.reduce_window(y, -jnp.inf, jax.lax.max, (1, 1, 2, 2), (1, 1, 2, 2), "VALID")
    y = y.reshape(y.shape[0], -1)                                  # torch NCHW flatten
    y = jax.nn.relu(jnp.dot(y, p["fc1_w"].T, precision=hp) + p["fc1_b"])
    y = jax.nn.relu(jnp.dot(y, p["fc2_w"].T, precision=hp) + p["fc2_b"])
    logits = jnp.dot(y, p["out_w"].T, precision=hp) + p["out_b"]
    return jax.nn.softmax(logits, axis=-1)


if __name__ == "__main__":
    key = jax.random.PRNGKey(0)
    k_param, k_x = jax.random.split(key)

    torch_params = init_torch_params(k_param)
    kernel_params = pack_params(torch_params)

    x = jax.random.normal(k_x, (2, 1, 28, 28), dtype=jnp.float32)

    out = network_forward(x, kernel_params)
    out = jax.block_until_ready(out)

    assert out.shape == (2, 10)
    # softmax rows sum to ~1 (approx reciprocal leaves ~1e-4 slack)
    assert bool(jnp.all(jnp.abs(jnp.sum(out, axis=1) - 1.0) < 5e-3))
    # match the PyTorch-equivalent reference
    ref = reference_forward(x, torch_params)
    max_err = float(jnp.max(jnp.abs(out - ref)))
    assert max_err < 2e-2, f"mismatch vs reference: {max_err}"

    print("KERNEL_OK")
</pallas_src>

<mosaic_0001>
module attributes {stable_mosaic.version = 11 : i64} {
  func.func @_lenet_kernel(%arg0: i32, %arg1: memref<8x28x28xf32, #tpu.memory_space<vmem>>, %arg2: memref<5x28x144xf32, #tpu.memory_space<vmem>>, %arg3: memref<1x144xf32, #tpu.memory_space<vmem>>, %arg4: memref<5x138x96xf32, #tpu.memory_space<vmem>>, %arg5: memref<1x96xf32, #tpu.memory_space<vmem>>, %arg6: memref<4x84x120xf32, #tpu.memory_space<vmem>>, %arg7: memref<1x120xf32, #tpu.memory_space<vmem>>, %arg8: memref<120x60xf32, #tpu.memory_space<vmem>>, %arg9: memref<1x60xf32, #tpu.memory_space<vmem>>, %arg10: memref<60x10xf32, #tpu.memory_space<vmem>>, %arg11: memref<1x10xf32, #tpu.memory_space<vmem>>, %arg12: memref<128x10xf32, #tpu.memory_space<vmem>>) attributes {dimension_semantics = [#tpu.dimension_semantics<parallel>], iteration_bounds = array<i64: 1>, scalar_prefetch = 0 : i64, scratch_operands = 0 : i64, tpu.core_type = #tpu.core_type<tc>, window_params = [{transform_indices = @transform_0, window_bounds = array<i64: 8, 28, 28>}, {pipeline_mode = #tpu.pipeline_mode<synchronous>, transform_indices = @transform_1, window_bounds = array<i64: 5, 28, 144>}, {pipeline_mode = #tpu.pipeline_mode<synchronous>, transform_indices = @transform_2, window_bounds = array<i64: 1, 144>}, {pipeline_mode = #tpu.pipeline_mode<synchronous>, transform_indices = @transform_3, window_bounds = array<i64: 5, 138, 96>}, {pipeline_mode = #tpu.pipeline_mode<synchronous>, transform_indices = @transform_4, window_bounds = array<i64: 1, 96>}, {pipeline_mode = #tpu.pipeline_mode<synchronous>, transform_indices = @transform_5, window_bounds = array<i64: 4, 84, 120>}, {pipeline_mode = #tpu.pipeline_mode<synchronous>, transform_indices = @transform_6, window_bounds = array<i64: 1, 120>}, {pipeline_mode = #tpu.pipeline_mode<synchronous>, transform_indices = @transform_7, window_bounds = array<i64: 120, 60>}, {pipeline_mode = #tpu.pipeline_mode<synchronous>, transform_indices = @transform_8, window_bounds = array<i64: 1, 60>}, {pipeline_mode = #tpu.pipeline_mode<synchronous>, transform_indices = @transform_9, window_bounds = array<i64: 60, 10>}, {pipeline_mode = #tpu.pipeline_mode<synchronous>, transform_indices = @transform_10, window_bounds = array<i64: 1, 10>}, {transform_indices = @transform_11, window_bounds = array<i64: 128, 10>}]} {
    %c0 = arith.constant 0 : index
    %c0_0 = arith.constant 0 : index
    %c0_1 = arith.constant 0 : index
    %0 = vector.load %arg1[%c0, %c0_0, %c0_1] : memref<8x28x28xf32, #tpu.memory_space<vmem>>, vector<8x28x28xf32>
    %1 = vector.extract_strided_slice %0 {offsets = [0, 0, 0], sizes = [8, 24, 28], strides = [1, 1, 1]} : vector<8x28x28xf32> to vector<8x24x28xf32>
    %2 = vector.shape_cast %1 : vector<8x24x28xf32> to vector<192x28xf32>
    %c0_2 = arith.constant 0 : index
    %c0_3 = arith.constant 0 : index
    %c0_4 = arith.constant 0 : index
    %3 = vector.load %arg2[%c0_2, %c0_3, %c0_4] : memref<5x28x144xf32, #tpu.memory_space<vmem>>, vector<1x28x144xf32>
    %4 = vector.shape_cast %3 : vector<1x28x144xf32> to vector<28x144xf32>
    %cst = arith.constant dense<0.000000e+00> : vector<192x144xf32>
    %5 = tpu.matmul %2, %4, %cst {dimension_numbers = #tpu.dot_dimension_numbers<[1], [0], [0], [1], [0, 0, 1, 1], [], []>} : vector<192x28xf32>, vector<28x144xf32>, vector<192x144xf32> -> vector<192x144xf32>
    %6 = vector.extract_strided_slice %0 {offsets = [0, 1, 0], sizes = [8, 24, 28], strides = [1, 1, 1]} : vector<8x28x28xf32> to vector<8x24x28xf32>
    %7 = vector.shape_cast %6 : vector<8x24x28xf32> to vector<192x28xf32>
    %c1 = arith.constant 1 : index
    %c0_5 = arith.constant 0 : index
    %c0_6 = arith.constant 0 : index
    %8 = vector.load %arg2[%c1, %c0_5, %c0_6] : memref<5x28x144xf32, #tpu.memory_space<vmem>>, vector<1x28x144xf32>
    %9 = vector.shape_cast %8 : vector<1x28x144xf32> to vector<28x144xf32>
    %cst_7 = arith.constant dense<0.000000e+00> : vector<192x144xf32>
    %10 = tpu.matmul %7, %9, %cst_7 {dimension_numbers = #tpu.dot_dimension_numbers<[1], [0], [0], [1], [0, 0, 1, 1], [], []>} : vector<192x28xf32>, vector<28x144xf32>, vector<192x144xf32> -> vector<192x144xf32>
    %11 = arith.addf %5, %10 : vector<192x144xf32>
    %12 = vector.extract_strided_slice %0 {offsets = [0, 2, 0], sizes = [8, 24, 28], strides = [1, 1, 1]} : vector<8x28x28xf32> to vector<8x24x28xf32>
    %13 = vector.shape_cast %12 : vector<8x24x28xf32> to vector<192x28xf32>
    %c2 = arith.constant 2 : index
    %c0_8 = arith.constant 0 : index
    %c0_9 = arith.constant 0 : index
    %14 = vector.load %arg2[%c2, %c0_8, %c0_9] : memref<5x28x144xf32, #tpu.memory_space<vmem>>, vector<1x28x144xf32>
    %15 = vector.shape_cast %14 : vector<1x28x144xf32> to vector<28x144xf32>
    %cst_10 = arith.constant dense<0.000000e+00> : vector<192x144xf32>
    %16 = tpu.matmul %13, %15, %cst_10 {dimension_numbers = #tpu.dot_dimension_numbers<[1], [0], [0], [1], [0, 0, 1, 1], [], []>} : vector<192x28xf32>, vector<28x144xf32>, vector<192x144xf32> -> vector<192x144xf32>
    %17 = arith.addf %11, %16 : vector<192x144xf32>
    %18 = vector.extract_strided_slice %0 {offsets = [0, 3, 0], sizes = [8, 24, 28], strides = [1, 1, 1]} : vector<8x28x28xf32> to vector<8x24x28xf32>
    %19 = vector.shape_cast %18 : vector<8x24x28xf32> to vector<192x28xf32>
    %c3 = arith.constant 3 : index
    %c0_11 = arith.constant 0 : index
    %c0_12 = arith.constant 0 : index
    %20 = vector.load %arg2[%c3, %c0_11, %c0_12] : memref<5x28x144xf32, #tpu.memory_space<vmem>>, vector<1x28x144xf32>
    %21 = vector.shape_cast %20 : vector<1x28x144xf32> to vector<28x144xf32>
    %cst_13 = arith.constant dense<0.000000e+00> : vector<192x144xf32>
    %22 = tpu.matmul %19, %21, %cst_13 {dimension_numbers = #tpu.dot_dimension_numbers<[1], [0], [0], [1], [0, 0, 1, 1], [], []>} : vector<192x28xf32>, vector<28x144xf32>, vector<192x144xf32> -> vector<192x144xf32>
    %23 = arith.addf %17, %22 : vector<192x144xf32>
    %24 = vector.extract_strided_slice %0 {offsets = [0, 4, 0], sizes = [8, 24, 28], strides = [1, 1, 1]} : vector<8x28x28xf32> to vector<8x24x28xf32>
    %25 = vector.shape_cast %24 : vector<8x24x28xf32> to vector<192x28xf32>
    %c4 = arith.constant 4 : index
    %c0_14 = arith.constant 0 : index
    %c0_15 = arith.constant 0 : index
    %26 = vector.load %arg2[%c4, %c0_14, %c0_15] : memref<5x28x144xf32, #tpu.memory_space<vmem>>, vector<1x28x144xf32>
    %27 = vector.shape_cast %26 : vector<1x28x144xf32> to vector<28x144xf32>
    %cst_16 = arith.constant dense<0.000000e+00> : vector<192x144xf32>
    %28 = tpu.matmul %25, %27, %cst_16 {dimension_numbers = #tpu.dot_dimension_numbers<[1], [0], [0], [1], [0, 0, 1, 1], [], []>} : vector<192x28xf32>, vector<28x144xf32>, vector<192x144xf32> -> vector<192x144xf32>
    %29 = arith.addf %23, %28 : vector<192x144xf32>
    %c0_17 = arith.constant 0 : index
    %c0_18 = arith.constant 0 : index
    %30 = vector.load %arg3[%c0_17, %c0_18] : memref<1x144xf32, #tpu.memory_space<vmem>>, vector<1x144xf32>
    %31 = vector.broadcast %30 : vector<1x144xf32> to vector<192x144xf32>
    %32 = arith.addf %29, %31 : vector<192x144xf32>
    %cst_19 = arith.constant 0.000000e+00 : f32
    %33 = vector.broadcast %cst_19 : f32 to vector<192x144xf32>
    %34 = arith.maximumf %32, %33 : vector<192x144xf32>
    %35 = vector.extract_strided_slice %34 {offsets = [0, 0], sizes = [1, 144], strides = [1, 1]} : vector<192x144xf32> to vector<1x144xf32>
    %36 = tpu.concatenate %34, %35 in 0 : vector<192x144xf32>, vector<1x144xf32> -> vector<193x144xf32>
    %37 = vector.extract_strided_slice %36 {offsets = [0, 0], sizes = [192, 144], strides = [1, 1]} : vector<193x144xf32> to vector<192x144xf32>
    %38 = vector.extract_strided_slice %36 {offsets = [1, 0], sizes = [192, 144], strides = [1, 1]} : vector<193x144xf32> to vector<192x144xf32>
    %39 = arith.maximumf %37, %38 : vector<192x144xf32>
    %40 = vector.extract_strided_slice %39 {offsets = [0, 0], sizes = [192, 138], strides = [1, 1]} : vector<192x144xf32> to vector<192x138xf32>
    %41 = vector.extract_strided_slice %39 {offsets = [0, 6], sizes = [192, 138], strides = [1, 1]} : vector<192x144xf32> to vector<192x138xf32>
    %42 = arith.maximumf %40, %41 : vector<192x138xf32>
    %43 = vector.shape_cast %42 : vector<192x138xf32> to vector<8x24x138xf32>
    %44 = vector.extract_strided_slice %43 {offsets = [0, 0, 0], sizes = [8, 16, 138], strides = [1, 1, 1]} : vector<8x24x138xf32> to vector<8x16x138xf32>
    %45 = vector.shape_cast %44 : vector<8x16x138xf32> to vector<128x138xf32>
    %c0_20 = arith.constant 0 : index
    %c0_21 = arith.constant 0 : index
    %c0_22 = arith.constant 0 : index
    %46 = vector.load %arg4[%c0_20, %c0_21, %c0_22] : memref<5x138x96xf32, #tpu.memory_space<vmem>>, vector<1x138x96xf32>
    %47 = vector.shape_cast %46 : vector<1x138x96xf32> to vector<138x96xf32>
    %cst_23 = arith.constant dense<0.000000e+00> : vector<128x96xf32>
    %48 = tpu.matmul %45, %47, %cst_23 {dimension_numbers = #tpu.dot_dimension_numbers<[1], [0], [0], [1], [0, 0, 1, 1], [], []>} : vector<128x138xf32>, vector<138x96xf32>, vector<128x96xf32> -> vector<128x96xf32>
    %49 = vector.extract_strided_slice %43 {offsets = [0, 2, 0], sizes = [8, 16, 138], strides = [1, 1, 1]} : vector<8x24x138xf32> to vector<8x16x138xf32>
    %50 = vector.shape_cast %49 : vector<8x16x138xf32> to vector<128x138xf32>
    %c1_24 = arith.constant 1 : index
    %c0_25 = arith.constant 0 : index
    %c0_26 = arith.constant 0 : index
    %51 = vector.load %arg4[%c1_24, %c0_25, %c0_26] : memref<5x138x96xf32, #tpu.memory_space<vmem>>, vector<1x138x96xf32>
    %52 = vector.shape_cast %51 : vector<1x138x96xf32> to vector<138x96xf32>
    %cst_27 = arith.constant dense<0.000000e+00> : vector<128x96xf32>
    %53 = tpu.matmul %50, %52, %cst_27 {dimension_numbers = #tpu.dot_dimension_numbers<[1], [0], [0], [1], [0, 0, 1, 1], [], []>} : vector<128x138xf32>, vector<138x96xf32>, vector<128x96xf32> -> vector<128x96xf32>
    %54 = arith.addf %48, %53 : vector<128x96xf32>
    %55 = vector.extract_strided_slice %43 {offsets = [0, 4, 0], sizes = [8, 16, 138], strides = [1, 1, 1]} : vector<8x24x138xf32> to vector<8x16x138xf32>
    %56 = vector.shape_cast %55 : vector<8x16x138xf32> to vector<128x138xf32>
    %c2_28 = arith.constant 2 : index
    %c0_29 = arith.constant 0 : index
    %c0_30 = arith.constant 0 : index
    %57 = vector.load %arg4[%c2_28, %c0_29, %c0_30] : memref<5x138x96xf32, #tpu.memory_space<vmem>>, vector<1x138x96xf32>
    %58 = vector.shape_cast %57 : vector<1x138x96xf32> to vector<138x96xf32>
    %cst_31 = arith.constant dense<0.000000e+00> : vector<128x96xf32>
    %59 = tpu.matmul %56, %58, %cst_31 {dimension_numbers = #tpu.dot_dimension_numbers<[1], [0], [0], [1], [0, 0, 1, 1], [], []>} : vector<128x138xf32>, vector<138x96xf32>, vector<128x96xf32> -> vector<128x96xf32>
    %60 = arith.addf %54, %59 : vector<128x96xf32>
    %61 = vector.extract_strided_slice %43 {offsets = [0, 6, 0], sizes = [8, 16, 138], strides = [1, 1, 1]} : vector<8x24x138xf32> to vector<8x16x138xf32>
    %62 = vector.shape_cast %61 : vector<8x16x138xf32> to vector<128x138xf32>
    %c3_32 = arith.constant 3 : index
    %c0_33 = arith.constant 0 : index
    %c0_34 = arith.constant 0 : index
    %63 = vector.load %arg4[%c3_32, %c0_33, %c0_34] : memref<5x138x96xf32, #tpu.memory_space<vmem>>, vector<1x138x96xf32>
    %64 = vector.shape_cast %63 : vector<1x138x96xf32> to vector<138x96xf32>
    %cst_35 = arith.constant dense<0.000000e+00> : vector<128x96xf32>
    %65 = tpu.matmul %62, %64, %cst_35 {dimension_numbers = #tpu.dot_dimension_numbers<[1], [0], [0], [1], [0, 0, 1, 1], [], []>} : vector<128x138xf32>, vector<138x96xf32>, vector<128x96xf32> -> vector<128x96xf32>
    %66 = arith.addf %60, %65 : vector<128x96xf32>
    %67 = vector.extract_strided_slice %43 {offsets = [0, 8, 0], sizes = [8, 16, 138], strides = [1, 1, 1]} : vector<8x24x138xf32> to vector<8x16x138xf32>
    %68 = vector.shape_cast %67 : vector<8x16x138xf32> to vector<128x138xf32>
    %c4_36 = arith.constant 4 : index
    %c0_37 = arith.constant 0 : index
    %c0_38 = arith.constant 0 : index
    %69 = vector.load %arg4[%c4_36, %c0_37, %c0_38] : memref<5x138x96xf32, #tpu.memory_space<vmem>>, vector<1x138x96xf32>
    %70 = vector.shape_cast %69 : vector<1x138x96xf32> to vector<138x96xf32>
    %cst_39 = arith.constant dense<0.000000e+00> : vector<128x96xf32>
    %71 = tpu.matmul %68, %70, %cst_39 {dimension_numbers = #tpu.dot_dimension_numbers<[1], [0], [0], [1], [0, 0, 1, 1], [], []>} : vector<128x138xf32>, vector<138x96xf32>, vector<128x96xf32> -> vector<128x96xf32>
    %72 = arith.addf %66, %71 : vector<128x96xf32>
    %c0_40 = arith.constant 0 : index
    %c0_41 = arith.constant 0 : index
    %73 = vector.load %arg5[%c0_40, %c0_41] : memref<1x96xf32, #tpu.memory_space<vmem>>, vector<1x96xf32>
    %74 = vector.broadcast %73 : vector<1x96xf32> to vector<128x96xf32>
    %75 = arith.addf %72, %74 : vector<128x96xf32>
    %cst_42 = arith.constant 0.000000e+00 : f32
    %76 = vector.broadcast %cst_42 : f32 to vector<128x96xf32>
    %77 = arith.maximumf %75, %76 : vector<128x96xf32>
    %78 = vector.extract_strided_slice %77 {offsets = [0, 0], sizes = [14, 96], strides = [1, 1]} : vector<128x96xf32> to vector<14x96xf32>
    %79 = tpu.concatenate %77, %78 in 0 : vector<128x96xf32>, vector<14x96xf32> -> vector<142x96xf32>
    %80 = vector.extract_strided_slice %79 {offsets = [0, 0], sizes = [140, 96], strides = [1, 1]} : vector<142x96xf32> to vector<140x96xf32>
    %81 = vector.extract_strided_slice %79 {offsets = [2, 0], sizes = [140, 96], strides = [1, 1]} : vector<142x96xf32> to vector<140x96xf32>
    %82 = arith.maximumf %80, %81 : vector<140x96xf32>
    %83 = vector.extract_strided_slice %82 {offsets = [0, 0], sizes = [140, 84], strides = [1, 1]} : vector<140x96xf32> to vector<140x84xf32>
    %84 = vector.extract_strided_slice %82 {offsets = [0, 12], sizes = [140, 84], strides = [1, 1]} : vector<140x96xf32> to vector<140x84xf32>
    %85 = arith.maximumf %83, %84 : vector<140x84xf32>
    %86 = vector.extract_strided_slice %85 {offsets = [0, 0], sizes = [128, 84], strides = [1, 1]} : vector<140x84xf32> to vector<128x84xf32>
    %c0_43 = arith.constant 0 : index
    %c0_44 = arith.constant 0 : index
    %c0_45 = arith.constant 0 : index
    %87 = vector.load %arg6[%c0_43, %c0_44, %c0_45] : memref<4x84x120xf32, #tpu.memory_space<vmem>>, vector<1x84x120xf32>
    %88 = vector.shape_cast %87 : vector<1x84x120xf32> to vector<84x120xf32>
    %cst_46 = arith.constant dense<0.000000e+00> : vector<128x120xf32>
    %89 = tpu.matmul %86, %88, %cst_46 {dimension_numbers = #tpu.dot_dimension_numbers<[1], [0], [0], [1], [0, 0, 1, 1], [], []>} : vector<128x84xf32>, vector<84x120xf32>, vector<128x120xf32> -> vector<128x120xf32>
    %90 = vector.extract_strided_slice %85 {offsets = [4, 0], sizes = [128, 84], strides = [1, 1]} : vector<140x84xf32> to vector<128x84xf32>
    %c1_47 = arith.constant 1 : index
    %c0_48 = arith.constant 0 : index
    %c0_49 = arith.constant 0 : index
    %91 = vector.load %arg6[%c1_47, %c0_48, %c0_49] : memref<4x84x120xf32, #tpu.memory_space<vmem>>, vector<1x84x120xf32>
    %92 = vector.shape_cast %91 : vector<1x84x120xf32> to vector<84x120xf32>
    %cst_50 = arith.constant dense<0.000000e+00> : vector<128x120xf32>
    %93 = tpu.matmul %90, %92, %cst_50 {dimension_numbers = #tpu.dot_dimension_numbers<[1], [0], [0], [1], [0, 0, 1, 1], [], []>} : vector<128x84xf32>, vector<84x120xf32>, vector<128x120xf32> -> vector<128x120xf32>
    %94 = arith.addf %89, %93 : vector<128x120xf32>
    %95 = vector.extract_strided_slice %85 {offsets = [8, 0], sizes = [128, 84], strides = [1, 1]} : vector<140x84xf32> to vector<128x84xf32>
    %c2_51 = arith.constant 2 : index
    %c0_52 = arith.constant 0 : index
    %c0_53 = arith.constant 0 : index
    %96 = vector.load %arg6[%c2_51, %c0_52, %c0_53] : memref<4x84x120xf32, #tpu.memory_space<vmem>>, vector<1x84x120xf32>
    %97 = vector.shape_cast %96 : vector<1x84x120xf32> to vector<84x120xf32>
    %cst_54 = arith.constant dense<0.000000e+00> : vector<128x120xf32>
    %98 = tpu.matmul %95, %97, %cst_54 {dimension_numbers = #tpu.dot_dimension_numbers<[1], [0], [0], [1], [0, 0, 1, 1], [], []>} : vector<128x84xf32>, vector<84x120xf32>, vector<128x120xf32> -> vector<128x120xf32>
    %99 = arith.addf %94, %98 : vector<128x120xf32>
    %100 = vector.extract_strided_slice %85 {offsets = [12, 0], sizes = [128, 84], strides = [1, 1]} : vector<140x84xf32> to vector<128x84xf32>
    %c3_55 = arith.constant 3 : index
    %c0_56 = arith.constant 0 : index
    %c0_57 = arith.constant 0 : index
    %101 = vector.load %arg6[%c3_55, %c0_56, %c0_57] : memref<4x84x120xf32, #tpu.memory_space<vmem>>, vector<1x84x120xf32>
    %102 = vector.shape_cast %101 : vector<1x84x120xf32> to vector<84x120xf32>
    %cst_58 = arith.constant dense<0.000000e+00> : vector<128x120xf32>
    %103 = tpu.matmul %100, %102, %cst_58 {dimension_numbers = #tpu.dot_dimension_numbers<[1], [0], [0], [1], [0, 0, 1, 1], [], []>} : vector<128x84xf32>, vector<84x120xf32>, vector<128x120xf32> -> vector<128x120xf32>
    %104 = arith.addf %99, %103 : vector<128x120xf32>
    %c0_59 = arith.constant 0 : index
    %c0_60 = arith.constant 0 : index
    %105 = vector.load %arg7[%c0_59, %c0_60] : memref<1x120xf32, #tpu.memory_space<vmem>>, vector<1x120xf32>
    %106 = vector.broadcast %105 : vector<1x120xf32> to vector<128x120xf32>
    %107 = arith.addf %104, %106 : vector<128x120xf32>
    %cst_61 = arith.constant 0.000000e+00 : f32
    %108 = vector.broadcast %cst_61 : f32 to vector<128x120xf32>
    %109 = arith.maximumf %107, %108 : vector<128x120xf32>
    %c0_62 = arith.constant 0 : index
    %c0_63 = arith.constant 0 : index
    %110 = vector.load %arg8[%c0_62, %c0_63] : memref<120x60xf32, #tpu.memory_space<vmem>>, vector<120x60xf32>
    %cst_64 = arith.constant dense<0.000000e+00> : vector<128x60xf32>
    %111 = tpu.matmul %109, %110, %cst_64 {dimension_numbers = #tpu.dot_dimension_numbers<[1], [0], [0], [1], [0, 0, 1, 1], [], []>} : vector<128x120xf32>, vector<120x60xf32>, vector<128x60xf32> -> vector<128x60xf32>
    %c0_65 = arith.constant 0 : index
    %c0_66 = arith.constant 0 : index
    %112 = vector.load %arg9[%c0_65, %c0_66] : memref<1x60xf32, #tpu.memory_space<vmem>>, vector<1x60xf32>
    %113 = vector.broadcast %112 : vector<1x60xf32> to vector<128x60xf32>
    %114 = arith.addf %111, %113 : vector<128x60xf32>
    %cst_67 = arith.constant 0.000000e+00 : f32
    %115 = vector.broadcast %cst_67 : f32 to vector<128x60xf32>
    %116 = arith.maximumf %114, %115 : vector<128x60xf32>
    %c0_68 = arith.constant 0 : index
    %c0_69 = arith.constant 0 : index
    %117 = vector.load %arg10[%c0_68, %c0_69] : memref<60x10xf32, #tpu.memory_space<vmem>>, vector<60x10xf32>
    %cst_70 = arith.constant dense<0.000000e+00> : vector<128x10xf32>
    %118 = tpu.matmul %116, %117, %cst_70 {dimension_numbers = #tpu.dot_dimension_numbers<[1], [0], [0], [1], [0, 0, 1, 1], [], []>} : vector<128x60xf32>, vector<60x10xf32>, vector<128x10xf32> -> vector<128x10xf32>
    %c0_71 = arith.constant 0 : index
    %c0_72 = arith.constant 0 : index
    %119 = vector.load %arg11[%c0_71, %c0_72] : memref<1x10xf32, #tpu.memory_space<vmem>>, vector<1x10xf32>
    %120 = vector.broadcast %119 : vector<1x10xf32> to vector<128x10xf32>
    %121 = arith.addf %118, %120 : vector<128x10xf32>
    %cst_73 = arith.constant dense<0xFF800000> : vector<128xf32>
    %122 = vector.multi_reduction <maximumf>, %121, %cst_73 [1] : vector<128x10xf32> to vector<128xf32>
    %123 = vector.shape_cast %122 : vector<128xf32> to vector<128x1xf32>
    %124 = vector.broadcast %123 : vector<128x1xf32> to vector<128x10xf32>
    %125 = arith.subf %121, %124 : vector<128x10xf32>
    %126 = math.exp %125 : vector<128x10xf32>
    %cst_74 = arith.constant dense<0.000000e+00> : vector<128xf32>
    %127 = vector.multi_reduction <add>, %126, %cst_74 [1] : vector<128x10xf32> to vector<128xf32>
    %128 = vector.shape_cast %127 : vector<128xf32> to vector<128x1xf32>
    %129 = tpu.reciprocal %128 {approx = true} : vector<128x1xf32> -> vector<128x1xf32>
    %130 = vector.broadcast %129 : vector<128x1xf32> to vector<128x10xf32>
    %131 = arith.mulf %126, %130 : vector<128x10xf32>
    %c0_75 = arith.constant 0 : index
    %c0_76 = arith.constant 0 : index
    %132 = vector.load %arg12[%c0_75, %c0_76] : memref<128x10xf32, #tpu.memory_space<vmem>>, vector<128x10xf32>
    tpu.vector_store %arg12[%c0_75, %c0_76], %131 {strides = array<i32>} : memref<128x10xf32, #tpu.memory_space<vmem>>, vector<128x10xf32>,
    return
  }
  func.func @transform_0(%arg0: i32) -> (i32, i32, i32) {
    %c0_i32 = arith.constant 0 : i32
    %c0_i32_0 = arith.constant 0 : i32
    %c0_i32_1 = arith.constant 0 : i32
    return %arg0, %c0_i32, %c0_i32_0 : i32, i32, i32
  }
  func.func @transform_1(%arg0: i32) -> (i32, i32, i32) {
    %c0_i32 = arith.constant 0 : i32
    %c0_i32_0 = arith.constant 0 : i32
    %c0_i32_1 = arith.constant 0 : i32
    %c0_i32_2 = arith.constant 0 : i32
    return %c0_i32, %c0_i32_0, %c0_i32_1 : i32, i32, i32
  }
  func.func @transform_2(%arg0: i32) -> (i32, i32) {
    %c0_i32 = arith.constant 0 : i32
    %c0_i32_0 = arith.constant 0 : i32
    %c0_i32_1 = arith.constant 0 : i32
    return %c0_i32, %c0_i32_0 : i32, i32
  }
  func.func @transform_3(%arg0: i32) -> (i32, i32, i32) {
    %c0_i32 = arith.constant 0 : i32
    %c0_i32_0 = arith.constant 0 : i32
    %c0_i32_1 = arith.constant 0 : i32
    %c0_i32_2 = arith.constant 0 : i32
    return %c0_i32, %c0_i32_0, %c0_i32_1 : i32, i32, i32
  }
  func.func @transform_4(%arg0: i32) -> (i32, i32) {
    %c0_i32 = arith.constant 0 : i32
    %c0_i32_0 = arith.constant 0 : i32
    %c0_i32_1 = arith.constant 0 : i32
    return %c0_i32, %c0_i32_0 : i32, i32
  }
  func.func @transform_5(%arg0: i32) -> (i32, i32, i32) {
    %c0_i32 = arith.constant 0 : i32
    %c0_i32_0 = arith.constant 0 : i32
    %c0_i32_1 = arith.constant 0 : i32
    %c0_i32_2 = arith.constant 0 : i32
    return %c0_i32, %c0_i32_0, %c0_i32_1 : i32, i32, i32
  }
  func.func @transform_6(%arg0: i32) -> (i32, i32) {
    %c0_i32 = arith.constant 0 : i32
    %c0_i32_0 = arith.constant 0 : i32
    %c0_i32_1 = arith.constant 0 : i32
    return %c0_i32, %c0_i32_0 : i32, i32
  }
  func.func @transform_7(%arg0: i32) -> (i32, i32) {
    %c0_i32 = arith.constant 0 : i32
    %c0_i32_0 = arith.constant 0 : i32
    %c0_i32_1 = arith.constant 0 : i32
    return %c0_i32, %c0_i32_0 : i32, i32
  }
  func.func @transform_8(%arg0: i32) -> (i32, i32) {
    %c0_i32 = arith.constant 0 : i32
    %c0_i32_0 = arith.constant 0 : i32
    %c0_i32_1 = arith.constant 0 : i32
    return %c0_i32, %c0_i32_0 : i32, i32
  }
  func.func @transform_9(%arg0: i32) -> (i32, i32) {
    %c0_i32 = arith.constant 0 : i32
    %c0_i32_0 = arith.constant 0 : i32
    %c0_i32_1 = arith.constant 0 : i32
    return %c0_i32, %c0_i32_0 : i32, i32
  }
  func.func @transform_10(%arg0: i32) -> (i32, i32) {
    %c0_i32 = arith.constant 0 : i32
    %c0_i32_0 = arith.constant 0 : i32
    %c0_i32_1 = arith.constant 0 : i32
    return %c0_i32, %c0_i32_0 : i32, i32
  }
  func.func @transform_11(%arg0: i32) -> (i32, i32) {
    %c0_i32 = arith.constant 0 : i32
    %c0_i32_0 = arith.constant 0 : i32
    return %arg0, %c0_i32 : i32, i32
  }
}

</mosaic_0001>

<bundles_post_ra>
// kernel: network_forward.1
= control target key start
LH: loop header
LB: loop body
LE: loop exit
PB: predicated region body
PF: predicated region fallthrough
CT: control target
= control target key end

     0   :  { %vm225_vm0 = vcmask 1043456   ;;  %v7063_v3 = vmov 0.0   ;;  %vm7064_vm1 = vmmov 1   ;;  %v10095_v10 = vmov 0  ;;  %s7066_s21 = smov 122   ;;  %s10069_s1 = inlined_call_operand.vmem [shape: f32[5,28,144], index: 1, kind: input, shape index: {}]   ;;  %s10070_s0 = inlined_call_operand.vmem [shape: f32[8,28,28], index: 0, kind: input, shape index: {}]   ;;  %s10071_s3 = inlined_call_operand.vmem [shape: f32[5,138,96], index: 3, kind: input, shape index: {}]   ;;  %s10072_s2 = inlined_call_operand.vmem [shape: f32[1,144], index: 2, kind: input, shape index: {}]   ;;  %s10073_s5 = inlined_call_operand.vmem [shape: f32[4,84,120], index: 5, kind: input, shape index: {}]   ;;  %s10074_s4 = inlined_call_operand.vmem [shape: f32[1,96], index: 4, kind: input, shape index: {}]   ;;  %s10075_s7 = inlined_call_operand.vmem [shape: f32[120,60], index: 7, kind: input, shape index: {}]   ;;  %s10076_s9 = inlined_call_operand.vmem [shape: f32[60,10], index: 9, kind: input, shape index: {}]   ;;  %s10077_s6 = inlined_call_operand.vmem [shape: f32[1,120], index: 6, kind: input, shape index: {}]   ;;  %s10078_s8 = inlined_call_operand.vmem [shape: f32[1,60], index: 8, kind: input, shape index: {}]   ;;  %s10079_s10 = inlined_call_operand.vmem [shape: f32[1,10], index: 10, kind: input, shape index: {}]   ;;  %s10080_s11 = inlined_call_operand.vmem [shape: f32[128,10], index: 11, kind: output, shape index: {}]  }
   0x1   :  { %v5486_v0 = vld [vmem:[%s10069_s1 + $0x48] sm:$0xff]  ;;  %v5488_v1 = vld [vmem:[%s10069_s1 + $0x58] sm:$0xff]  ;;  %v5485_v2 = vld [vmem:[%s10069_s1 + $0x40] sm:$0xff]  ;;  %296 = vmatprep.mubr.f32.mxu0 %v7063_v3  ;;  %vm110_vm3 = vcmask 1046528   ;;  %vm176_vm4 = vcmask 228352   ;;  %vm704_vm5 = vcmask 1045504  }
   0x2   :  { %v6383_v4 = vpack.c.bf16 %v5488_v1, %v5486_v0  ;;  %v5487_v5 = vld [vmem:[%s10069_s1 + $0x50] sm:$0xff]  ;;  %v5490_v6 = vld [vmem:[%s10069_s1 + $0x68] sm:$0xff]  ;;  %v5492_v7 = vld [vmem:[%s10069_s1 + $0x78] sm:$0xf]  ;;  %vm1081_vm6 = vcmask 1044480   ;;  %vm2661_vm7 = vcmask 1041408  }
   0x3   :  { %v6385_v8 = vpack.c.bf16 %v5487_v5, %v5485_v2  ;;  %v6387_v9 = vpack.c.bf16 %v5492_v7, %v5490_v6  ;;  %vm7149_vm2 = vmpackc.low %vm225_vm0, %vm7064_vm1  ;;  %v5489_v11 = vld [vmem:[%s10069_s1 + $0x60] sm:$0xff]  ;;  %v5491_v12 = vld [vmem:[%s10069_s1 + $0x70] sm:$0xf]  ;;  %vm2326_vm9 = vcmask 998400   ;;  %vm2628_vm10 = vcmask 80896  }
   0x4   :  { %v10096_v10 = vsel %vm7149_vm2, 4294967295, %v10095_v10  ;;  %6384 = vmatprep.subr.bf16.mxu0 %v6383_v4  ;;  %v7162_v13 = vld [vmem:[%s10070_s0] sm:$0xff]  ;;  %v7167_v14 = vld [vmem:[%s10070_s0 + $0x8] sm:$0xff]  ;;  %v6390_v16 = vpack.c.bf16 %v5491_v12, %v5489_v11  ;;  %v73_v19 = vld [vmem:[%s10069_s1 + $0x18] sm:$0xff]  ;;  %vm4088_vm11 = vcmask 687104   ;;  %vm4867_vm12 = vcmask 982016  }
   0x5   :  { %10097 = vst [vmem:[#allocation2_spill] sm:$0xff] %v10096_v10  ;;  %v71_v15 = vld [vmem:[%s10069_s1 + $0x8] sm:$0xff]  ;;  %6386 = vmatpush1.bf16.msra.mxu0 %v6385_v8  ;;  %v111_v17 = vrot.slane %v7162_v13, 1  ;;  %v112_v18 = vrot.slane %v7167_v14, 1  ;;  %v70_v21 = vld [vmem:[%s10069_s1] sm:$0xff]  ;;  %v72_v22 = vld [vmem:[%s10069_s1 + $0x10] sm:$0xff] }
   0x6   :  { %6389 = vmatprep.subr.msk.bf16.mxu0 %vm7149_vm2, %v6387_v9  ;;  %v6393_v20 = vpack.c.bf16 %v73_v19, %v71_v15  ;;  %v7188_v23 = vld [vmem:[%s10070_s0 + $0x10] sm:$0xff]  ;;  %v6395_v25 = vpack.c.bf16 %v72_v22, %v70_v21  ;;  %v7197_v27 = vld [vmem:[%s10070_s0 + $0x18] sm:$0xf]  ;;  %v75_v28 = vld [vmem:[%s10069_s1 + $0x28] sm:$0xff]  ;;  %vm5092_vm13 = vcmask 490496  }
   0x7   :  { %v113_v24 = vsel %vm110_vm3, %v111_v17, %v112_v18  ;;  %v114_v26 = vrot.slane %v7188_v23, 1  ;;  %v77_v29 = vld [vmem:[%s10069_s1 + $0x38] sm:$0xf]  ;;  %v74_v30 = vld [vmem:[%s10069_s1 + $0x20] sm:$0xff]  ;;  %v116_v32 = vrot.slane %v7197_v27, 1  ;;  %v7223_v36 = vld [vmem:[%s10070_s0 + $0x28] sm:$0xff] }
   0x8   :  { %v6397_v33 = vpack.c.bf16 %v77_v29, %v75_v28  ;;  %v76_v34 = vld [vmem:[%s10069_s1 + $0x30] sm:$0xf]  ;;  %v7218_v35 = vld [vmem:[%s10070_s0 + $0x20] sm:$0xff]  ;;  %v119_v40 = vrot.slane %v7223_v36, 1  ;;  %v5546_v42 = vld [vmem:[%s10069_s1 + $0x88] sm:$0xff] }
   0x9   :  { %6392 = vmatpush1.bf16.msk.msra.mxu0 %vm7149_vm2, %v6390_v16  ;;  %v115_v31 = vsel %vm110_vm3, %v112_v18, %v114_v26  ;;  %v6400_v37 = vpack.c.bf16 %v76_v34, %v74_v30  ;;  %v117_v38 = vsel %vm110_vm3, %v114_v26, %v116_v32  ;;  %v118_v39 = vrot.slane %v7218_v35, 1  ;;  %v7237_v41 = vld [vmem:[%s10070_s0 + $0x30] sm:$0xff]  ;;  %v5548_v43 = vld [vmem:[%s10069_s1 + $0x98] sm:$0xff]  ;;  %v7261_v50 = vld [vmem:[%s10070_s0 + $0x40] sm:$0xff] }
   0xa   :  { %6394 = vmatprep.subr.bf16.mxu0 %v6393_v20  ;;  %v6403_v44 = vpack.c.bf16 %v5548_v43, %v5546_v42  ;;  %v121_v46 = vrot.slane %v7237_v41, 1  ;;  %v7252_v47 = vld [vmem:[%s10070_s0 + $0x38] sm:$0xf]  ;;  %v7266_v51 = vld [vmem:[%s10070_s0 + $0x48] sm:$0xff]  ;;  %v125_v53 = vrot.slane %v7261_v50, 1  ;;  %v7276_v55 = vld [vmem:[%s10070_s0 + $0x50] sm:$0xff] }
   0xb   :  { %v120_v45 = vsel %vm110_vm3, %v118_v39, %v119_v40  ;;  %v123_v49 = vrot.slane %v7252_v47, 1  ;;  %v126_v54 = vrot.slane %v7266_v51, 1  ;;  %v128_v57 = vrot.slane %v7276_v55, 1  ;;  %v7285_v58 = vld [vmem:[%s10070_s0 + $0x58] sm:$0xf]  ;;  %v7294_v61 = vld [vmem:[%s10070_s0 + $0x60] sm:$0xff]  ;;  %vm8006_vm8 = vmpackc.low %vm2661_vm7, %vm7064_vm1 }
   0xc   :  { %5495 = vmatmul.mubr.msk.f32.vlgmr.msra.gmra.mrb[0].mxu0 %vm176_vm4, %v113_v24  ;;  %v122_v48 = vsel %vm110_vm3, %v119_v40, %v121_v46  ;;  %v130_v60 = vrot.slane %v7285_v58, 1  ;;  %v7299_v62 = vld [vmem:[%s10070_s0 + $0x68] sm:$0xff]  ;;  %v132_v0 = vrot.slane %v7294_v61, 1  ;;  %v7309_v2 = vld [vmem:[%s10070_s0 + $0x70] sm:$0xff]  ;;  %v7318_v6 = vld [vmem:[%s10070_s0 + $0x78] sm:$0xf] }
   0xd   :  { %6396 = vmatpush1.bf16.msra.mxu0 %v6395_v25  ;;  %302 = vmatprep.mubr.f32.mxu0 %v7063_v3  ;;  %v124_v52 = vsel %vm110_vm3, %v121_v46, %v123_v49  ;;  %v127_v56 = vsel %vm110_vm3, %v125_v53, %v126_v54  ;;  %v129_v59 = vsel %vm110_vm3, %v126_v54, %v128_v57  ;;  %v133_v1 = vrot.slane %v7299_v62, 1  ;;  %v7327_v9 = vld [vmem:[%s10070_s0 + $0x80] sm:$0xff]  ;;  %v7332_v11 = vld [vmem:[%s10070_s0 + $0x88] sm:$0xff]  ;;  %v7342_v17 = vld [vmem:[%s10070_s0 + $0x90] sm:$0xff] }
   0xe   :  { %6399 = vmatprep.subr.msk.bf16.mxu0 %vm7149_vm2, %v6397_v33  ;;  %v131_v63 = vsel %vm110_vm3, %v128_v57, %v130_v60  ;;  %v135_v5 = vrot.slane %v7309_v2, 1  ;;  %v137_v8 = vrot.slane %v7318_v6, 1  ;;  %v139_v15 = vrot.slane %v7327_v9, 1  ;;  %v7351_v20 = vld [vmem:[%s10070_s0 + $0x98] sm:$0xf]  ;;  %v7360_v24 = vld [vmem:[%s10070_s0 + $0xa0] sm:$0xff] }
   0xf   :  { %v134_v4 = vsel %vm110_vm3, %v132_v0, %v133_v1  ;;  %v140_v16 = vrot.slane %v7332_v11, 1  ;;  %v142_v19 = vrot.slane %v7342_v17, 1  ;;  %v144_v22 = vrot.slane %v7351_v20, 1  ;;  %v7365_v25 = vld [vmem:[%s10070_s0 + $0xa8] sm:$0xff]  ;;  %v7375_v30 = vld [vmem:[%s10070_s0 + $0xb0] sm:$0xff]  ;;  %v7426_v53 = vld [vmem:[%s10070_s0 + $0xe0] sm:$0xff] }
  0x10   :  { %5496 = vmatmul.mubr.msk.f32.gmra.mrb[2].mxu0 %vm176_vm4, %v115_v31  ;;  %v136_v7 = vsel %vm110_vm3, %v133_v1, %v135_v5  ;;  %v138_v12 = vsel %vm110_vm3, %v135_v5, %v137_v8  ;;  %v146_v28 = vrot.slane %v7360_v24, 1  ;;  %v147_v29 = vrot.slane %v7365_v25, 1  ;;  %v7384_v33 = vld [vmem:[%s10070_s0 + $0xb8] sm:$0xf]  ;;  %v7398_v39 = vld [vmem:[%s10070_s0 + $0xc8] sm:$0xff]  ;;  %v7441_v60 = vld [vmem:[%s10070_s0 + $0xf0] sm:$0xff] }
  0x11   :  { %308 = vmatprep.mubr.f32.mxu0 %v7063_v3  ;;  %6402 = vmatpush1.bf16.msk.msra.mxu0 %vm7149_vm2, %v6400_v37  ;;  %v141_v18 = vsel %vm110_vm3, %v139_v15, %v140_v16  ;;  %v143_v21 = vsel %vm110_vm3, %v140_v16, %v142_v19  ;;  %v145_v26 = vsel %vm110_vm3, %v142_v19, %v144_v22  ;;  %v149_v32 = vrot.slane %v7375_v30, 1  ;;  %v7431_v54 = vld [vmem:[%s10070_s0 + $0xe8] sm:$0xff]  ;;  %v7450_v1 = vld [vmem:[%s10070_s0 + $0xf8] sm:$0xf]  ;;  %v5545_v8 = vld [vmem:[%s10069_s1 + $0x80] sm:$0xff] }
  0x12   :  { %6404 = vmatprep.subr.bf16.mxu0 %v6403_v44  ;;  %v148_v31 = vsel %vm110_vm3, %v146_v28, %v147_v29  ;;  %v151_v37 = vrot.slane %v7384_v33, 1  ;;  %v154_v43 = vrot.slane %v7398_v39, 1  ;;  %v7408_v44 = vld [vmem:[%s10070_s0 + $0xd0] sm:$0xff]  ;;  %v160_v57 = vrot.slane %v7426_v53, 1  ;;  %v5550_v15 = vld [vmem:[%s10069_s1 + $0xa8] sm:$0xff]  ;;  %v5582_v28 = vld [vmem:[%s10069_s1 + $0xd8] sm:$0xff] }
  0x13   :  { %v150_v34 = vsel %vm110_vm3, %v147_v29, %v149_v32  ;;  %v156_v46 = vrot.slane %v7408_v44, 1  ;;  %v163_v0 = vrot.slane %v7441_v60, 1  ;;  %v165_v5 = vrot.slane %v7450_v1, 1  ;;  %v5552_v16 = vld [vmem:[%s10069_s1 + $0xb8] sm:$0xf] }
  0x14   :  { %5497 = vmatmul.mubr.msk.f32.gmra.mrb[4].mxu0 %vm176_vm4, %v117_v38  ;;  %v7393_v38 = vld [vmem:[%s10070_s0 + $0xc0] sm:$0xff]  ;;  %v152_v40 = vsel %vm110_vm3, %v149_v32, %v151_v37  ;;  %v6407_v19 = vpack.c.bf16 %v5552_v16, %v5550_v15  ;;  %v5551_v22 = vld [vmem:[%s10069_s1 + $0xb0] sm:$0xf]  ;;  %v705_v32 = vrot.slane %v7162_v13, 2  ;;  %v713_v15 = vrot.slane %v7223_v36, 2 }
  0x15   :  { %314 = vmatprep.mubr.f32.mxu0 %v7063_v3  ;;  %v153_v42 = vrot.slane %v7393_v38, 1  ;;  %v157_v49 = vsel %vm110_vm3, %v154_v43, %v156_v46  ;;  %v5579_v37 = vld [vmem:[%s10069_s1 + $0xc0] sm:$0xff] }
  0x18   :  { %5498 = vmatmul.mubr.msk.f32.gmra.mrb[6].mxu0 %vm176_vm4, %v120_v45  ;;  %v155_v45 = vsel %vm110_vm3, %v153_v42, %v154_v43  ;;  %v5584_v42 = vld [vmem:[%s10069_s1 + $0xe8] sm:$0xff]  ;;  %v5586_v43 = vld [vmem:[%s10069_s1 + $0xf8] sm:$0xf] }
  0x19   :  { %320 = vmatprep.mubr.f32.mxu0 %v7063_v3 }
  0x1c   :  { %5499 = vmatmul.mubr.msk.f32.gmra.mrb[8].mxu0 %vm176_vm4, %v122_v48  ;;  %v7417_v48 = vld [vmem:[%s10070_s0 + $0xd8] sm:$0xf] }
  0x1d   :  { %326 = vmatprep.mubr.f32.mxu0 %v7063_v3 }
  0x20   :  { %5500 = vmatmul.mubr.msk.f32.gmra.mrb[10].mxu0 %vm176_vm4, %v124_v52  ;;  %v158_v52 = vrot.slane %v7417_v48, 1 }
  0x21   :  { %332 = vmatprep.mubr.f32.mxu0 %v7063_v3 }
  0x24   :  { %5501 = vmatmul.mubr.msk.f32.gmra.mrb[12].mxu0 %vm176_vm4, %v127_v56  ;;  %v159_v56 = vsel %vm110_vm3, %v156_v46, %v158_v52  ;;  %v6417_v52 = vpack.c.bf16 %v5586_v43, %v5584_v42  ;;  %v727_v42 = vrot.slane %v7299_v62, 2 }
  0x25   :  { %338 = vmatprep.mubr.f32.mxu0 %v7063_v3 }
  0x28   :  { %5502 = vmatmul.mubr.msk.f32.gmra.mrb[14].mxu0 %vm176_vm4, %v129_v59  ;;  %v161_v59 = vrot.slane %v7431_v54, 1 }
  0x29   :  { %344 = vmatprep.mubr.f32.mxu0 %v7063_v3 }
  0x2c   :  { %5503 = vmatmul.mubr.msk.f32.gmra.mrb[16].mxu0 %vm176_vm4, %v131_v63  ;;  %v162_v63 = vsel %vm110_vm3, %v160_v57, %v161_v59  ;;  %v5585_v57 = vld [vmem:[%s10069_s1 + $0xf0] sm:$0xf] }
  0x2d   :  { %350 = vmatprep.mubr.f32.mxu0 %v7063_v3 }
  0x30   :  { %5504 = vmatmul.mubr.msk.f32.gmra.mrb[18].mxu0 %vm176_vm4, %v134_v4  ;;  %v164_v4 = vsel %vm110_vm3, %v161_v59, %v163_v0  ;;  %v5614_v59 = vld [vmem:[%s10069_s1 + $0x108] sm:$0xff] }
  0x31   :  { %356 = vmatprep.mubr.f32.mxu0 %v7063_v3 }
  0x34   :  { %5505 = vmatmul.mubr.msk.f32.gmra.mrb[20].mxu0 %vm176_vm4, %v136_v7  ;;  %v166_v7 = vsel %vm110_vm3, %v163_v0, %v165_v5 }
  0x35   :  { %362 = vmatprep.mubr.f32.mxu0 %v7063_v3 }
  0x38   :  { %5506 = vmatmul.mubr.msk.f32.gmra.mrb[22].mxu0 %vm176_vm4, %v138_v12  ;;  %v5547_v12 = vld [vmem:[%s10069_s1 + $0x90] sm:$0xff] }
  0x39   :  { %368 = vmatprep.mubr.f32.mxu0 %v7063_v3 }
  0x3c   :  { %5507 = vmatmul.mubr.msk.f32.gmra.mrb[24].mxu0 %vm176_vm4, %v141_v18  ;;  %v6405_v18 = vpack.c.bf16 %v5547_v12, %v5545_v8  ;;  %v712_v12 = vrot.slane %v7218_v35, 2 }
  0x3d   :  { %374 = vmatprep.mubr.f32.mxu0 %v7063_v3 }
  0x3e   :  { %v714_v16 = vsel %vm704_vm5, %v712_v12, %v713_v15 }
  0x40   :  { %5508 = vmatmul.mubr.msk.f32.gmra.mrb[26].mxu0 %vm176_vm4, %v143_v21  ;;  %v5549_v21 = vld [vmem:[%s10069_s1 + $0xa0] sm:$0xff] }
  0x41   :  { %380 = vmatprep.mubr.f32.mxu0 %v7063_v3  ;;  %v6410_v29 = vpack.c.bf16 %v5551_v22, %v5549_v21  ;;  %v717_v21 = vrot.slane %v7252_v47, 2 }
  0x44   :  { %5509 = vmatmul.mubr.msk.f32.gmra.mrb[28].mxu0 %vm176_vm4, %v145_v26  ;;  %v5580_v26 = vld [vmem:[%s10069_s1 + $0xc8] sm:$0xff] }
  0x45   :  { %386 = vmatprep.mubr.f32.mxu0 %v7063_v3 }
  0x48   :  { %5510 = vmatmul.mubr.msk.f32.gmra.mrb[30].mxu0 %vm176_vm4, %v148_v31  ;;  %v6413_v31 = vpack.c.bf16 %v5582_v28, %v5580_v26  ;;  %v719_v26 = vrot.slane %v7261_v50, 2  ;;  %v720_v28 = vrot.slane %v7266_v51, 2 }
  0x49   :  { %392 = vmatprep.mubr.f32.mxu0 %v7063_v3 }
  0x4c   :  { %5511 = vmatmul.mubr.msk.f32.gmra.mrb[32].mxu0 %vm176_vm4, %v150_v34  ;;  %v706_v34 = vrot.slane %v7167_v14, 2 }
  0x4d   :  { %398 = vmatprep.mubr.f32.mxu0 %v7063_v3 }
  0x50   :  { %5512 = vmatmul.mubr.msk.f32.gmra.mrb[34].mxu0 %vm176_vm4, %v152_v40  ;;  %v5581_v40 = vld [vmem:[%s10069_s1 + $0xd0] sm:$0xff] }
  0x51   :  { %404 = vmatprep.mubr.f32.mxu0 %v7063_v3  ;;  %v6415_v46 = vpack.c.bf16 %v5581_v40, %v5579_v37  ;;  %v726_v40 = vrot.slane %v7294_v61, 2 }
  0x53   :  { %v728_v43 = vsel %vm704_vm5, %v726_v40, %v727_v42 }
  0x54   :  { %5513 = vmatmul.mubr.msk.f32.gmra.mrb[36].mxu0 %vm176_vm4, %v155_v45  ;;  %v707_v45 = vsel %vm704_vm5, %v705_v32, %v706_v34 }
  0x55   :  { %410 = vmatprep.mubr.f32.mxu0 %v7063_v3 }
  0x58   :  { %5514 = vmatmul.mubr.msk.f32.gmra.mrb[38].mxu0 %vm176_vm4, %v157_v49  ;;  %v708_v49 = vrot.slane %v7188_v23, 2 }
  0x59   :  { %416 = vmatprep.mubr.f32.mxu0 %v7063_v3 }
  0x5a   :  { %v709_v0 = vsel %vm704_vm5, %v706_v34, %v708_v49  ;;  %v724_v34 = vrot.slane %v7285_v58, 2 }
  0x5c   :  { %5515 = vmatmul.mubr.msk.f32.gmra.mrb[40].mxu0 %vm176_vm4, %v159_v56  ;;  %v5583_v56 = vld [vmem:[%s10069_s1 + $0xe0] sm:$0xff] }
  0x5d   :  { %422 = vmatprep.mubr.f32.mxu0 %v7063_v3  ;;  %v6420_v5 = vpack.c.bf16 %v5585_v57, %v5583_v56  ;;  %v733_v56 = vrot.slane %v7327_v9, 2  ;;  %v734_v57 = vrot.slane %v7332_v11, 2 }
  0x60   :  { %5516 = vmatmul.mubr.msk.f32.gmra.mrb[42].mxu0 %vm176_vm4, %v162_v63  ;;  %v5616_v63 = vld [vmem:[%s10069_s1 + $0x118] sm:$0xff] }
  0x61   :  { %428 = vmatprep.mubr.f32.mxu0 %v7063_v3 }
  0x64   :  { %5517 = vmatmul.mubr.msk.f32.gmra.mrb[44].mxu0 %vm176_vm4, %v164_v4  ;;  %v710_v4 = vrot.slane %v7197_v27, 2 }
  0x65   :  { %434 = vmatprep.mubr.f32.mxu0 %v7063_v3 }
  0x66   :  { %v711_v8 = vsel %vm704_vm5, %v708_v49, %v710_v4  ;;  %v731_v49 = vrot.slane %v7318_v6, 2  ;;  %v738_v4 = vrot.slane %v7351_v20, 2 }
  0x68   :  { %5518 = vmatmul.mubr.msk.f32.gmra.mrb[46].mxu0 %vm176_vm4, %v166_v7  ;;  %v6423_v7 = vpack.c.bf16 %v5616_v63, %v5614_v59  ;;  %v735_v59 = vsel %vm704_vm5, %v733_v56, %v734_v57  ;;  %v736_v63 = vrot.slane %v7342_v17, 2  ;;  %v5613_v56 = vld [vmem:[%s10069_s1 + $0x100] sm:$0xff] }
  0x69   :  { %559 = vmatprep.mubr.f32.mxu0 %v7063_v3 }
  0x6c   :  { %5521 = vmatmul.mubr.msk.f32.vlgmr.msra.gmra.mrb[0].mxu0 %vm176_vm4, %v7162_v13 }
  0x6d   :  { %6406 = vmatpush1.bf16.msra.mxu0 %v6405_v18  ;;  %565 = vmatprep.mubr.f32.mxu0 %v7063_v3  ;;  %v715_v18 = vrot.slane %v7237_v41, 2 }
  0x6e   :  { %6409 = vmatprep.subr.msk.bf16.mxu0 %vm7149_vm2, %v6407_v19 }
  0x6f   :  { %v716_v19 = vsel %vm704_vm5, %v713_v15, %v715_v18  ;;  %v718_v22 = vsel %vm704_vm5, %v715_v18, %v717_v21  ;;  %v743_v15 = vrot.slane %v7375_v30, 2  ;;  %v745_v18 = vrot.slane %v7384_v33, 2 }
  0x70   :  { %5522 = vmatmul.mubr.msk.f32.gmra.mrb[2].mxu0 %vm176_vm4, %v7167_v14  ;;  %v747_v21 = vrot.slane %v7393_v38, 2 }
  0x71   :  { %571 = vmatprep.mubr.f32.mxu0 %v7063_v3  ;;  %6412 = vmatpush1.bf16.msk.msra.mxu0 %vm7149_vm2, %v6410_v29  ;;  %v721_v29 = vsel %vm704_vm5, %v719_v26, %v720_v28 }
  0x72   :  { %6414 = vmatprep.subr.bf16.mxu0 %v6413_v31  ;;  %v722_v31 = vrot.slane %v7276_v55, 2 }
  0x74   :  { %5523 = vmatmul.mubr.msk.f32.gmra.mrb[4].mxu0 %vm176_vm4, %v7188_v23  ;;  %v723_v32 = vsel %vm704_vm5, %v720_v28, %v722_v31  ;;  %v725_v37 = vsel %vm704_vm5, %v722_v31, %v724_v34  ;;  %v750_v28 = vrot.slane %v7408_v44, 2  ;;  %v752_v31 = vrot.slane %v7417_v48, 2 }
  0x75   :  { %577 = vmatprep.mubr.f32.mxu0 %v7063_v3  ;;  %v754_v34 = vrot.slane %v7426_v53, 2 }
  0x78   :  { %5524 = vmatmul.mubr.msk.f32.gmra.mrb[6].mxu0 %vm176_vm4, %v7218_v35 }
  0x79   :  { %583 = vmatprep.mubr.f32.mxu0 %v7063_v3 }
  0x7c   :  { %5525 = vmatmul.mubr.msk.f32.gmra.mrb[8].mxu0 %vm176_vm4, %v7223_v36 }
  0x7d   :  { %589 = vmatprep.mubr.f32.mxu0 %v7063_v3 }
  0x80   :  { %5526 = vmatmul.mubr.msk.f32.gmra.mrb[10].mxu0 %vm176_vm4, %v7237_v41 }
  0x81   :  { %595 = vmatprep.mubr.f32.mxu0 %v7063_v3 }
  0x84   :  { %5527 = vmatmul.mubr.msk.f32.gmra.mrb[12].mxu0 %vm176_vm4, %v7261_v50 }
  0x85   :  { %601 = vmatprep.mubr.f32.mxu0 %v7063_v3 }
  0x88   :  { %5528 = vmatmul.mubr.msk.f32.gmra.mrb[14].mxu0 %vm176_vm4, %v7266_v51 }
  0x89   :  { %607 = vmatprep.mubr.f32.mxu0 %v7063_v3 }
  0x8c   :  { %5529 = vmatmul.mubr.msk.f32.gmra.mrb[16].mxu0 %vm176_vm4, %v7276_v55 }
  0x8d   :  { %613 = vmatprep.mubr.f32.mxu0 %v7063_v3 }
  0x90   :  { %5530 = vmatmul.mubr.msk.f32.gmra.mrb[18].mxu0 %vm176_vm4, %v7294_v61 }
  0x91   :  { %619 = vmatprep.mubr.f32.mxu0 %v7063_v3 }
  0x94   :  { %5531 = vmatmul.mubr.msk.f32.gmra.mrb[20].mxu0 %vm176_vm4, %v7299_v62 }
  0x95   :  { %625 = vmatprep.mubr.f32.mxu0 %v7063_v3 }
  0x98   :  { %5532 = vmatmul.mubr.msk.f32.gmra.mrb[22].mxu0 %vm176_vm4, %v7309_v2 }
  0x99   :  { %631 = vmatprep.mubr.f32.mxu0 %v7063_v3 }
  0x9c   :  { %5533 = vmatmul.mubr.msk.f32.gmra.mrb[24].mxu0 %vm176_vm4, %v7327_v9 }
  0x9d   :  { %637 = vmatprep.mubr.f32.mxu0 %v7063_v3 }
  0xa0   :  { %5534 = vmatmul.mubr.msk.f32.gmra.mrb[26].mxu0 %vm176_vm4, %v7332_v11 }
  0xa1   :  { %643 = vmatprep.mubr.f32.mxu0 %v7063_v3 }
  0xa4   :  { %5535 = vmatmul.mubr.msk.f32.gmra.mrb[28].mxu0 %vm176_vm4, %v7342_v17 }
  0xa5   :  { %649 = vmatprep.mubr.f32.mxu0 %v7063_v3 }
  0xa8   :  { %5536 = vmatmul.mubr.msk.f32.gmra.mrb[30].mxu0 %vm176_vm4, %v7360_v24 }
  0xa9   :  { %655 = vmatprep.mubr.f32.mxu0 %v7063_v3 }
  0xac   :  { %5537 = vmatmul.mubr.msk.f32.gmra.mrb[32].mxu0 %vm176_vm4, %v7365_v25 }
  0xad   :  { %661 = vmatprep.mubr.f32.mxu0 %v7063_v3 }
  0xb0   :  { %5538 = vmatmul.mubr.msk.f32.gmra.mrb[34].mxu0 %vm176_vm4, %v7375_v30 }
  0xb1   :  { %667 = vmatprep.mubr.f32.mxu0 %v7063_v3 }
  0xb4   :  { %5539 = vmatmul.mubr.msk.f32.gmra.mrb[36].mxu0 %vm176_vm4, %v7393_v38 }
  0xb5   :  { %673 = vmatprep.mubr.f32.mxu0 %v7063_v3 }
  0xb8   :  { %5540 = vmatmul.mubr.msk.f32.gmra.mrb[38].mxu0 %vm176_vm4, %v7398_v39 }
  0xb9   :  { %679 = vmatprep.mubr.f32.mxu0 %v7063_v3 }
  0xbc   :  { %5541 = vmatmul.mubr.msk.f32.gmra.mrb[40].mxu0 %vm176_vm4, %v7408_v44 }
  0xbd   :  { %685 = vmatprep.mubr.f32.mxu0 %v7063_v3 }
  0xc0   :  { %5542 = vmatmul.mubr.msk.f32.gmra.mrb[42].mxu0 %vm176_vm4, %v7426_v53 }
  0xc1   :  { %691 = vmatprep.mubr.f32.mxu0 %v7063_v3 }
  0xc4   :  { %5543 = vmatmul.mubr.msk.f32.gmra.mrb[44].mxu0 %vm176_vm4, %v7431_v54 }
  0xc5   :  { %697 = vmatprep.mubr.f32.mxu0 %v7063_v3 }
  0xc8   :  { %5544 = vmatmul.mubr.msk.f32.gmra.mrb[46].mxu0 %vm176_vm4, %v7441_v60 }
  0xc9   :  { %888 = vmatprep.mubr.f32.mxu0 %v7063_v3 }
  0xcc   :  { %5555 = vmatmul.mubr.msk.f32.vlgmr.msra.gmra.mrb[0].mxu0 %vm176_vm4, %v707_v45  ;;  %v729_v45 = vrot.slane %v7309_v2, 2 }
  0xcd   :  { %6416 = vmatpush1.bf16.msra.mxu0 %v6415_v46  ;;  %894 = vmatprep.mubr.f32.mxu0 %v7063_v3 }
  0xce   :  { %6419 = vmatprep.subr.msk.bf16.mxu0 %vm7149_vm2, %v6417_v52  ;;  %v730_v46 = vsel %vm704_vm5, %v727_v42, %v729_v45  ;;  %v732_v52 = vsel %vm704_vm5, %v729_v45, %v731_v49  ;;  %v757_v42 = vrot.slane %v7441_v60, 2  ;;  %v759_v45 = vrot.slane %v7450_v1, 2 }
  0xcf   :  { %v1082_v49 = vrot.slane %v7162_v13, 3 }
  0xd0   :  { %5556 = vmatmul.mubr.msk.f32.gmra.mrb[2].mxu0 %vm176_vm4, %v709_v0  ;;  %v737_v0 = vsel %vm704_vm5, %v734_v57, %v736_v63  ;;  %v5615_v57 = vld [vmem:[%s10069_s1 + $0x110] sm:$0xff] }
  0xd1   :  { %900 = vmatprep.mubr.f32.mxu0 %v7063_v3  ;;  %6422 = vmatpush1.bf16.msk.msra.mxu0 %vm7149_vm2, %v6420_v5  ;;  %v739_v5 = vsel %vm704_vm5, %v736_v63, %v738_v4  ;;  %v5620_v63 = vld [vmem:[%s10069_s1 + $0x138] sm:$0xf]  ;;  %v6425_v4 = vpack.c.bf16 %v5615_v57, %v5613_v56  ;;  %v1106_v57 = vrot.slane %v7309_v2, 3 }
  0xd2   :  { %6424 = vmatprep.subr.bf16.mxu0 %v6423_v7  ;;  %v740_v7 = vrot.slane %v7360_v24, 2 }
  0xd4   :  { %5557 = vmatmul.mubr.msk.f32.gmra.mrb[4].mxu0 %vm176_vm4, %v711_v8  ;;  %v741_v8 = vrot.slane %v7365_v25, 2 }
  0xd5   :  { %906 = vmatprep.mubr.f32.mxu0 %v7063_v3 }
  0xd6   :  { %v742_v12 = vsel %vm704_vm5, %v740_v7, %v741_v8 }
  0xd8   :  { %5558 = vmatmul.mubr.msk.f32.gmra.mrb[6].mxu0 %vm176_vm4, %v714_v16  ;;  %v744_v16 = vsel %vm704_vm5, %v741_v8, %v743_v15  ;;  %v5617_v8 = vld [vmem:[%s10069_s1 + $0x120] sm:$0xff] }
  0xd9   :  { %912 = vmatprep.mubr.f32.mxu0 %v7063_v3 }
  0xdc   :  { %5559 = vmatmul.mubr.msk.f32.gmra.mrb[8].mxu0 %vm176_vm4, %v716_v19  ;;  %v746_v19 = vsel %vm704_vm5, %v743_v15, %v745_v18 }
  0xdd   :  { %918 = vmatprep.mubr.f32.mxu0 %v7063_v3 }
  0xe0   :  { %5560 = vmatmul.mubr.msk.f32.gmra.mrb[10].mxu0 %vm176_vm4, %v718_v22  ;;  %v748_v22 = vrot.slane %v7398_v39, 2 }
  0xe1   :  { %924 = vmatprep.mubr.f32.mxu0 %v7063_v3 }
  0xe2   :  { %v749_v26 = vsel %vm704_vm5, %v747_v21, %v748_v22  ;;  %v1089_v21 = vrot.slane %v7218_v35, 3 }
  0xe4   :  { %5561 = vmatmul.mubr.msk.f32.gmra.mrb[12].mxu0 %vm176_vm4, %v721_v29  ;;  %v751_v29 = vsel %vm704_vm5, %v748_v22, %v750_v28  ;;  %v1090_v22 = vrot.slane %v7223_v36, 3 }
  0xe5   :  { %930 = vmatprep.mubr.f32.mxu0 %v7063_v3 }
  0xe8   :  { %5562 = vmatmul.mubr.msk.f32.gmra.mrb[14].mxu0 %vm176_vm4, %v723_v32  ;;  %v753_v32 = vsel %vm704_vm5, %v750_v28, %v752_v31  ;;  %v1092_v28 = vrot.slane %v7237_v41, 3  ;;  %v1094_v31 = vrot.slane %v7252_v47, 3 }
  0xe9   :  { %936 = vmatprep.mubr.f32.mxu0 %v7063_v3 }
  0xec   :  { %5563 = vmatmul.mubr.msk.f32.gmra.mrb[16].mxu0 %vm176_vm4, %v725_v37  ;;  %v755_v37 = vrot.slane %v7431_v54, 2 }
  0xed   :  { %942 = vmatprep.mubr.f32.mxu0 %v7063_v3 }
  0xee   :  { %v756_v40 = vsel %vm704_vm5, %v754_v34, %v755_v37  ;;  %v1096_v34 = vrot.slane %v7261_v50, 3 }
  0xf0   :  { %5564 = vmatmul.mubr.msk.f32.gmra.mrb[18].mxu0 %vm176_vm4, %v728_v43  ;;  %v758_v43 = vsel %vm704_vm5, %v755_v37, %v757_v42  ;;  %v1097_v37 = vrot.slane %v7266_v51, 3 }
  0xf1   :  { %948 = vmatprep.mubr.f32.mxu0 %v7063_v3 }
  0xf4   :  { %5565 = vmatmul.mubr.msk.f32.gmra.mrb[20].mxu0 %vm176_vm4, %v730_v46  ;;  %v760_v46 = vsel %vm704_vm5, %v757_v42, %v759_v45  ;;  %v1099_v42 = vrot.slane %v7276_v55, 3  ;;  %v1101_v45 = vrot.slane %v7285_v58, 3 }
  0xf5   :  { %954 = vmatprep.mubr.f32.mxu0 %v7063_v3 }
  0xf8   :  { %5566 = vmatmul.mubr.msk.f32.gmra.mrb[22].mxu0 %vm176_vm4, %v732_v52  ;;  %v1083_v52 = vrot.slane %v7167_v14, 3 }
  0xf9   :  { %960 = vmatprep.mubr.f32.mxu0 %v7063_v3 }
  0xfc   :  { %5567 = vmatmul.mubr.msk.f32.gmra.mrb[24].mxu0 %vm176_vm4, %v735_v59  ;;  %v5618_v59 = vld [vmem:[%s10069_s1 + $0x128] sm:$0xff] }
  0xfd   :  { %966 = vmatprep.mubr.f32.mxu0 %v7063_v3  ;;  %v6427_v7 = vpack.c.bf16 %v5620_v63, %v5618_v59  ;;  %v1108_v63 = vrot.slane %v7318_v6, 3 }
 0x100   :  { %5568 = vmatmul.mubr.msk.f32.gmra.mrb[26].mxu0 %vm176_vm4, %v737_v0  ;;  %v1084_v0 = vsel %vm1081_vm6, %v1082_v49, %v1083_v52  ;;  %v1103_v49 = vrot.slane %v7294_v61, 3 }
 0x101   :  { %972 = vmatprep.mubr.f32.mxu0 %v7063_v3 }
 0x104   :  { %5569 = vmatmul.mubr.msk.f32.gmra.mrb[28].mxu0 %vm176_vm4, %v739_v5  ;;  %v1085_v5 = vrot.slane %v7188_v23, 3 }
 0x105   :  { %978 = vmatprep.mubr.f32.mxu0 %v7063_v3 }
 0x106   :  { %v1086_v15 = vsel %vm1081_vm6, %v1083_v52, %v1085_v5  ;;  %v1104_v52 = vrot.slane %v7299_v62, 3 }
 0x108   :  { %5570 = vmatmul.mubr.msk.f32.gmra.mrb[30].mxu0 %vm176_vm4, %v742_v12  ;;  %v5619_v12 = vld [vmem:[%s10069_s1 + $0x130] sm:$0xf]  ;;  %v1105_v56 = vsel %vm1081_vm6, %v1103_v49, %v1104_v52  ;;  %v1107_v59 = vsel %vm1081_vm6, %v1104_v52, %v1106_v57  ;;  %v1134_v52 = vrot.slane %v7441_v60, 3 }
 0x109   :  { %984 = vmatprep.mubr.f32.mxu0 %v7063_v3  ;;  %v6430_v18 = vpack.c.bf16 %v5619_v12, %v5617_v8  ;;  %v1113_v8 = vrot.slane %v7342_v17, 3 }
 0x10c   :  { %5571 = vmatmul.mubr.msk.f32.gmra.mrb[32].mxu0 %vm176_vm4, %v744_v16  ;;  %v1087_v16 = vrot.slane %v7197_v27, 3 }
 0x10d   :  { %990 = vmatprep.mubr.f32.mxu0 %v7063_v3 }
 0x110   :  { %5572 = vmatmul.mubr.msk.f32.gmra.mrb[34].mxu0 %vm176_vm4, %v746_v19  ;;  %v1088_v19 = vsel %vm1081_vm6, %v1085_v5, %v1087_v16  ;;  %v1111_v5 = vrot.slane %v7332_v11, 3 }
 0x111   :  { %996 = vmatprep.mubr.f32.mxu0 %v7063_v3 }
 0x112   :  { %v1114_v12 = vsel %vm1081_vm6, %v1111_v5, %v1113_v8 }
 0x114   :  { %5573 = vmatmul.mubr.msk.f32.gmra.mrb[36].mxu0 %vm176_vm4, %v749_v26  ;;  %v1091_v26 = vsel %vm1081_vm6, %v1089_v21, %v1090_v22 }
 0x115   :  { %1002 = vmatprep.mubr.f32.mxu0 %v7063_v3 }
 0x118   :  { %5574 = vmatmul.mubr.msk.f32.gmra.mrb[38].mxu0 %vm176_vm4, %v751_v29  ;;  %v1093_v29 = vsel %vm1081_vm6, %v1090_v22, %v1092_v28  ;;  %v1120_v22 = vrot.slane %v7375_v30, 3 }
 0x119   :  { %1008 = vmatprep.mubr.f32.mxu0 %v7063_v3 }
 0x11c   :  { %5575 = vmatmul.mubr.msk.f32.gmra.mrb[40].mxu0 %vm176_vm4, %v753_v32  ;;  %v1095_v32 = vsel %vm1081_vm6, %v1092_v28, %v1094_v31  ;;  %v1122_v28 = vrot.slane %v7384_v33, 3  ;;  %v1124_v31 = vrot.slane %v7393_v38, 3 }
 0x11d   :  { %1014 = vmatprep.mubr.f32.mxu0 %v7063_v3 }
 0x120   :  { %5576 = vmatmul.mubr.msk.f32.gmra.mrb[42].mxu0 %vm176_vm4, %v756_v40  ;;  %v1098_v40 = vsel %vm1081_vm6, %v1096_v34, %v1097_v37 }
 0x121   :  { %1020 = vmatprep.mubr.f32.mxu0 %v7063_v3 }
 0x124   :  { %5577 = vmatmul.mubr.msk.f32.gmra.mrb[44].mxu0 %vm176_vm4, %v758_v43  ;;  %v1100_v43 = vsel %vm1081_vm6, %v1097_v37, %v1099_v42  ;;  %v1127_v37 = vrot.slane %v7408_v44, 3 }
 0x125   :  { %1026 = vmatprep.mubr.f32.mxu0 %v7063_v3 }
 0x128   :  { %5578 = vmatmul.mubr.msk.f32.gmra.mrb[46].mxu0 %vm176_vm4, %v760_v46  ;;  %v1102_v46 = vsel %vm1081_vm6, %v1099_v42, %v1101_v45  ;;  %v1129_v42 = vrot.slane %v7417_v48, 3  ;;  %v1131_v45 = vrot.slane %v7426_v53, 3 }
 0x129   :  { %1265 = vmatprep.mubr.f32.mxu0 %v7063_v3 }
 0x12c   :  { %5589 = vmatmul.mubr.msk.f32.vlgmr.msra.gmra.mrb[0].mxu0 %vm176_vm4, %v1084_v0  ;;  %v1109_v0 = vsel %vm1081_vm6, %v1106_v57, %v1108_v63  ;;  %v1136_v57 = vrot.slane %v7450_v1, 3  ;;  %v1458_v63 = vrot.slane %v7162_v13, 4 }
 0x12d   :  { %6426 = vmatpush1.bf16.msra.mxu0 %v6425_v4  ;;  %1271 = vmatprep.mubr.f32.mxu0 %v7063_v3  ;;  %v1110_v4 = vrot.slane %v7327_v9, 3 }
 0x12e   :  { %6429 = vmatprep.subr.msk.bf16.mxu0 %vm7149_vm2, %v6427_v7 }
 0x12f   :  { %v1112_v7 = vsel %vm1081_vm6, %v1110_v4, %v1111_v5  ;;  %v1461_v5 = vrot.slane %v7188_v23, 4 }
 0x130   :  { %5590 = vmatmul.mubr.msk.f32.gmra.mrb[2].mxu0 %vm176_vm4, %v1086_v15  ;;  %v1115_v15 = vrot.slane %v7351_v20, 3 }
 0x131   :  { %1277 = vmatprep.mubr.f32.mxu0 %v7063_v3  ;;  %6432 = vmatpush1.bf16.msk.msra.mxu0 %vm7149_vm2, %v6430_v18  ;;  %v1117_v18 = vrot.slane %v7360_v24, 3 }
 0x132   :  { %v1116_v16 = vsel %vm1081_vm6, %v1113_v8, %v1115_v15  ;;  %v1463_v8 = vrot.slane %v7197_v27, 4  ;;  %v1468_v15 = vrot.slane %v7237_v41, 4 }
 0x134   :  { %5591 = vmatmul.mubr.msk.f32.gmra.mrb[4].mxu0 %vm176_vm4, %v1088_v19  ;;  %v1118_v19 = vrot.slane %v7365_v25, 3  ;;  %v1464_v13 = vsel %vm225_vm0, %v1461_v5, %v1463_v8  ;;  %v5654_v8 = vld [vmem:[%s10071_s3 + $0xc8] sm:$0xff] }
 0x135   :  { %1283 = vmatprep.mubr.f32.mxu0 %v7063_v3 }
 0x136   :  { %v1119_v21 = vsel %vm1081_vm6, %v1117_v18, %v1118_v19  ;;  %v1473_v18 = vrot.slane %v7266_v51, 4  ;;  %v1479_v51 = vrot.slane %v7294_v61, 4 }
 0x138   :  { %5592 = vmatmul.mubr.msk.f32.gmra.mrb[6].mxu0 %vm176_vm4, %v1091_v26  ;;  %v1121_v26 = vsel %vm1081_vm6, %v1118_v19, %v1120_v22  ;;  %v1475_v19 = vrot.slane %v7276_v55, 4 }
 0x139   :  { %1289 = vmatprep.mubr.f32.mxu0 %v7063_v3 }
 0x13c   :  { %5593 = vmatmul.mubr.msk.f32.gmra.mrb[8].mxu0 %vm176_vm4, %v1093_v29  ;;  %v1123_v29 = vsel %vm1081_vm6, %v1120_v22, %v1122_v28  ;;  %v1480_v22 = vrot.slane %v7299_v62, 4  ;;  %v1484_v28 = vrot.slane %v7318_v6, 4  ;;  %v1486_v62 = vrot.slane %v7327_v9, 4 }
 0x13d   :  { %1295 = vmatprep.mubr.f32.mxu0 %v7063_v3 }
 0x13e   :  { %v1481_v55 = vsel %vm225_vm0, %v1479_v51, %v1480_v22 }
 0x140   :  { %5594 = vmatmul.mubr.msk.f32.gmra.mrb[10].mxu0 %vm176_vm4, %v1095_v32  ;;  %v1125_v32 = vrot.slane %v7398_v39, 3 }
 0x141   :  { %1301 = vmatprep.mubr.f32.mxu0 %v7063_v3 }
 0x142   :  { %v1126_v34 = vsel %vm1081_vm6, %v1124_v31, %v1125_v32  ;;  %v1489_v31 = vrot.slane %v7342_v17, 4 }
 0x144   :  { %5595 = vmatmul.mubr.msk.f32.gmra.mrb[12].mxu0 %vm176_vm4, %v1098_v40  ;;  %v1128_v40 = vsel %vm1081_vm6, %v1125_v32, %v1127_v37  ;;  %v1491_v32 = vrot.slane %v7351_v20, 4 }
 0x145   :  { %1307 = vmatprep.mubr.f32.mxu0 %v7063_v3 }
 0x146   :  { %v1492_v9 = vsel %vm225_vm0, %v1489_v31, %v1491_v32  ;;  %v5662_v32 = vld [vmem:[%s10071_s3 + $0x108] sm:$0xff] }
 0x148   :  { %5596 = vmatmul.mubr.msk.f32.gmra.mrb[14].mxu0 %vm176_vm4, %v1100_v43  ;;  %v1130_v43 = vsel %vm1081_vm6, %v1127_v37, %v1129_v42  ;;  %v1496_v37 = vrot.slane %v7375_v30, 4  ;;  %v1501_v42 = vrot.slane %v7398_v39, 4  ;;  %v1507_v39 = vrot.slane %v7426_v53, 4 }
 0x149   :  { %1313 = vmatprep.mubr.f32.mxu0 %v7063_v3 }
 0x14c   :  { %5597 = vmatmul.mubr.msk.f32.gmra.mrb[16].mxu0 %vm176_vm4, %v1102_v46  ;;  %v1132_v46 = vrot.slane %v7431_v54, 3 }
 0x14d   :  { %1319 = vmatprep.mubr.f32.mxu0 %v7063_v3 }
 0x14e   :  { %v1133_v49 = vsel %vm1081_vm6, %v1131_v45, %v1132_v46  ;;  %v1505_v45 = vrot.slane %v7417_v48, 4 }
 0x150   :  { %5598 = vmatmul.mubr.msk.f32.gmra.mrb[18].mxu0 %vm176_vm4, %v1105_v56  ;;  %v1135_v56 = vsel %vm1081_vm6, %v1132_v46, %v1134_v52  ;;  %v1508_v46 = vrot.slane %v7431_v54, 4  ;;  %v10081_v54 = vmov 0.0|0.0  }
 0x151   :  { %1325 = vmatprep.mubr.f32.mxu0 %v7063_v3  ;;  %6433 = vmatprep.subr.bf16.mxu1 %v10081_v54 }
 0x154   :  { %5599 = vmatmul.mubr.msk.f32.gmra.mrb[20].mxu0 %vm176_vm4, %v1107_v59  ;;  %v1137_v59 = vsel %vm1081_vm6, %v1134_v52, %v1136_v57  ;;  %v1512_v52 = vrot.slane %v7450_v1, 4  ;;  %v5650_v57 = vld [vmem:[%s10071_s3 + $0xa8] sm:$0xff] }
 0x155   :  { %1331 = vmatprep.mubr.f32.mxu0 %v7063_v3 }
 0x158   :  { %5600 = vmatmul.mubr.msk.f32.gmra.mrb[22].mxu0 %vm176_vm4, %v1109_v0  ;;  %v1459_v0 = vrot.slane %v7167_v14, 4  ;;  %v1465_v14 = vrot.slane %v7218_v35, 4 }
 0x159   :  { %1337 = vmatprep.mubr.f32.mxu0 %v7063_v3 }
 0x15a   :  { %v1460_v4 = vsel %vm225_vm0, %v1458_v63, %v1459_v0  ;;  %v5651_v63 = vld [vmem:[%s10071_s3 + $0xb0] sm:$0xff] }
 0x15c   :  { %5601 = vmatmul.mubr.msk.f32.gmra.mrb[24].mxu0 %vm176_vm4, %v1112_v7  ;;  %v1462_v7 = vsel %vm225_vm0, %v1459_v0, %v1461_v5  ;;  %v5652_v0 = vld [vmem:[%s10071_s3 + $0xb8] sm:$0xff] }
 0x15d   :  { %1343 = vmatprep.mubr.f32.mxu0 %v7063_v3  ;;  %v6440_v5 = vpack.c.bf16 %v5652_v0, %v5651_v63 }
 0x160   :  { %5602 = vmatmul.mubr.msk.f32.gmra.mrb[26].mxu0 %vm176_vm4, %v1114_v12  ;;  %v1466_v12 = vrot.slane %v7223_v36, 4  ;;  %v1472_v36 = vrot.slane %v7261_v50, 4 }
 0x161   :  { %1349 = vmatprep.mubr.f32.mxu0 %v7063_v3 }
 0x162   :  { %v1467_v23 = vsel %vm225_vm0, %v1465_v14, %v1466_v12  ;;  %v1469_v27 = vsel %vm225_vm0, %v1466_v12, %v1468_v15  ;;  %v1474_v41 = vsel %vm225_vm0, %v1472_v36, %v1473_v18  ;;  %v5655_v12 = vld [vmem:[%s10071_s3 + $0xd0] sm:$0xff]  ;;  %v1834_v36 = vld [vmem:[%s10072_s2] sm:$0x3] }
 0x164   :  { %5603 = vmatmul.mubr.msk.f32.gmra.mrb[28].mxu0 %vm176_vm4, %v1116_v16  ;;  %v1470_v16 = vrot.slane %v7252_v47, 4  ;;  %v1476_v47 = vsel %vm225_vm0, %v1473_v18, %v1475_v19 }
 0x165   :  { %1355 = vmatprep.mubr.f32.mxu0 %v7063_v3 }
 0x166   :  { %v1471_v35 = vsel %vm225_vm0, %v1468_v15, %v1470_v16  ;;  %v5657_v16 = vld [vmem:[%s10071_s3 + $0xe0] sm:$0xff] }
 0x168   :  { %5604 = vmatmul.mubr.msk.f32.gmra.mrb[30].mxu0 %vm176_vm4, %v1119_v21  ;;  %v1477_v21 = vrot.slane %v7285_v58, 4 }
 0x169   :  { %1361 = vmatprep.mubr.f32.mxu0 %v7063_v3 }
 0x16a   :  { %v1478_v50 = vsel %vm225_vm0, %v1475_v19, %v1477_v21 }
 0x16c   :  { %5605 = vmatmul.mubr.msk.f32.gmra.mrb[32].mxu0 %vm176_vm4, %v1121_v26  ;;  %v1482_v26 = vrot.slane %v7309_v2, 4 }
 0x16d   :  { %1367 = vmatprep.mubr.f32.mxu0 %v7063_v3 }
 0x16e   :  { %v1483_v58 = vsel %vm225_vm0, %v1480_v22, %v1482_v26  ;;  %v1485_v61 = vsel %vm225_vm0, %v1482_v26, %v1484_v28  ;;  %v5660_v26 = vld [vmem:[%s10071_s3 + $0xf8] sm:$0xff] }
 0x170   :  { %5606 = vmatmul.mubr.msk.f32.gmra.mrb[34].mxu0 %vm176_vm4, %v1123_v29  ;;  %v1487_v29 = vrot.slane %v7332_v11, 4  ;;  %v1493_v11 = vrot.slane %v7360_v24, 4 }
 0x171   :  { %1373 = vmatprep.mubr.f32.mxu0 %v7063_v3 }
 0x172   :  { %v1488_v2 = vsel %vm225_vm0, %v1486_v62, %v1487_v29  ;;  %v1490_v6 = vsel %vm225_vm0, %v1487_v29, %v1489_v31 }
 0x174   :  { %5607 = vmatmul.mubr.msk.f32.gmra.mrb[36].mxu0 %vm176_vm4, %v1126_v34  ;;  %v1494_v34 = vrot.slane %v7365_v25, 4  ;;  %v1500_v25 = vrot.slane %v7393_v38, 4 }
 0x175   :  { %1379 = vmatprep.mubr.f32.mxu0 %v7063_v3 }
 0x176   :  { %v1495_v17 = vsel %vm225_vm0, %v1493_v11, %v1494_v34  ;;  %v1497_v20 = vsel %vm225_vm0, %v1494_v34, %v1496_v37  ;;  %v1502_v30 = vsel %vm225_vm0, %v1500_v25, %v1501_v42 }
 0x178   :  { %5608 = vmatmul.mubr.msk.f32.gmra.mrb[38].mxu0 %vm176_vm4, %v1128_v40  ;;  %v1498_v40 = vrot.slane %v7384_v33, 4 }
 0x179   :  { %1385 = vmatprep.mubr.f32.mxu0 %v7063_v3 }
 0x17a   :  { %v1499_v24 = vsel %vm225_vm0, %v1496_v37, %v1498_v40 }
 0x17c   :  { %5609 = vmatmul.mubr.msk.f32.gmra.mrb[40].mxu0 %vm176_vm4, %v1130_v43  ;;  %v1503_v43 = vrot.slane %v7408_v44, 4  ;;  %v1509_v44 = vsel %vm225_vm0, %v1507_v39, %v1508_v46 }
 0x17d   :  { %1391 = vmatprep.mubr.f32.mxu0 %v7063_v3 }
 0x17e   :  { %v1504_v33 = vsel %vm225_vm0, %v1501_v42, %v1503_v43  ;;  %v1506_v38 = vsel %vm225_vm0, %v1503_v43, %v1505_v45  ;;  %v5663_v43 = vld [vmem:[%s10071_s3 + $0x110] sm:$0xff] }
 0x180   :  { %5610 = vmatmul.mubr.msk.f32.gmra.mrb[42].mxu0 %vm176_vm4, %v1133_v49  ;;  %v1510_v49 = vrot.slane %v7441_v60, 4  ;;  %v5647_v60 = vld [vmem:[%s10071_s3 + $0x90] sm:$0xff] }
 0x181   :  { %1397 = vmatprep.mubr.f32.mxu0 %v7063_v3 }
 0x182   :  { %v1511_v48 = vsel %vm225_vm0, %v1508_v46, %v1510_v49  ;;  %v1513_v53 = vsel %vm225_vm0, %v1510_v49, %v1512_v52 }
 0x184   :  { %5611 = vmatmul.mubr.msk.f32.gmra.mrb[44].mxu0 %vm176_vm4, %v1135_v56  ;;  %v5648_v56 = vld [vmem:[%s10071_s3 + $0x98] sm:$0xff] }
 0x185   :  { %1403 = vmatprep.mubr.f32.mxu0 %v7063_v3  ;;  %v6434_v1 = vpack.c.bf16 %v5648_v56, %v5647_v60 }
 0x187   :  { %6435 = vmatpush1.bf16.msra.mxu1 %v6434_v1 }
 0x188   :  { %5612 = vmatmul.mubr.msk.f32.gmra.mrb[46].mxu0 %vm176_vm4, %v1137_v59  ;;  %6436 = vmatprep.subr.bf16.mxu1 %v10081_v54 }
 0x189   :  { %1641 = vmatprep.mubr.f32.mxu0 %v7063_v3 }
 0x18c   :  { %5623 = vmatmul.mubr.msk.f32.vlgmr.msra.gmra.mrb[0].mxu0 %vm176_vm4, %v1460_v4  ;;  %v1836_v4 = vlaneseq }
 0x18d   :  { %1647 = vmatprep.mubr.f32.mxu0 %v7063_v3 }
 0x18e   :  { %v1837_v14 = vshrl.u32 %v1836_v4, 7 }
 0x190   :  { %5624 = vmatmul.mubr.msk.f32.gmra.mrb[2].mxu0 %vm176_vm4, %v1462_v7  ;;  %v5653_v7 = vld [vmem:[%s10071_s3 + $0xc0] sm:$0xff]  ;;  %v1842_v18 = vsub.s32 1, %v1837_v14 }
 0x191   :  { %1653 = vmatprep.mubr.f32.mxu0 %v7063_v3 }
 0x194   :  { %5625 = vmatmul.mubr.msk.f32.gmra.mrb[4].mxu0 %vm176_vm4, %v1464_v13  ;;  %v6443_v13 = vpack.c.bf16 %v5654_v8, %v5653_v7 }
 0x195   :  { %1659 = vmatprep.mubr.f32.mxu0 %v7063_v3 }
 0x198   :  { %5626 = vmatmul.mubr.msk.f32.gmra.mrb[6].mxu0 %vm176_vm4, %v1467_v23  ;;  %v5656_v23 = vld [vmem:[%s10071_s3 + $0xd8] sm:$0xff] }
 0x199   :  { %1665 = vmatprep.mubr.f32.mxu0 %v7063_v3  ;;  %v6446_v15 = vpack.c.bf16 %v5656_v23, %v5655_v12 }
 0x19c   :  { %5627 = vmatmul.mubr.msk.f32.gmra.mrb[8].mxu0 %vm176_vm4, %v1469_v27  ;;  %v1838_v27 = vsub.s32 0, %v1837_v14 }
 0x19d   :  { %1671 = vmatprep.mubr.f32.mxu0 %v7063_v3 }
 0x19e   :  { %v7966_v19 = vrot.slane %v1834_v36, %v1838_v27 }
 0x1a0   :  { %5628 = vmatmul.mubr.msk.f32.gmra.mrb[10].mxu0 %vm176_vm4, %v1471_v35  ;;  %v5658_v35 = vld [vmem:[%s10071_s3 + $0xe8] sm:$0xff] }
 0x1a1   :  { %1677 = vmatprep.mubr.f32.mxu0 %v7063_v3 }
 0x1a4   :  { %5629 = vmatmul.mubr.msk.f32.gmra.mrb[12].mxu0 %vm176_vm4, %v1474_v41  ;;  %v6449_v41 = vpack.c.bf16 %v5658_v35, %v5657_v16 }
 0x1a5   :  { %1683 = vmatprep.mubr.f32.mxu0 %v7063_v3 }
 0x1a8   :  { %5630 = vmatmul.mubr.msk.f32.gmra.mrb[14].mxu0 %vm176_vm4, %v1476_v47  ;;  %v7969_v47 = vrot.slane %v1834_v36, %v1842_v18 }
 0x1a9   :  { %1689 = vmatprep.mubr.f32.mxu0 %v7063_v3 }
 0x1ac   :  { %5631 = vmatmul.mubr.msk.f32.gmra.mrb[16].mxu0 %vm176_vm4, %v1478_v50 }
 0x1ad   :  { %1695 = vmatprep.mubr.f32.mxu0 %v7063_v3 }
 0x1b0   :  { %5632 = vmatmul.mubr.msk.f32.gmra.mrb[18].mxu0 %vm176_vm4, %v1481_v55  ;;  %v5659_v55 = vld [vmem:[%s10071_s3 + $0xf0] sm:$0xff] }
 0x1b1   :  { %1701 = vmatprep.mubr.f32.mxu0 %v7063_v3 }
 0x1b4   :  { %5633 = vmatmul.mubr.msk.f32.gmra.mrb[20].mxu0 %vm176_vm4, %v1483_v58  ;;  %v6452_v58 = vpack.c.bf16 %v5660_v26, %v5659_v55 }
 0x1b5   :  { %1707 = vmatprep.mubr.f32.mxu0 %v7063_v3 }
 0x1b8   :  { %5634 = vmatmul.mubr.msk.f32.gmra.mrb[22].mxu0 %vm176_vm4, %v1485_v61 }
 0x1b9   :  { %1713 = vmatprep.mubr.f32.mxu0 %v7063_v3 }
 0x1bc   :  { %5635 = vmatmul.mubr.msk.f32.gmra.mrb[24].mxu0 %vm176_vm4, %v1488_v2 }
 0x1bd   :  { %1719 = vmatprep.mubr.f32.mxu0 %v7063_v3 }
 0x1c0   :  { %5636 = vmatmul.mubr.msk.f32.gmra.mrb[26].mxu0 %vm176_vm4, %v1490_v6  ;;  %v5661_v6 = vld [vmem:[%s10071_s3 + $0x100] sm:$0xff] }
 0x1c1   :  { %1725 = vmatprep.mubr.f32.mxu0 %v7063_v3  ;;  %v6455_v11 = vpack.c.bf16 %v5662_v32, %v5661_v6 }
 0x1c4   :  { %5637 = vmatmul.mubr.msk.f32.gmra.mrb[28].mxu0 %vm176_vm4, %v1492_v9 }
 0x1c5   :  { %1731 = vmatprep.mubr.f32.mxu0 %v7063_v3 }
 0x1c8   :  { %5638 = vmatmul.mubr.msk.f32.gmra.mrb[30].mxu0 %vm176_vm4, %v1495_v17 }
 0x1c9   :  { %1737 = vmatprep.mubr.f32.mxu0 %v7063_v3 }
 0x1cc   :  { %5639 = vmatmul.mubr.msk.f32.gmra.mrb[32].mxu0 %vm176_vm4, %v1497_v20 }
 0x1cd   :  { %1743 = vmatprep.mubr.f32.mxu0 %v7063_v3 }
 0x1d0   :  { %5640 = vmatmul.mubr.msk.f32.gmra.mrb[34].mxu0 %vm176_vm4, %v1499_v24 }
 0x1d1   :  { %1749 = vmatprep.mubr.f32.mxu0 %v7063_v3 }
 0x1d4   :  { %5641 = vmatmul.mubr.msk.f32.gmra.mrb[36].mxu0 %vm176_vm4, %v1502_v30 }
 0x1d5   :  { %1755 = vmatprep.mubr.f32.mxu0 %v7063_v3 }
 0x1d8   :  { %5642 = vmatmul.mubr.msk.f32.gmra.mrb[38].mxu0 %vm176_vm4, %v1504_v33  ;;  %v5664_v33 = vld [vmem:[%s10071_s3 + $0x118] sm:$0x3] }
 0x1d9   :  { %1761 = vmatprep.mubr.f32.mxu0 %v7063_v3  ;;  %v6458_v39 = vpack.c.bf16 %v5664_v33, %v5663_v43 }
 0x1dc   :  { %5643 = vmatmul.mubr.msk.f32.gmra.mrb[40].mxu0 %vm176_vm4, %v1506_v38 }
 0x1dd   :  { %1767 = vmatprep.mubr.f32.mxu0 %v7063_v3 }
 0x1e0   :  { %5644 = vmatmul.mubr.msk.f32.gmra.mrb[42].mxu0 %vm176_vm4, %v1509_v44 }
 0x1e1   :  { %1773 = vmatprep.mubr.f32.mxu0 %v7063_v3 }
 0x1e4   :  { %5645 = vmatmul.mubr.msk.f32.gmra.mrb[44].mxu0 %vm176_vm4, %v1511_v48 }
 0x1e5   :  { %1779 = vmatprep.mubr.f32.mxu0 %v7063_v3  ;;  %v5649_v3 = vld [vmem:[%s10071_s3 + $0xa0] sm:$0xff] }
 0x1e6   :  { %v6437_v59 = vpack.c.bf16 %v5650_v57, %v5649_v3 }
 0x1e8   :  { %5646 = vmatmul.mubr.msk.f32.gmra.mrb[46].mxu0 %vm176_vm4, %v1513_v53  ;;  %6438 = vmatpush1.bf16.msra.mxu1 %v6437_v59 }
 0x1e9   :  { %6439 = vmatprep.subr.bf16.mxu1 %v10081_v54 }
 0x1ec   :  { %6441 = vmatpush1.bf16.msra.mxu1 %v6440_v5 }
 0x1ed   :  { %6442 = vmatprep.subr.bf16.mxu1 %v10081_v54 }
 0x1f0   :  { %6444 = vmatpush1.bf16.msra.mxu1 %v6443_v13 }
 0x1f1   :  { %6445 = vmatprep.subr.bf16.mxu1 %v10081_v54 }
 0x1f4   :  { %6447 = vmatpush1.bf16.msra.mxu1 %v6446_v15 }
 0x1f5   :  { %6448 = vmatprep.subr.bf16.mxu1 %v10081_v54 }
 0x1f8   :  { %6450 = vmatpush1.bf16.msra.mxu1 %v6449_v41 }
 0x1f9   :  { %6451 = vmatprep.subr.bf16.mxu1 %v10081_v54 }
 0x1fc   :  { %6453 = vmatpush1.bf16.msra.mxu1 %v6452_v58 }
 0x1fd   :  { %6454 = vmatprep.subr.bf16.mxu1 %v10081_v54 }
 0x200   :  { %6456 = vmatpush1.bf16.msra.mxu1 %v6455_v11 }
 0x201   :  { %6457 = vmatprep.subr.bf16.mxu1 %v10081_v54 }
 0x204   :  { %6460 = vmatpush1.bf16.msk.msra.mxu1 %vm8006_vm8, %v6458_v39 }
 0x205   :  { %6461 = vmatprep.subr.bf16.mxu1 %v10081_v54 }
 0x25f   :  { %v1643_v21 = vpop.f32.mrb[0].mxu0 }
 0x260   :  { %v1846_v50 = vadd.f32 %v7966_v19, %v1643_v21  ;;  %v1645_v51 = vpop.f32.mrb[1].mxu0 }
 0x261   :  { %v1847_v22 = vadd.f32 %v7969_v47, %v1645_v51 }
 0x262   :  { %v1894_v61 = vmax.f32 %v1846_v50, 0.0 }
 0x263   :  { %v1649_v28 = vpop.f32.mrb[2].mxu0  ;;  %v1895_v2 = vmax.f32 %v1847_v22, 0.0 }
 0x264   :  { %v1848_v62 = vadd.f32 %v7966_v19, %v1649_v28  ;;  %v1651_v29 = vpop.f32.mrb[3].mxu0  ;;  %v7989_v37 = vrot.slane %v1894_v61, 1 }
 0x265   :  { %v1849_v31 = vadd.f32 %v7969_v47, %v1651_v29  ;;  %v7992_v25 = vrot.slane %v1895_v2, 1 }
 0x266   :  { %v1896_v9 = vmax.f32 %v1848_v62, 0.0 }
 0x267   :  { %v1897_v34 = vmax.f32 %v1849_v31, 0.0  ;;  %v1655_v17 = vpop.f32.mrb[4].mxu0 }
 0x268   :  { %v1991_v20 = vrot.slane %v1896_v9, 1  ;;  %v1850_v40 = vadd.f32 %v7966_v19, %v1655_v17  ;;  %v1657_v24 = vpop.f32.mrb[5].mxu0 }
 0x269   :  { %v1994_v42 = vrot.slane %v1897_v34, 1  ;;  %v1851_v30 = vadd.f32 %v7969_v47, %v1657_v24 }
 0x26a   :  { %v1898_v45 = vmax.f32 %v1850_v40, 0.0  ;;  %v1992_v38 = vsel %vm110_vm3, %v7989_v37, %v1991_v20 }
 0x26b   :  { %v1899_v44 = vmax.f32 %v1851_v30, 0.0  ;;  %v1661_v49 = vpop.f32.mrb[6].mxu0  ;;  %v1995_v48 = vsel %vm110_vm3, %v7992_v25, %v1994_v42  ;;  %v8012_v52 = vmax.f32 %v1894_v61, %v1992_v38 }
 0x26c   :  { %v1996_v53 = vrot.slane %v1898_v45, 1  ;;  %v1852_v60 = vadd.f32 %v7966_v19, %v1661_v49  ;;  %v1663_v56 = vpop.f32.mrb[7].mxu0  ;;  %v8015_v1 = vmax.f32 %v1895_v2, %v1995_v48 }
 0x26d   :  { %v1998_v3 = vrot.slane %v1899_v44, 1  ;;  %v1853_v57 = vadd.f32 %v7969_v47, %v1663_v56 }
 0x26e   :  { %v1900_v59 = vmax.f32 %v1852_v60, 0.0  ;;  %2232 = vrot.lane.b32.xlu0 %v8015_v1, %s7066_s21  ;;  %v1997_v63 = vsel %vm110_vm3, %v1991_v20, %v1996_v53 }
 0x26f   :  { %v1901_v0 = vmax.f32 %v1853_v57, 0.0  ;;  %v1667_v4 = vpop.f32.mrb[8].mxu0  ;;  %v1999_v5 = vsel %vm110_vm3, %v1994_v42, %v1998_v3  ;;  %v8025_v7 = vmax.f32 %v1896_v9, %v1997_v63 }
 0x270   :  { %v2000_v8 = vrot.slane %v1900_v59, 1  ;;  %v1854_v13 = vadd.f32 %v7966_v19, %v1667_v4  ;;  %v1669_v14 = vpop.f32.mrb[9].mxu0  ;;  %v8028_v12 = vmax.f32 %v1897_v34, %v1999_v5 }
 0x271   :  { %v2002_v23 = vrot.slane %v1901_v0, 1  ;;  %v1855_v15 = vadd.f32 %v7969_v47, %v1669_v14  ;;  %v6944_v27 = vpack.i.bf16 %v8025_v7, %v8012_v52 }
 0x272   :  { %v1902_v16 = vmax.f32 %v1854_v13, 0.0  ;;  %2236 = vrot.lane.b32.xlu1 %v8028_v12, %s7066_s21  ;;  %v2001_v35 = vsel %vm110_vm3, %v1996_v53, %v2000_v8 }
 0x273   :  { %v1903_v36 = vmax.f32 %v1855_v15, 0.0  ;;  %6945 = vrot.lane.b32.xlu0 %v6944_v27, %s7066_s21  ;;  %v1673_v18 = vpop.f32.mrb[10].mxu0  ;;  %v2003_v41 = vsel %vm110_vm3, %v1998_v3, %v2002_v23  ;;  %v8038_v21 = vmax.f32 %v1898_v45, %v2001_v35 }
 0x274   :  { %v2004_v50 = vrot.slane %v1902_v16, 1  ;;  %v1856_v51 = vadd.f32 %v7966_v19, %v1673_v18  ;;  %v1675_v22 = vpop.f32.mrb[11].mxu0  ;;  %v8041_v55 = vmax.f32 %v1899_v44, %v2003_v41 }
 0x275   :  { %v2006_v26 = vrot.slane %v1903_v36, 1  ;;  %v1857_v58 = vadd.f32 %v7969_v47, %v1675_v22 }
 0x276   :  { %v1904_v28 = vmax.f32 %v1856_v51, 0.0  ;;  %v2005_v61 = vsel %vm110_vm3, %v2000_v8, %v2004_v50 }
 0x277   :  { %v1905_v62 = vmax.f32 %v1857_v58, 0.0  ;;  %2240 = vrot.lane.b32.xlu0 %v8041_v55, %s7066_s21  ;;  %v1679_v29 = vpop.f32.mrb[12].mxu0  ;;  %v8047_v2 = vmax.f32 %v1900_v59, %v2005_v61  ;;  %v2007_v31 = vsel %vm110_vm3, %v2002_v23, %v2006_v26 }
 0x278   :  { %v2008_v6 = vrot.slane %v1904_v28, 1  ;;  %v1858_v32 = vadd.f32 %v7966_v19, %v1679_v29  ;;  %v1681_v9 = vpop.f32.mrb[13].mxu0  ;;  %v8051_v11 = vmax.f32 %v1901_v0, %v2007_v31 }
 0x279   :  { %v2010_v34 = vrot.slane %v1905_v62, 1  ;;  %v1859_v17 = vadd.f32 %v7969_v47, %v1681_v9  ;;  %v6949_v20 = vpack.i.bf16 %v8047_v2, %v8038_v21 }
 0x27a   :  { %v1906_v40 = vmax.f32 %v1858_v32, 0.0  ;;  %v2009_v24 = vsel %vm110_vm3, %v2004_v50, %v2008_v6 }
 0x27b   :  { %v1907_v42 = vmax.f32 %v1859_v17, 0.0  ;;  %6950 = vrot.lane.b32.xlu1 %v6949_v20, %s7066_s21  ;;  %v1685_v30 = vpop.f32.mrb[14].mxu0  ;;  %v2011_v43 = vsel %vm110_vm3, %v2006_v26, %v2010_v34  ;;  %v8059_v33 = vmax.f32 %v1902_v16, %v2009_v24 }
 0x27c   :  { %v2012_v45 = vrot.slane %v1906_v40, 1  ;;  %v1860_v38 = vadd.f32 %v7966_v19, %v1685_v30  ;;  %v1687_v39 = vpop.f32.mrb[15].mxu0  ;;  %v8062_v44 = vmax.f32 %v1903_v36, %v2011_v43 }
 0x27d   :  { %v2014_v49 = vrot.slane %v1907_v42, 1  ;;  %v1861_v48 = vadd.f32 %v7969_v47, %v1687_v39 }
 0x27e   :  { %v1908_v53 = vmax.f32 %v1860_v38, 0.0  ;;  %v2013_v60 = vsel %vm110_vm3, %v2008_v6, %v2012_v45 }
 0x27f   :  { %v1909_v56 = vmax.f32 %v1861_v48, 0.0  ;;  %2244 = vrot.lane.b32.xlu1 %v8051_v11, %s7066_s21  ;;  %v1691_v3 = vpop.f32.mrb[16].mxu0  ;;  %v8068_v57 = vmax.f32 %v1904_v28, %v2013_v60  ;;  %v2015_v59 = vsel %vm110_vm3, %v2010_v34, %v2014_v49 }
 0x280   :  { %v2016_v63 = vrot.slane %v1908_v53, 1  ;;  %v1862_v0 = vadd.f32 %v7966_v19, %v1691_v3  ;;  %v1693_v4 = vpop.f32.mrb[17].mxu0  ;;  %v8072_v5 = vmax.f32 %v1905_v62, %v2015_v59 }
 0x281   :  { %v2018_v8 = vrot.slane %v1909_v56, 1  ;;  %v1863_v13 = vadd.f32 %v7969_v47, %v1693_v4  ;;  %v6954_v14 = vpack.i.bf16 %v8068_v57, %v8059_v33 }
 0x282   :  { %v1910_v23 = vmax.f32 %v1862_v0, 0.0  ;;  %v2017_v15 = vsel %vm110_vm3, %v2012_v45, %v2016_v63 }
 0x283   :  { %v1911_v27 = vmax.f32 %v1863_v13, 0.0  ;;  %2248 = vrot.lane.b32.xlu1 %v8062_v44, %s7066_s21  ;;  %6955 = vrot.lane.b32.xlu0 %v6954_v14, %s7066_s21  ;;  %v1697_v16 = vpop.f32.mrb[18].mxu0  ;;  %v2019_v35 = vsel %vm110_vm3, %v2014_v49, %v2018_v8  ;;  %v8082_v36 = vmax.f32 %v1906_v40, %v2017_v15 }
 0x284   :  { %v2020_v18 = vrot.slane %v1910_v23, 1  ;;  %v1864_v41 = vadd.f32 %v7966_v19, %v1697_v16  ;;  %v1699_v50 = vpop.f32.mrb[19].mxu0  ;;  %v8085_v51 = vmax.f32 %v1907_v42, %v2019_v35 }
 0x285   :  { %v2022_v22 = vrot.slane %v1911_v27, 1  ;;  %v1865_v26 = vadd.f32 %v7969_v47, %v1699_v50 }
 0x286   :  { %v1912_v58 = vmax.f32 %v1864_v41, 0.0  ;;  %v2021_v28 = vsel %vm110_vm3, %v2016_v63, %v2020_v18 }
 0x287   :  { %v1913_v61 = vmax.f32 %v1865_v26, 0.0  ;;  %2252 = vrot.lane.b32.xlu0 %v8072_v5, %s7066_s21  ;;  %v1703_v62 = vpop.f32.mrb[20].mxu0  ;;  %v8091_v29 = vmax.f32 %v1908_v53, %v2021_v28  ;;  %v2023_v31 = vsel %vm110_vm3, %v2018_v8, %v2022_v22 }
 0x288   :  { %v2024_v6 = vrot.slane %v1912_v58, 1  ;;  %v1866_v32 = vadd.f32 %v7966_v19, %v1703_v62  ;;  %v1705_v9 = vpop.f32.mrb[21].mxu0  ;;  %v8095_v34 = vmax.f32 %v1909_v56, %v2023_v31 }
 0x289   :  { %v2026_v17 = vrot.slane %v1913_v61, 1  ;;  %v1867_v20 = vadd.f32 %v7969_v47, %v1705_v9  ;;  %v6959_v40 = vpack.i.bf16 %v8091_v29, %v8082_v36 }
 0x28a   :  { %v1914_v24 = vmax.f32 %v1866_v32, 0.0  ;;  %v2025_v42 = vsel %vm110_vm3, %v2020_v18, %v2024_v6 }
 0x28b   :  { %v1915_v30 = vmax.f32 %v1867_v20, 0.0  ;;  %2256 = vrot.lane.b32.xlu0 %v8085_v51, %s7066_s21  ;;  %6960 = vrot.lane.b32.xlu1 %v6959_v40, %s7066_s21  ;;  %v1709_v43 = vpop.f32.mrb[22].mxu0  ;;  %v2027_v45 = vsel %vm110_vm3, %v2022_v22, %v2026_v17  ;;  %v8105_v38 = vmax.f32 %v1910_v23, %v2025_v42 }
 0x28c   :  { %v2028_v39 = vrot.slane %v1914_v24, 1  ;;  %v1868_v49 = vadd.f32 %v7966_v19, %v1709_v43  ;;  %v1711_v48 = vpop.f32.mrb[23].mxu0  ;;  %v8108_v53 = vmax.f32 %v1911_v27, %v2027_v45 }
 0x28d   :  { %v2030_v60 = vrot.slane %v1915_v30, 1  ;;  %v1869_v56 = vadd.f32 %v7969_v47, %v1711_v48 }
 0x28e   :  { %v1916_v3 = vmax.f32 %v1868_v49, 0.0  ;;  %v2029_v59 = vsel %vm110_vm3, %v2024_v6, %v2028_v39 }
 0x28f   :  { %v1917_v63 = vmax.f32 %v1869_v56, 0.0  ;;  %2260 = vrot.lane.b32.xlu1 %v8095_v34, %s7066_s21  ;;  %v1715_v0 = vpop.f32.mrb[24].mxu0  ;;  %v8114_v4 = vmax.f32 %v1912_v58, %v2029_v59  ;;  %v2031_v8 = vsel %vm110_vm3, %v2026_v17, %v2030_v60 }
 0x290   :  { %v2032_v13 = vrot.slane %v1916_v3, 1  ;;  %v1870_v14 = vadd.f32 %v7966_v19, %v1715_v0  ;;  %v1717_v23 = vpop.f32.mrb[25].mxu0  ;;  %v8118_v15 = vmax.f32 %v1913_v61, %v2031_v8 }
 0x291   :  { %v2034_v27 = vrot.slane %v1917_v63, 1  ;;  %v1871_v16 = vadd.f32 %v7969_v47, %v1717_v23  ;;  %v6964_v35 = vpack.i.bf16 %v8114_v4, %v8105_v38 }
 0x292   :  { %v1918_v18 = vmax.f32 %v1870_v14, 0.0  ;;  %v2033_v41 = vsel %vm110_vm3, %v2028_v39, %v2032_v13 }
 0x293   :  { %v1919_v50 = vmax.f32 %v1871_v16, 0.0  ;;  %2264 = vrot.lane.b32.xlu1 %v8108_v53, %s7066_s21  ;;  %6965 = vrot.lane.b32.xlu0 %v6964_v35, %s7066_s21  ;;  %v1721_v22 = vpop.f32.mrb[26].mxu0  ;;  %v2035_v26 = vsel %vm110_vm3, %v2030_v60, %v2034_v27  ;;  %v8128_v58 = vmax.f32 %v1914_v24, %v2033_v41 }
 0x294   :  { %v2036_v28 = vrot.slane %v1918_v18, 1  ;;  %v1872_v61 = vadd.f32 %v7966_v19, %v1721_v22  ;;  %v1723_v62 = vpop.f32.mrb[27].mxu0  ;;  %v8131_v31 = vmax.f32 %v1915_v30, %v2035_v26 }
 0x295   :  { %v2038_v6 = vrot.slane %v1919_v50, 1  ;;  %v1873_v32 = vadd.f32 %v7969_v47, %v1723_v62 }
 0x296   :  { %v1920_v9 = vmax.f32 %v1872_v61, 0.0  ;;  %v2037_v17 = vsel %vm110_vm3, %v2032_v13, %v2036_v28 }
 0x297   :  { %v1921_v20 = vmax.f32 %v1873_v32, 0.0  ;;  %2268 = vrot.lane.b32.xlu0 %v8118_v15, %s7066_s21  ;;  %v1727_v40 = vpop.f32.mrb[28].mxu0  ;;  %v8137_v42 = vmax.f32 %v1916_v3, %v2037_v17  ;;  %v2039_v24 = vsel %vm110_vm3, %v2034_v27, %v2038_v6 }
 0x298   :  { %v2040_v43 = vrot.slane %v1920_v9, 1  ;;  %v1874_v45 = vadd.f32 %v7966_v19, %v1727_v40  ;;  %v1729_v30 = vpop.f32.mrb[29].mxu0  ;;  %v8141_v39 = vmax.f32 %v1917_v63, %v2039_v24 }
 0x299   :  { %v2042_v49 = vrot.slane %v1921_v20, 1  ;;  %v1875_v48 = vadd.f32 %v7969_v47, %v1729_v30  ;;  %v6969_v60 = vpack.i.bf16 %v8137_v42, %v8128_v58 }
 0x29a   :  { %v1922_v56 = vmax.f32 %v1874_v45, 0.0  ;;  %v2041_v59 = vsel %vm110_vm3, %v2036_v28, %v2040_v43 }
 0x29b   :  { %v1923_v0 = vmax.f32 %v1875_v48, 0.0  ;;  %2272 = vrot.lane.b32.xlu0 %v8131_v31, %s7066_s21  ;;  %6970 = vrot.lane.b32.xlu1 %v6969_v60, %s7066_s21  ;;  %v1733_v3 = vpop.f32.mrb[30].mxu0  ;;  %v2043_v8 = vsel %vm110_vm3, %v2038_v6, %v2042_v49  ;;  %v8151_v63 = vmax.f32 %v1918_v18, %v2041_v59 }
 0x29c   :  { %v2044_v13 = vrot.slane %v1922_v56, 1  ;;  %v1876_v14 = vadd.f32 %v7966_v19, %v1733_v3  ;;  %v1735_v23 = vpop.f32.mrb[31].mxu0  ;;  %v8154_v27 = vmax.f32 %v1919_v50, %v2043_v8 }
 0x29d   :  { %v2046_v16 = vrot.slane %v1923_v0, 1  ;;  %v1877_v35 = vadd.f32 %v7969_v47, %v1735_v23 }
 0x29e   :  { %v1924_v41 = vmax.f32 %v1876_v14, 0.0  ;;  %v2045_v22 = vsel %vm110_vm3, %v2040_v43, %v2044_v13 }
 0x29f   :  { %v1925_v26 = vmax.f32 %v1877_v35, 0.0  ;;  %2276 = vrot.lane.b32.xlu1 %v8141_v39, %s7066_s21  ;;  %v1739_v28 = vpop.f32.mrb[32].mxu0  ;;  %v8160_v61 = vmax.f32 %v1920_v9, %v2045_v22  ;;  %v2047_v18 = vsel %vm110_vm3, %v2042_v49, %v2046_v16 }
 0x2a0   :  { %v2048_v62 = vrot.slane %v1924_v41, 1  ;;  %v1878_v6 = vadd.f32 %v7966_v19, %v1739_v28  ;;  %v1741_v50 = vpop.f32.mrb[33].mxu0  ;;  %v8164_v32 = vmax.f32 %v1921_v20, %v2047_v18 }
 0x2a1   :  { %v2050_v17 = vrot.slane %v1925_v26, 1  ;;  %v1879_v40 = vadd.f32 %v7969_v47, %v1741_v50  ;;  %v6974_v24 = vpack.i.bf16 %v8160_v61, %v8151_v63 }
 0x2a2   :  { %v1926_v43 = vmax.f32 %v1878_v6, 0.0  ;;  %v2049_v45 = vsel %vm110_vm3, %v2044_v13, %v2048_v62 }
 0x2a3   :  { %v1927_v30 = vmax.f32 %v1879_v40, 0.0  ;;  %2280 = vrot.lane.b32.xlu1 %v8154_v27, %s7066_s21  ;;  %6975 = vrot.lane.b32.xlu0 %v6974_v24, %s7066_s21  ;;  %v1745_v9 = vpop.f32.mrb[34].mxu0  ;;  %v2051_v49 = vsel %vm110_vm3, %v2046_v16, %v2050_v17  ;;  %v8174_v20 = vmax.f32 %v1922_v56, %v2049_v45 }
 0x2a4   :  { %v2052_v48 = vrot.slane %v1926_v43, 1  ;;  %v1880_v60 = vadd.f32 %v7966_v19, %v1745_v9  ;;  %v1747_v59 = vpop.f32.mrb[35].mxu0  ;;  %v8177_v3 = vmax.f32 %v1923_v0, %v2051_v49 }
 0x2a5   :  { %v2054_v8 = vrot.slane %v1927_v30, 1  ;;  %v1881_v13 = vadd.f32 %v7969_v47, %v1747_v59 }
 0x2a6   :  { %v1928_v14 = vmax.f32 %v1880_v60, 0.0  ;;  %v2053_v23 = vsel %vm110_vm3, %v2048_v62, %v2052_v48 }
 0x2a7   :  { %v1929_v35 = vmax.f32 %v1881_v13, 0.0  ;;  %2284 = vrot.lane.b32.xlu0 %v8164_v32, %s7066_s21  ;;  %v1751_v22 = vpop.f32.mrb[36].mxu0  ;;  %v8183_v16 = vmax.f32 %v1924_v41, %v2053_v23  ;;  %v2055_v56 = vsel %vm110_vm3, %v2050_v17, %v2054_v8 }
 0x2a8   :  { %v2056_v28 = vrot.slane %v1928_v14, 1  ;;  %v1882_v18 = vadd.f32 %v7966_v19, %v1751_v22  ;;  %v1753_v0 = vpop.f32.mrb[37].mxu0  ;;  %v8187_v6 = vmax.f32 %v1925_v26, %v2055_v56 }
 0x2a9   :  { %v2058_v50 = vrot.slane %v1929_v35, 1  ;;  %v1883_v40 = vadd.f32 %v7969_v47, %v1753_v0  ;;  %v6979_v62 = vpack.i.bf16 %v8183_v16, %v8174_v20 }
 0x2aa   :  { %v1930_v24 = vmax.f32 %v1882_v18, 0.0  ;;  %v2057_v45 = vsel %vm110_vm3, %v2052_v48, %v2056_v28 }
 0x2ab   :  { %v1931_v9 = vmax.f32 %v1883_v40, 0.0  ;;  %2288 = vrot.lane.b32.xlu0 %v8177_v3, %s7066_s21  ;;  %6980 = vrot.lane.b32.xlu1 %v6979_v62, %s7066_s21  ;;  %v1757_v41 = vpop.f32.mrb[38].mxu0  ;;  %v2059_v17 = vsel %vm110_vm3, %v2054_v8, %v2058_v50  ;;  %v8197_v26 = vmax.f32 %v1926_v43, %v2057_v45 }
 0x2ac   :  { %v2060_v49 = vrot.slane %v1930_v24, 1  ;;  %v1884_v60 = vadd.f32 %v7966_v19, %v1757_v41  ;;  %v1759_v59 = vpop.f32.mrb[39].mxu0  ;;  %v8200_v13 = vmax.f32 %v1927_v30, %v2059_v17 }
 0x2ad   :  { %v2062_v23 = vrot.slane %v1931_v9, 1  ;;  %v1885_v48 = vadd.f32 %v7969_v47, %v1759_v59 }
 0x2ae   :  { %v1932_v22 = vmax.f32 %v1884_v60, 0.0  ;;  %v2061_v56 = vsel %vm110_vm3, %v2056_v28, %v2060_v49 }
 0x2af   :  { %v1933_v18 = vmax.f32 %v1885_v48, 0.0  ;;  %2292 = vrot.lane.b32.xlu1 %v8187_v6, %s7066_s21  ;;  %v1763_v0 = vpop.f32.mrb[40].mxu0  ;;  %v8206_v8 = vmax.f32 %v1928_v14, %v2061_v56  ;;  %v2063_v43 = vsel %vm110_vm3, %v2058_v50, %v2062_v23 }
 0x2b0   :  { %v2064_v40 = vrot.slane %v1932_v22, 1  ;;  %v1886_v62 = vadd.f32 %v7966_v19, %v1763_v0  ;;  %v1765_v30 = vpop.f32.mrb[41].mxu0  ;;  %v8210_v45 = vmax.f32 %v1929_v35, %v2063_v43 }
 0x2b1   :  { %10100 = vst [vmem:[#allocation3_spill] sm:$0xff] %v8206_v8  ;;  %v2066_v41 = vrot.slane %v1933_v18, 1  ;;  %v1887_v17 = vadd.f32 %v7969_v47, %v1765_v30  ;;  %v6984_v28 = vpack.i.bf16 %v8206_v8, %v8197_v26 }
 0x2b2   :  { %10101 = vst [vmem:[#allocation4_spill] sm:$0xff] %v8210_v45  ;;  %v1934_v60 = vmax.f32 %v1886_v62, 0.0  ;;  %v2065_v59 = vsel %vm110_vm3, %v2060_v49, %v2064_v40 }
 0x2b3   :  { %v1935_v48 = vmax.f32 %v1887_v17, 0.0  ;;  %2296 = vrot.lane.b32.xlu1 %v8200_v13, %s7066_s21  ;;  %6985 = vrot.lane.b32.xlu0 %v6984_v28, %s7066_s21  ;;  %v1769_v14 = vpop.f32.mrb[42].mxu0  ;;  %v2067_v50 = vsel %vm110_vm3, %v2062_v23, %v2066_v41  ;;  %v8220_v35 = vmax.f32 %v1930_v24, %v2065_v59 }
 0x2b4   :  { %v2068_v56 = vrot.slane %v1934_v60, 1  ;;  %v1888_v0 = vadd.f32 %v7966_v19, %v1769_v14  ;;  %v1771_v43 = vpop.f32.mrb[43].mxu0  ;;  %v8223_v30 = vmax.f32 %v1931_v9, %v2067_v50 }
 0x2b5   :  { %10102 = vst [vmem:[#allocation5_spill] sm:$0xff] %v8220_v35  ;;  %v2070_v62 = vrot.slane %v1935_v48, 1  ;;  %v1889_v49 = vadd.f32 %v7969_v47, %v1771_v43 }
 0x2b6   :  { %v1936_v17 = vmax.f32 %v1888_v0, 0.0  ;;  %v2069_v54 = vsel %vm110_vm3, %v2064_v40, %v2068_v56 }
 0x2b7   :  { %v1937_v10 = vmax.f32 %v1889_v49, 0.0  ;;  %2300 = vrot.lane.b32.xlu0 %v8210_v45, %s7066_s21  ;;  %v1775_v28 = vpop.f32.mrb[44].mxu0  ;;  %v8229_v23 = vmax.f32 %v1932_v22, %v2069_v54  ;;  %v2071_v24 = vsel %vm110_vm3, %v2066_v41, %v2070_v62 }
 0x2b8   :  { %v2072_v59 = vrot.slane %v1936_v17, 1  ;;  %v1890_v14 = vadd.f32 %v7966_v19, %v1775_v28  ;;  %v1777_v9 = vpop.f32.mrb[45].mxu0  ;;  %v8233_v50 = vmax.f32 %v1933_v18, %v2071_v24 }
 0x2b9   :  { %10103 = vst [vmem:[#allocation6_spill] sm:$0xff] %v8229_v23  ;;  %v2074_v8 = vrot.slane %v1937_v10, 1  ;;  %v1891_v0 = vadd.f32 %v7969_v47, %v1777_v9  ;;  %v6989_v40 = vpack.i.bf16 %v8229_v23, %v8220_v35 }
 0x2ba   :  { %v1938_v43 = vmax.f32 %v1890_v14, 0.0  ;;  %v2073_v49 = vsel %vm110_vm3, %v2068_v56, %v2072_v59 }
 0x2bb   :  { %v1939_v45 = vmax.f32 %v1891_v0, 0.0  ;;  %2304 = vrot.lane.b32.xlu0 %v8223_v30, %s7066_s21  ;;  %6990 = vrot.lane.b32.xlu1 %v6989_v40, %s7066_s21  ;;  %v1781_v54 = vpop.f32.mrb[46].mxu0  ;;  %v2075_v22 = vsel %vm110_vm3, %v2070_v62, %v2074_v8  ;;  %v8243_v18 = vmax.f32 %v1934_v60, %v2073_v49 }
 0x2bc   :  { %v2076_v41 = vrot.slane %v1938_v43, 1  ;;  %v1892_v28 = vadd.f32 %v7966_v19, %v1781_v54  ;;  %v1783_v24 = vpop.f32.mrb[47].mxu0  ;;  %v8246_v9 = vmax.f32 %v1935_v48, %v2075_v22 }
 0x2bd   :  { %v2078_v14 = vrot.slane %v1939_v45, 1  ;;  %v1893_v56 = vadd.f32 %v7969_v47, %v1783_v24 }
 0x2be   :  { %v1940_v0 = vmax.f32 %v1892_v28, 0.0  ;;  %v2077_v23 = vsel %vm110_vm3, %v2072_v59, %v2076_v41 }
 0x2bf   :  { %v1941_v35 = vmax.f32 %v1893_v56, 0.0  ;;  %2308 = vrot.lane.b32.xlu1 %v8233_v50, %s7066_s21  ;;  %v8252_v40 = vmax.f32 %v1936_v17, %v2077_v23  ;;  %v2079_v60 = vsel %vm110_vm3, %v2074_v8, %v2078_v14 }
 0x2c0   :  { %v2080_v62 = vrot.slane %v1940_v0, 1  ;;  %v8255_v49 = vmax.f32 %v1937_v10, %v2079_v60 }
 0x2c1   :  { %v2082_v19 = vrot.slane %v1941_v35, 1  ;;  %v6994_v48 = vpack.i.bf16 %v8252_v40, %v8243_v18 }
 0x2c2   :  { %v2081_v47 = vsel %vm110_vm3, %v2076_v41, %v2080_v62  ;;  %v2084_v10 = vsel %vm110_vm3, %v2080_v62, %v7989_v37 }
 0x2c3   :  { %2312 = vrot.lane.b32.xlu1 %v8246_v9, %s7066_s21  ;;  %6995 = vrot.lane.b32.xlu0 %v6994_v48, %s7066_s21  ;;  %v8263_v59 = vmax.f32 %v1938_v43, %v2081_v47  ;;  %v2083_v17 = vsel %vm110_vm3, %v2078_v14, %v2082_v19  ;;  %v8274_v8 = vmax.f32 %v1940_v0, %v2084_v10 }
 0x2c4   :  { %v8266_v23 = vmax.f32 %v1939_v45, %v2083_v17  ;;  %v2085_v54 = vsel %vm110_vm3, %v2082_v19, %v7992_v25 }
 0x2c5   :  { %v8282_v45 = vmax.f32 %v1941_v35, %v2085_v54 }
 0x2c7   :  { %2316 = vrot.lane.b32.xlu0 %v8255_v49, %s7066_s21  ;;  %2318 = vrot.lane.b32.xlu1 %v8263_v59, %s7066_s21 }
 0x2cb   :  { %2322 = vrot.lane.b32.xlu1 %v8274_v8, %s7066_s21  ;;  %2320 = vrot.lane.b32.xlu0 %v8266_v23, %s7066_s21 }
 0x2cf   :  { %2324 = vrot.lane.b32.xlu0 %v8282_v45, %s7066_s21 }
 0x2e0   :  { %v2233_v37 = vpop.permute.xlu0 %2232 }
 0x2e1   :  { %v8287_v43 = vmax.f32 %v8015_v1, %v2233_v37  ;;  %v2447_v1 = vld [vmem:[%s10071_s3] sm:$0xff] }
 0x2e3   :  { %v2516_v14 = vrot.slane %v8287_v43, 2 }
 0x2e4   :  { %v2237_v22 = vpop.permute.xlu1 %2236 }
 0x2e5   :  { %v8290_v41 = vmax.f32 %v8028_v12, %v2237_v22  ;;  %v6946_v25 = vpop.permute.xlu0 %6945  ;;  %v2448_v12 = vld [vmem:[%s10071_s3 + $0x8] sm:$0xff] }
 0x2e6   :  { %v6948_v28 = vunpack.i.h.bf16 %v6946_v25  ;;  %v6947_v24 = vunpack.i.l.bf16 %v6946_v25  ;;  %v6462_v54 = vpack.c.bf16 %v2448_v12, %v2447_v1  ;;  %v2452_v1 = vld [vmem:[%s10071_s3 + $0x28] sm:$0xff] }
 0x2e7   :  { %v2517_v35 = vrot.slane %v8290_v41, 2 }
 0x2e8   :  { %v2327_v56 = vsel %vm2326_vm9, %v6947_v24, %v2233_v37  ;;  %v2328_v0 = vsel %vm2326_vm9, %v6948_v28, %v2237_v22 }
 0x2e9   :  { %v8303_v60 = vmax.f32 %v8012_v52, %v2327_v56  ;;  %v8306_v62 = vmax.f32 %v8025_v7, %v2328_v0  ;;  %v2241_v19 = vpop.permute.xlu0 %2240  ;;  %v2518_v48 = vsel %vm704_vm5, %v2516_v14, %v2517_v35  ;;  %v2449_v52 = vld [vmem:[%s10071_s3 + $0x10] sm:$0xff]  ;;  %v2450_v7 = vld [vmem:[%s10071_s3 + $0x18] sm:$0xff]  ;;  %v10104_v56 = vmov 0.0|0.0   ;;  %v2451_v0 = vld [vmem:[%s10071_s3 + $0x20] sm:$0xff] }
 0x2ea   :  { %v8310_v47 = vmax.f32 %v8041_v55, %v2241_v19  ;;  %5666 = vmatprep.mubr.msk.f32.mxu1 %vm2628_vm10, %v2518_v48  ;;  %v6465_v24 = vpack.c.bf16 %v2450_v7, %v2449_v52  ;;  %v2453_v52 = vld [vmem:[%s10071_s3 + $0x30] sm:$0xff] }
 0x2eb   :  { %v2513_v17 = vrot.slane %v8303_v60, 2  ;;  %v2514_v10 = vrot.slane %v8306_v62, 2 }
 0x2ec   :  { %v2521_v37 = vrot.slane %v8310_v47, 2 }
 0x2ed   :  { %v6951_v22 = vpop.permute.xlu1 %6950  ;;  %v2515_v55 = vsel %vm704_vm5, %v2513_v17, %v2514_v10 }
 0x2ee   :  { %v6952_v25 = vunpack.i.l.bf16 %v6951_v22  ;;  %2730 = vmatmul.mubr.f32.vlgmr.msra.gmra.mrb[0].mxu1 %v2515_v55  ;;  %v2522_v28 = vsel %vm704_vm5, %v2517_v35, %v2521_v37  ;;  %v6953_v48 = vunpack.i.h.bf16 %v6951_v22 }
 0x2ef   :  { %5667 = vmatprep.mubr.msk.f32.mxu1 %vm2628_vm10, %v2522_v28  ;;  %6463 = vmatpush1.bf16.msra.mxu1 %v6462_v54  ;;  %v6468_v54 = vpack.c.bf16 %v2452_v1, %v2451_v0 }
 0x2f0   :  { %v2329_v14 = vsel %vm2326_vm9, %v6952_v25, %v2241_v19  ;;  %6464 = vmatprep.subr.bf16.mxu1 %v10104_v56 }
 0x2f1   :  { %v8334_v12 = vmax.f32 %v8038_v21, %v2329_v14  ;;  %v2245_v35 = vpop.permute.xlu1 %2244  ;;  %v2454_v21 = vld [vmem:[%s10071_s3 + $0x38] sm:$0xff] }
 0x2f2   :  { %v2330_v19 = vsel %vm2326_vm9, %v6953_v48, %v2245_v35  ;;  %v8339_v37 = vmax.f32 %v8051_v11, %v2245_v35 }
 0x2f3   :  { %v2519_v17 = vrot.slane %v8334_v12, 2  ;;  %6466 = vmatpush1.bf16.msra.mxu1 %v6465_v24  ;;  %v8353_v11 = vmax.f32 %v8047_v2, %v2330_v19  ;;  %v6471_v24 = vpack.c.bf16 %v2454_v21, %v2453_v52  ;;  %v2456_v2 = vld [vmem:[%s10071_s3 + $0x48] sm:$0xff] }
 0x2f4   :  { %6467 = vmatprep.subr.bf16.mxu1 %v10104_v56  ;;  %v2526_v1 = vrot.slane %v8339_v37, 2 }
 0x2f5   :  { %v2249_v7 = vpop.permute.xlu1 %2248  ;;  %v6956_v22 = vpop.permute.xlu0 %6955  ;;  %v2520_v55 = vsel %vm704_vm5, %v2514_v10, %v2519_v17  ;;  %v2523_v21 = vrot.slane %v8353_v11, 2 }
 0x2f6   :  { %v8350_v25 = vmax.f32 %v8062_v44, %v2249_v7  ;;  %v6957_v28 = vunpack.i.l.bf16 %v6956_v22  ;;  %2735 = vmatmul.mubr.f32.gmra.mrb[2].mxu1 %v2520_v55  ;;  %v6958_v14 = vunpack.i.h.bf16 %v6956_v22  ;;  %v2455_v44 = vld [vmem:[%s10071_s3 + $0x40] sm:$0xff] }
 0x2f7   :  { %6469 = vmatpush1.bf16.msra.mxu1 %v6468_v54 }
 0x2f8   :  { %v2331_v0 = vsel %vm2326_vm9, %v6957_v28, %v2249_v7  ;;  %v2527_v35 = vrot.slane %v8350_v25, 2  ;;  %6470 = vmatprep.subr.bf16.mxu1 %v10104_v56 }
 0x2f9   :  { %v8366_v10 = vmax.f32 %v8059_v33, %v2331_v0  ;;  %v2253_v48 = vpop.permute.xlu0 %2252  ;;  %v6474_v33 = vpack.c.bf16 %v2456_v2, %v2455_v44 }
 0x2fa   :  { %v2332_v17 = vsel %vm2326_vm9, %v6958_v14, %v2253_v48  ;;  %v8370_v54 = vmax.f32 %v8072_v5, %v2253_v48  ;;  %v2528_v19 = vsel %vm704_vm5, %v2526_v1, %v2527_v35  ;;  %v2457_v5 = vld [vmem:[%s10071_s3 + $0x50] sm:$0xff] }
 0x2fb   :  { %v8374_v52 = vmax.f32 %v8068_v57, %v2332_v17  ;;  %5668 = vmatprep.mubr.msk.f32.mxu1 %vm2628_vm10, %v2528_v19  ;;  %v2524_v7 = vrot.slane %v8366_v10, 2  ;;  %6472 = vmatpush1.bf16.msra.mxu1 %v6471_v24  ;;  %v2458_v57 = vld [vmem:[%s10071_s3 + $0x58] sm:$0xff]  ;;  %v2459_v19 = vld [vmem:[%s10071_s3 + $0x60] sm:$0xff] }
 0x2fc   :  { %v2531_v22 = vrot.slane %v8370_v54, 2  ;;  %6473 = vmatprep.subr.bf16.mxu1 %v10104_v56  ;;  %v6477_v44 = vpack.c.bf16 %v2458_v57, %v2457_v5 }
 0x2fd   :  { %v2257_v55 = vpop.permute.xlu0 %2256  ;;  %v6961_v28 = vpop.permute.xlu1 %6960  ;;  %v2525_v14 = vsel %vm704_vm5, %v2523_v21, %v2524_v7  ;;  %v2529_v0 = vrot.slane %v8374_v52, 2 }
 0x2fe   :  { %v6962_v24 = vunpack.i.l.bf16 %v6961_v28  ;;  %2740 = vmatmul.mubr.f32.gmra.mrb[4].mxu1 %v2525_v14  ;;  %v2532_v1 = vsel %vm704_vm5, %v2527_v35, %v2531_v22  ;;  %v8392_v2 = vmax.f32 %v8085_v51, %v2257_v55  ;;  %v6963_v48 = vunpack.i.h.bf16 %v6961_v28  ;;  %v2460_v35 = vld [vmem:[%s10071_s3 + $0x68] sm:$0xff] }
 0x2ff   :  { %5669 = vmatprep.mubr.msk.f32.mxu1 %vm2628_vm10, %v2532_v1  ;;  %6475 = vmatpush1.bf16.msra.mxu1 %v6474_v33  ;;  %v2530_v51 = vsel %vm704_vm5, %v2524_v7, %v2529_v0 }
 0x300   :  { %v2333_v17 = vsel %vm2326_vm9, %v6962_v24, %v2257_v55  ;;  %6476 = vmatprep.subr.bf16.mxu1 %v10104_v56  ;;  %v6480_v55 = vpack.c.bf16 %v2460_v35, %v2459_v19  ;;  %v2536_v28 = vrot.slane %v8392_v2, 2 }
 0x301   :  { %v8403_v21 = vmax.f32 %v8082_v36, %v2333_v17  ;;  %v2261_v33 = vpop.permute.xlu1 %2260  ;;  %v2461_v36 = vld [vmem:[%s10071_s3 + $0x70] sm:$0xff] }
 0x302   :  { %v2334_v22 = vsel %vm2326_vm9, %v6963_v48, %v2261_v33  ;;  %v8408_v5 = vmax.f32 %v8095_v34, %v2261_v33  ;;  %2745 = vmatmul.mubr.f32.gmra.mrb[6].mxu1 %v2530_v51  ;;  %v2462_v34 = vld [vmem:[%s10071_s3 + $0x78] sm:$0xff]  ;;  %v2464_v51 = vld [vmem:[%s10071_s3 + $0x88] sm:$0x3] }
 0x303   :  { %v8411_v57 = vmax.f32 %v8091_v29, %v2334_v22  ;;  %6478 = vmatpush1.bf16.msra.mxu1 %v6477_v44  ;;  %v2533_v29 = vrot.slane %v8403_v21, 2  ;;  %v6483_v19 = vpack.c.bf16 %v2462_v34, %v2461_v36 }
 0x304   :  { %v2537_v14 = vrot.slane %v8408_v5, 2  ;;  %6479 = vmatprep.subr.bf16.mxu1 %v10104_v56 }
 0x305   :  { %v2265_v7 = vpop.permute.xlu1 %2264  ;;  %v6966_v0 = vpop.permute.xlu0 %6965  ;;  %v2534_v24 = vrot.slane %v8411_v57, 2 }
 0x306   :  { %v8425_v1 = vmax.f32 %v8108_v53, %v2265_v7  ;;  %v6967_v44 = vunpack.i.l.bf16 %v6966_v0  ;;  %v2538_v48 = vsel %vm704_vm5, %v2536_v28, %v2537_v14  ;;  %v2463_v53 = vld [vmem:[%s10071_s3 + $0x80] sm:$0xff]  ;;  %v6968_v28 = vunpack.i.h.bf16 %v6966_v0 }
 0x307   :  { %5670 = vmatprep.mubr.msk.f32.mxu1 %vm2628_vm10, %v2538_v48  ;;  %v2535_v17 = vsel %vm704_vm5, %v2533_v29, %v2534_v24  ;;  %6481 = vmatpush1.bf16.msra.mxu1 %v6480_v55 }
 0x308   :  { %v2335_v35 = vsel %vm2326_vm9, %v6967_v44, %v2265_v7  ;;  %2750 = vmatmul.mubr.f32.gmra.mrb[8].mxu1 %v2535_v17  ;;  %v2541_v33 = vrot.slane %v8425_v1, 2  ;;  %6482 = vmatprep.subr.bf16.mxu1 %v10104_v56  ;;  %v6486_v7 = vpack.c.bf16 %v2464_v51, %v2463_v53 }
 0x309   :  { %v8440_v22 = vmax.f32 %v8105_v38, %v2335_v35  ;;  %v2269_v55 = vpop.permute.xlu0 %2268 }
 0x30a   :  { %v2542_v36 = vsel %vm704_vm5, %v2537_v14, %v2541_v33  ;;  %v2336_v29 = vsel %vm2326_vm9, %v6968_v28, %v2269_v55  ;;  %v8447_v44 = vmax.f32 %v8118_v15, %v2269_v55 }
 0x30b   :  { %5671 = vmatprep.mubr.msk.f32.mxu1 %vm2628_vm10, %v2542_v36  ;;  %v2539_v34 = vrot.slane %v8440_v22, 2  ;;  %6484 = vmatpush1.bf16.msra.mxu1 %v6483_v19  ;;  %v8455_v35 = vmax.f32 %v8114_v4, %v2336_v29 }
 0x30c   :  { %6485 = vmatprep.subr.bf16.mxu1 %v10104_v56  ;;  %v2546_v33 = vrot.slane %v8447_v44, 2 }
 0x30d   :  { %v2273_v48 = vpop.permute.xlu0 %2272  ;;  %v6971_v38 = vpop.permute.xlu1 %6970  ;;  %v2540_v17 = vsel %vm704_vm5, %v2534_v24, %v2539_v34  ;;  %v2543_v36 = vrot.slane %v8455_v35, 2 }
 0x30e   :  { %v8452_v0 = vmax.f32 %v8131_v31, %v2273_v48  ;;  %v6972_v14 = vunpack.i.l.bf16 %v6971_v38  ;;  %2755 = vmatmul.mubr.f32.gmra.mrb[10].mxu1 %v2540_v17  ;;  %v6973_v19 = vunpack.i.h.bf16 %v6971_v38 }
 0x30f   :  { %6488 = vmatpush1.bf16.msk.msra.mxu1 %vm8006_vm8, %v6486_v7 }
 0x310   :  { %v2337_v15 = vsel %vm2326_vm9, %v6972_v14, %v2273_v48  ;;  %v2547_v53 = vrot.slane %v8452_v0, 2  ;;  %6489 = vmatprep.subr.bf16.mxu1 %v10104_v56 }
 0x311   :  { %v8464_v31 = vmax.f32 %v8128_v58, %v2337_v15  ;;  %v2277_v24 = vpop.permute.xlu1 %2276 }
 0x312   :  { %v2338_v51 = vsel %vm2326_vm9, %v6973_v19, %v2277_v24  ;;  %v8468_v4 = vmax.f32 %v8141_v39, %v2277_v24  ;;  %v2548_v55 = vsel %vm704_vm5, %v2546_v33, %v2547_v53 }
 0x313   :  { %v8472_v28 = vmax.f32 %v8137_v42, %v2338_v51  ;;  %5672 = vmatprep.mubr.msk.f32.mxu1 %vm2628_vm10, %v2548_v55  ;;  %v2544_v34 = vrot.slane %v8464_v31, 2 }
 0x314   :  { %v2551_v58 = vrot.slane %v8468_v4, 2 }
 0x315   :  { %v2281_v7 = vpop.permute.xlu1 %2280  ;;  %v6976_v29 = vpop.permute.xlu0 %6975  ;;  %v2545_v48 = vsel %vm704_vm5, %v2543_v36, %v2544_v34  ;;  %v2549_v39 = vrot.slane %v8472_v28, 2 }
 0x316   :  { %v6977_v38 = vunpack.i.l.bf16 %v6976_v29  ;;  %2760 = vmatmul.mubr.f32.gmra.mrb[12].mxu1 %v2545_v48  ;;  %v2552_v17 = vsel %vm704_vm5, %v2547_v53, %v2551_v58  ;;  %v8483_v42 = vmax.f32 %v8154_v27, %v2281_v7  ;;  %v6978_v14 = vunpack.i.h.bf16 %v6976_v29 }
 0x317   :  { %5673 = vmatprep.mubr.msk.f32.mxu1 %vm2628_vm10, %v2552_v17  ;;  %v2550_v24 = vsel %vm704_vm5, %v2544_v34, %v2549_v39 }
 0x318   :  { %v2339_v19 = vsel %vm2326_vm9, %v6977_v38, %v2281_v7  ;;  %v2556_v27 = vrot.slane %v8483_v42, 2 }
 0x319   :  { %v8487_v15 = vmax.f32 %v8151_v63, %v2339_v19  ;;  %v2285_v33 = vpop.permute.xlu0 %2284 }
 0x31a   :  { %v2340_v51 = vsel %vm2326_vm9, %v6978_v14, %v2285_v33  ;;  %v8492_v55 = vmax.f32 %v8164_v32, %v2285_v33  ;;  %2765 = vmatmul.mubr.f32.gmra.mrb[14].mxu1 %v2550_v24 }
 0x31b   :  { %v8495_v53 = vmax.f32 %v8160_v61, %v2340_v51  ;;  %v2553_v63 = vrot.slane %v8487_v15, 2 }
 0x31c   :  { %v2557_v36 = vrot.slane %v8492_v55, 2 }
 0x31d   :  { %v2289_v58 = vpop.permute.xlu0 %2288  ;;  %v6981_v7 = vpop.permute.xlu1 %6980  ;;  %v2554_v29 = vrot.slane %v8495_v53, 2 }
 0x31e   :  { %v8502_v34 = vmax.f32 %v8177_v3, %v2289_v58  ;;  %v6982_v48 = vunpack.i.l.bf16 %v6981_v7  ;;  %v2558_v32 = vsel %vm704_vm5, %v2556_v27, %v2557_v36  ;;  %v6983_v19 = vunpack.i.h.bf16 %v6981_v7 }
 0x31f   :  { %5674 = vmatprep.mubr.msk.f32.mxu1 %vm2628_vm10, %v2558_v32  ;;  %v2555_v61 = vsel %vm704_vm5, %v2553_v63, %v2554_v29 }
 0x320   :  { %v2341_v39 = vsel %vm2326_vm9, %v6982_v48, %v2289_v58  ;;  %2770 = vmatmul.mubr.f32.gmra.mrb[16].mxu1 %v2555_v61  ;;  %v2561_v38 = vrot.slane %v8502_v34, 2 }
 0x321   :  { %v8510_v17 = vmax.f32 %v8174_v20, %v2341_v39  ;;  %v2293_v14 = vpop.permute.xlu1 %2292 }
 0x322   :  { %v2562_v3 = vsel %vm704_vm5, %v2557_v36, %v2561_v38  ;;  %v2342_v24 = vsel %vm2326_vm9, %v6983_v19, %v2293_v14  ;;  %v8517_v51 = vmax.f32 %v8187_v6, %v2293_v14 }
 0x323   :  { %10105 = vst [vmem:[#allocation7_spill] sm:$0xff] %v8510_v17  ;;  %5675 = vmatprep.mubr.msk.f32.mxu1 %vm2628_vm10, %v2562_v3  ;;  %v2559_v33 = vrot.slane %v8510_v17, 2  ;;  %v8524_v36 = vmax.f32 %v8183_v16, %v2342_v24  ;;  %v10108_v16 = vld [vmem:[#allocation3_spill] sm:$0xff] }
 0x324   :  { %v2566_v61 = vrot.slane %v8517_v51, 2 }
 0x325   :  { %v2297_v27 = vpop.permute.xlu1 %2296  ;;  %v6986_v58 = vpop.permute.xlu0 %6985  ;;  %v2560_v63 = vsel %vm704_vm5, %v2554_v29, %v2559_v33  ;;  %v2563_v33 = vrot.slane %v8524_v36, 2 }
 0x326   :  { %v8521_v20 = vmax.f32 %v8200_v13, %v2297_v27  ;;  %v6987_v48 = vunpack.i.l.bf16 %v6986_v58  ;;  %2775 = vmatmul.mubr.f32.gmra.mrb[18].mxu1 %v2560_v63  ;;  %v6988_v7 = vunpack.i.h.bf16 %v6986_v58  ;;  %v10106_v13 = vld [vmem:[#allocation4_spill] sm:$0xff] }
 0x328   :  { %v2343_v32 = vsel %vm2326_vm9, %v6987_v48, %v2297_v27  ;;  %v2567_v6 = vrot.slane %v8521_v20, 2 }
 0x329   :  { %v8530_v39 = vmax.f32 %v8197_v26, %v2343_v32  ;;  %v2301_v38 = vpop.permute.xlu0 %2300 }
 0x32a   :  { %v2344_v29 = vsel %vm2326_vm9, %v6988_v7, %v2301_v38  ;;  %v8534_v14 = vmax.f32 %v10106_v13, %v2301_v38  ;;  %v2568_v19 = vsel %vm704_vm5, %v2566_v61, %v2567_v6  ;;  %v10110_v13 = vld [vmem:[#allocation5_spill] sm:$0xff] }
 0x32b   :  { %v8538_v3 = vmax.f32 %v10108_v16, %v2344_v29  ;;  %5676 = vmatprep.mubr.msk.f32.mxu1 %vm2628_vm10, %v2568_v19  ;;  %v2564_v24 = vrot.slane %v8530_v39, 2 }
 0x32c   :  { %10107 = vst [vmem:[#allocation4_spill] sm:$0xff] %v8534_v14  ;;  %v2571_v26 = vrot.slane %v8534_v14, 2 }
 0x32d   :  { %10109 = vst [vmem:[#allocation3_spill] sm:$0xff] %v8538_v3  ;;  %v2305_v27 = vpop.permute.xlu0 %2304  ;;  %v6991_v58 = vpop.permute.xlu1 %6990  ;;  %v2565_v63 = vsel %vm704_vm5, %v2563_v33, %v2564_v24  ;;  %v2569_v48 = vrot.slane %v8538_v3, 2 }
 0x32e   :  { %v6992_v7 = vunpack.i.l.bf16 %v6991_v58  ;;  %2780 = vmatmul.mubr.f32.gmra.mrb[20].mxu1 %v2565_v63  ;;  %v2572_v32 = vsel %vm704_vm5, %v2567_v6, %v2571_v26  ;;  %v8549_v61 = vmax.f32 %v8223_v30, %v2305_v27  ;;  %v6993_v38 = vunpack.i.h.bf16 %v6991_v58  ;;  %v10111_v6 = vld [vmem:[#allocation6_spill] sm:$0xff] }
 0x32f   :  { %5677 = vmatprep.mubr.msk.f32.mxu1 %vm2628_vm10, %v2572_v32  ;;  %v2570_v33 = vsel %vm704_vm5, %v2564_v24, %v2569_v48 }
 0x330   :  { %v2345_v29 = vsel %vm2326_vm9, %v6992_v7, %v2305_v27  ;;  %v2576_v30 = vrot.slane %v8549_v61, 2 }
 0x331   :  { %v8553_v19 = vmax.f32 %v10110_v13, %v2345_v29  ;;  %v2309_v16 = vpop.permute.xlu1 %2308 }
 0x332   :  { %v2346_v3 = vsel %vm2326_vm9, %v6993_v38, %v2309_v16  ;;  %v8558_v63 = vmax.f32 %v8233_v50, %v2309_v16  ;;  %2785 = vmatmul.mubr.f32.gmra.mrb[22].mxu1 %v2570_v33 }
 0x333   :  { %v8561_v26 = vmax.f32 %v10111_v6, %v2346_v3  ;;  %v2573_v32 = vrot.slane %v8553_v19, 2 }
 0x334   :  { %v2577_v58 = vrot.slane %v8558_v63, 2 }
 0x335   :  { %v2313_v27 = vpop.permute.xlu1 %2312  ;;  %v6996_v7 = vpop.permute.xlu0 %6995  ;;  %v2574_v29 = vrot.slane %v8561_v26, 2 }
 0x336   :  { %v8568_v24 = vmax.f32 %v8246_v9, %v2313_v27  ;;  %v6997_v48 = vunpack.i.l.bf16 %v6996_v7  ;;  %v2578_v50 = vsel %vm704_vm5, %v2576_v30, %v2577_v58  ;;  %v6998_v38 = vunpack.i.h.bf16 %v6996_v7 }
 0x337   :  { %5678 = vmatprep.mubr.msk.f32.mxu1 %vm2628_vm10, %v2578_v50  ;;  %v2575_v3 = vsel %vm704_vm5, %v2573_v32, %v2574_v29 }
 0x338   :  { %v2347_v13 = vsel %vm2326_vm9, %v6997_v48, %v2313_v27  ;;  %2790 = vmatmul.mubr.f32.gmra.mrb[24].mxu1 %v2575_v3  ;;  %v2581_v16 = vrot.slane %v8568_v24, 2 }
 0x339   :  { %v8576_v33 = vmax.f32 %v8243_v18, %v2347_v13  ;;  %v2317_v6 = vpop.permute.xlu0 %2316  ;;  %v2319_v17 = vpop.permute.xlu1 %2318 }
 0x33a   :  { %v2348_v9 = vsel %vm2326_vm9, %v6998_v38, %v2317_v6  ;;  %v2582_v14 = vsel %vm704_vm5, %v2577_v58, %v2581_v16  ;;  %v8583_v7 = vmax.f32 %v8255_v49, %v2317_v6 }
 0x33b   :  { %5679 = vmatprep.mubr.msk.f32.mxu1 %vm2628_vm10, %v2582_v14  ;;  %v2579_v30 = vrot.slane %v8576_v33, 2  ;;  %v8586_v27 = vmax.f32 %v8252_v40, %v2348_v9 }
 0x33c   :  { %v2586_v14 = vrot.slane %v8583_v7, 2 }
 0x33d   :  { %v2321_v32 = vpop.permute.xlu0 %2320  ;;  %v2580_v18 = vsel %vm704_vm5, %v2574_v29, %v2579_v30  ;;  %v2323_v3 = vpop.permute.xlu1 %2322  ;;  %v2583_v40 = vrot.slane %v8586_v27, 2 }
 0x33e   :  { %v2349_v48 = vsel %vm2326_vm9, %v2319_v17, %v2321_v32  ;;  %v8591_v50 = vmax.f32 %v8266_v23, %v2321_v32  ;;  %2795 = vmatmul.mubr.f32.gmra.mrb[26].mxu1 %v2580_v18 }
 0x33f   :  { %v8594_v58 = vmax.f32 %v8263_v59, %v2349_v48  ;;  %v5701_v48 = vld [vmem:[%s10071_s3 + $0x130] sm:$0xff] }
 0x340   :  { %v2587_v49 = vrot.slane %v8591_v50, 2 }
 0x341   :  { %v2325_v38 = vpop.permute.xlu0 %2324  ;;  %v2584_v13 = vrot.slane %v8594_v58, 2 }
 0x342   :  { %v2350_v29 = vsel %vm2326_vm9, %v2323_v3, %v2325_v38  ;;  %v8602_v17 = vmax.f32 %v8282_v45, %v2325_v38  ;;  %v2588_v23 = vsel %vm704_vm5, %v2586_v14, %v2587_v49  ;;  %v5699_v45 = vld [vmem:[%s10071_s3 + $0x120] sm:$0xff]  ;;  %v5702_v14 = vld [vmem:[%s10071_s3 + $0x138] sm:$0xff]  ;;  %v5704_v38 = vld [vmem:[%s10071_s3 + $0x148] sm:$0xff] }
 0x343   :  { %v8606_v59 = vmax.f32 %v8274_v8, %v2350_v29  ;;  %5680 = vmatprep.mubr.msk.f32.mxu1 %vm2628_vm10, %v2588_v23  ;;  %v2585_v16 = vsel %vm704_vm5, %v2583_v40, %v2584_v13  ;;  %v5700_v8 = vld [vmem:[%s10071_s3 + $0x128] sm:$0xff]  ;;  %v5703_v3 = vld [vmem:[%s10071_s3 + $0x140] sm:$0xff]  ;;  %v5706_v29 = vld [vmem:[%s10071_s3 + $0x158] sm:$0xff] }
 0x344   :  { %2800 = vmatmul.mubr.f32.gmra.mrb[28].mxu1 %v2585_v16  ;;  %v2591_v6 = vrot.slane %v8602_v17, 2  ;;  %v6490_v18 = vpack.c.bf16 %v5700_v8, %v5699_v45  ;;  %v6496_v40 = vpack.c.bf16 %v5704_v38, %v5703_v3  ;;  %v5707_v16 = vld [vmem:[%s10071_s3 + $0x160] sm:$0xff]  ;;  %v5710_v45 = vld [vmem:[%s10071_s3 + $0x178] sm:$0xff] }
 0x345   :  { %v2589_v9 = vrot.slane %v8606_v59, 2  ;;  %v5715_v38 = vld [vmem:[%s10071_s3 + $0x1a0] sm:$0xff] }
 0x346   :  { %v2592_v30 = vsel %vm704_vm5, %v2587_v49, %v2591_v6  ;;  %v6493_v49 = vpack.c.bf16 %v5702_v14, %v5701_v48  ;;  %v5708_v6 = vld [vmem:[%s10071_s3 + $0x168] sm:$0xff]  ;;  %v5713_v14 = vld [vmem:[%s10071_s3 + $0x190] sm:$0xff] }
 0x347   :  { %5681 = vmatprep.mubr.msk.f32.mxu1 %vm2628_vm10, %v2592_v30  ;;  %v2590_v32 = vsel %vm704_vm5, %v2584_v13, %v2589_v9  ;;  %v5705_v13 = vld [vmem:[%s10071_s3 + $0x150] sm:$0xff]  ;;  %v6502_v9 = vpack.c.bf16 %v5708_v6, %v5707_v16  ;;  %v5735_v6 = vld [vmem:[%s10071_s3 + $0x1b8] sm:$0xff] }
 0x348   :  { %2805 = vmatmul.mubr.f32.gmra.mrb[30].mxu1 %v2590_v32  ;;  %v6499_v23 = vpack.c.bf16 %v5706_v29, %v5705_v13  ;;  %v5709_v30 = vld [vmem:[%s10071_s3 + $0x170] sm:$0xff]  ;;  %v5711_v32 = vld [vmem:[%s10071_s3 + $0x180] sm:$0xff]  ;;  %v2994_v29 = vrot.slane %v8290_v41, 4 }
 0x349   :  { %5683 = vmatprep.mubr.msk.f32.mxu1 %vm2628_vm10, %v8287_v43  ;;  %v6505_v8 = vpack.c.bf16 %v5710_v45, %v5709_v30  ;;  %v5734_v16 = vld [vmem:[%s10071_s3 + $0x1b0] sm:$0xff]  ;;  %v2991_v30 = vrot.slane %v8306_v62, 4 }
 0x34c   :  { %2910 = vmatmul.mubr.f32.vlgmr.msra.gmra.mrb[32].mxu1 %v8303_v60 }
 0x34d   :  { %5684 = vmatprep.mubr.msk.f32.mxu1 %vm2628_vm10, %v8290_v41  ;;  %6491 = vmatpush1.bf16.msra.mxu1 %v6490_v18  ;;  %v5712_v18 = vld [vmem:[%s10071_s3 + $0x188] sm:$0xff] }
 0x34e   :  { %6492 = vmatprep.subr.bf16.mxu1 %v10104_v56  ;;  %v6508_v48 = vpack.c.bf16 %v5712_v18, %v5711_v32  ;;  %v6518_v32 = vpack.c.bf16 %v5735_v6, %v5734_v16  ;;  %v5736_v18 = vld [vmem:[%s10071_s3 + $0x1c0] sm:$0xff]  ;;  %v5739_v16 = vld [vmem:[%s10071_s3 + $0x1d8] sm:$0xff]  ;;  %v3001_v6 = vrot.slane %v8366_v10, 4 }
 0x350   :  { %2915 = vmatmul.mubr.f32.gmra.mrb[34].mxu1 %v8306_v62 }
 0x351   :  { %5685 = vmatprep.mubr.msk.f32.mxu1 %vm2628_vm10, %v8339_v37  ;;  %6494 = vmatpush1.bf16.msra.mxu1 %v6493_v49  ;;  %v5714_v49 = vld [vmem:[%s10071_s3 + $0x198] sm:$0xff] }
 0x352   :  { %6495 = vmatprep.subr.bf16.mxu1 %v10104_v56  ;;  %v6511_v3 = vpack.c.bf16 %v5714_v49, %v5713_v14  ;;  %v2996_v49 = vrot.slane %v8334_v12, 4 }
 0x354   :  { %2920 = vmatmul.mubr.f32.gmra.mrb[36].mxu1 %v8353_v11 }
 0x355   :  { %5686 = vmatprep.mubr.msk.f32.mxu1 %vm2628_vm10, %v8350_v25  ;;  %6497 = vmatpush1.bf16.msra.mxu1 %v6496_v40  ;;  %v5716_v40 = vld [vmem:[%s10071_s3 + $0x1a8] sm:$0x3] }
 0x356   :  { %6498 = vmatprep.subr.bf16.mxu1 %v10104_v56  ;;  %v6514_v13 = vpack.c.bf16 %v5716_v40, %v5715_v38  ;;  %v3004_v38 = vrot.slane %v8350_v25, 4 }
 0x358   :  { %2925 = vmatmul.mubr.f32.gmra.mrb[38].mxu1 %v8366_v10 }
 0x359   :  { %5687 = vmatprep.mubr.msk.f32.mxu1 %vm2628_vm10, %v8392_v2  ;;  %6500 = vmatpush1.bf16.msra.mxu1 %v6499_v23  ;;  %v2993_v23 = vrot.slane %v8287_v43, 4 }
 0x35a   :  { %6501 = vmatprep.subr.bf16.mxu1 %v10104_v56 }
 0x35b   :  { %v2995_v45 = vsel %vm225_vm0, %v2993_v23, %v2994_v29  ;;  %v5738_v23 = vld [vmem:[%s10071_s3 + $0x1d0] sm:$0xff] }
 0x35c   :  { %2930 = vmatmul.mubr.f32.gmra.mrb[40].mxu1 %v8403_v21 }
 0x35d   :  { %5688 = vmatprep.mubr.msk.f32.mxu1 %vm2628_vm10, %v8408_v5  ;;  %6503 = vmatpush1.bf16.msra.mxu1 %v6502_v9  ;;  %v2990_v9 = vrot.slane %v8303_v60, 4 }
 0x35e   :  { %6504 = vmatprep.subr.bf16.mxu1 %v10104_v56 }
 0x35f   :  { %v2992_v14 = vsel %vm225_vm0, %v2990_v9, %v2991_v30 }
 0x360   :  { %2935 = vmatmul.mubr.f32.gmra.mrb[42].mxu1 %v8411_v57 }
 0x361   :  { %5689 = vmatprep.mubr.msk.f32.mxu1 %vm2628_vm10, %v8447_v44  ;;  %6506 = vmatpush1.bf16.msra.mxu1 %v6505_v8  ;;  %v2998_v8 = vrot.slane %v8310_v47, 4 }
 0x362   :  { %6507 = vmatprep.subr.bf16.mxu1 %v10104_v56 }
 0x364   :  { %2940 = vmatmul.mubr.f32.gmra.mrb[44].mxu1 %v8455_v35 }
 0x365   :  { %5690 = vmatprep.mubr.msk.f32.mxu1 %vm2628_vm10, %v8452_v0  ;;  %6509 = vmatpush1.bf16.msra.mxu1 %v6508_v48  ;;  %v5737_v48 = vld [vmem:[%s10071_s3 + $0x1c8] sm:$0xff] }
 0x366   :  { %6510 = vmatprep.subr.bf16.mxu1 %v10104_v56  ;;  %v6521_v40 = vpack.c.bf16 %v5737_v48, %v5736_v18  ;;  %v5740_v18 = vld [vmem:[%s10071_s3 + $0x1e0] sm:$0xff] }
 0x368   :  { %2945 = vmatmul.mubr.f32.gmra.mrb[46].mxu1 %v8464_v31 }
 0x369   :  { %5691 = vmatprep.mubr.msk.f32.mxu1 %vm2628_vm10, %v8483_v42  ;;  %6512 = vmatpush1.bf16.msra.mxu1 %v6511_v3  ;;  %v2999_v3 = vsel %vm225_vm0, %v2994_v29, %v2998_v8  ;;  %v2997_v29 = vsel %vm225_vm0, %v2991_v30, %v2996_v49  ;;  %v3000_v8 = vrot.slane %v8353_v11, 4  ;;  %v5741_v30 = vld [vmem:[%s10071_s3 + $0x1e8] sm:$0xff] }
 0x36a   :  { %6513 = vmatprep.subr.bf16.mxu1 %v10104_v56 }
 0x36b   :  { %v3002_v48 = vsel %vm225_vm0, %v3000_v8, %v3001_v6  ;;  %v3010_v8 = vrot.slane %v8403_v21, 4 }
 0x36c   :  { %2950 = vmatmul.mubr.f32.gmra.mrb[48].mxu1 %v8487_v15 }
 0x36d   :  { %5692 = vmatprep.mubr.msk.f32.mxu1 %vm2628_vm10, %v8492_v55  ;;  %6516 = vmatpush1.bf16.msk.msra.mxu1 %vm8006_vm8, %v6514_v13  ;;  %v3003_v13 = vrot.slane %v8339_v37, 4 }
 0x36e   :  { %6517 = vmatprep.subr.bf16.mxu1 %v10104_v56 }
 0x36f   :  { %v3005_v9 = vsel %vm225_vm0, %v3003_v13, %v3004_v38  ;;  %v3013_v13 = vrot.slane %v8392_v2, 4 }
 0x370   :  { %2955 = vmatmul.mubr.f32.gmra.mrb[50].mxu1 %v8495_v53 }
 0x371   :  { %5693 = vmatprep.mubr.msk.f32.mxu1 %vm2628_vm10, %v8517_v51 }
 0x374   :  { %2960 = vmatmul.mubr.f32.gmra.mrb[52].mxu1 %v8524_v36 }
 0x375   :  { %5694 = vmatprep.mubr.msk.f32.mxu1 %vm2628_vm10, %v8521_v20 }
 0x378   :  { %2965 = vmatmul.mubr.f32.gmra.mrb[54].mxu1 %v8530_v39 }
 0x379   :  { %5695 = vmatprep.mubr.msk.f32.mxu1 %vm2628_vm10, %v8549_v61 }
 0x37c   :  { %2970 = vmatmul.mubr.f32.gmra.mrb[56].mxu1 %v8553_v19 }
 0x37d   :  { %5696 = vmatprep.mubr.msk.f32.mxu1 %vm2628_vm10, %v8558_v63 }
 0x380   :  { %2975 = vmatmul.mubr.f32.gmra.mrb[58].mxu1 %v8561_v26 }
 0x381   :  { %5697 = vmatprep.mubr.msk.f32.mxu1 %vm2628_vm10, %v8583_v7 }
 0x384   :  { %2980 = vmatmul.mubr.f32.gmra.mrb[60].mxu1 %v8586_v27 }
 0x385   :  { %5698 = vmatprep.mubr.msk.f32.mxu1 %vm2628_vm10, %v8591_v50 }
 0x388   :  { %2985 = vmatmul.mubr.f32.gmra.mrb[62].mxu1 %v8594_v58 }
 0x389   :  { %5718 = vmatprep.mubr.msk.f32.mxu1 %vm2628_vm10, %v2995_v45  ;;  %v3008_v45 = vrot.slane %v8370_v54, 4 }
 0x38b   :  { %v3009_v49 = vsel %vm225_vm0, %v3004_v38, %v3008_v45  ;;  %v3018_v45 = vrot.slane %v8425_v1, 4 }
 0x38c   :  { %3205 = vmatmul.mubr.f32.vlgmr.msra.gmra.mrb[64].mxu1 %v2992_v14  ;;  %v3006_v14 = vrot.slane %v8374_v52, 4 }
 0x38d   :  { %5719 = vmatprep.mubr.msk.f32.mxu1 %vm2628_vm10, %v2999_v3  ;;  %6519 = vmatpush1.bf16.msra.mxu1 %v6518_v32  ;;  %v6524_v32 = vpack.c.bf16 %v5739_v16, %v5738_v23  ;;  %v3014_v3 = vrot.slane %v8408_v5, 4  ;;  %v5742_v23 = vld [vmem:[%s10071_s3 + $0x1f0] sm:$0xff]  ;;  %v5743_v16 = vld [vmem:[%s10071_s3 + $0x1f8] sm:$0xff] }
 0x38e   :  { %6520 = vmatprep.subr.bf16.mxu1 %v10104_v56  ;;  %v3007_v38 = vsel %vm225_vm0, %v3001_v6, %v3006_v14  ;;  %v5745_v6 = vld [vmem:[%s10071_s3 + $0x208] sm:$0xff] }
 0x38f   :  { %v3019_v14 = vsel %vm225_vm0, %v3014_v3, %v3018_v45  ;;  %v3028_v45 = vrot.slane %v8468_v4, 4 }
 0x390   :  { %3210 = vmatmul.mubr.f32.gmra.mrb[66].mxu1 %v2997_v29  ;;  %v3011_v29 = vrot.slane %v8411_v57, 4 }
 0x391   :  { %5720 = vmatprep.mubr.msk.f32.mxu1 %vm2628_vm10, %v3005_v9  ;;  %6522 = vmatpush1.bf16.msra.mxu1 %v6521_v40  ;;  %v6527_v40 = vpack.c.bf16 %v5741_v30, %v5740_v18  ;;  %v3015_v9 = vsel %vm225_vm0, %v3013_v13, %v3014_v3  ;;  %v5744_v18 = vld [vmem:[%s10071_s3 + $0x200] sm:$0xff]  ;;  %v3023_v13 = vrot.slane %v8447_v44, 4 }
 0x392   :  { %6523 = vmatprep.subr.bf16.mxu1 %v10104_v56  ;;  %v3012_v30 = vsel %vm225_vm0, %v3010_v8, %v3011_v29  ;;  %v3020_v8 = vrot.slane %v8455_v35, 4 }
 0x394   :  { %3215 = vmatmul.mubr.f32.gmra.mrb[68].mxu1 %v3002_v48  ;;  %v3016_v48 = vrot.slane %v8440_v22, 4 }
 0x395   :  { %5721 = vmatprep.mubr.msk.f32.mxu1 %vm2628_vm10, %v3009_v49  ;;  %6525 = vmatpush1.bf16.msra.mxu1 %v6524_v32  ;;  %v6530_v32 = vpack.c.bf16 %v5743_v16, %v5742_v23  ;;  %v3024_v49 = vrot.slane %v8452_v0, 4  ;;  %v5746_v23 = vld [vmem:[%s10071_s3 + $0x210] sm:$0xff]  ;;  %v5747_v16 = vld [vmem:[%s10071_s3 + $0x218] sm:$0xff] }
 0x396   :  { %6526 = vmatprep.subr.bf16.mxu1 %v10104_v56  ;;  %v3017_v3 = vsel %vm225_vm0, %v3011_v29, %v3016_v48  ;;  %v5749_v29 = vld [vmem:[%s10071_s3 + $0x228] sm:$0xff] }
 0x397   :  { %v3029_v48 = vsel %vm225_vm0, %v3024_v49, %v3028_v45  ;;  %v3038_v45 = vrot.slane %v8502_v34, 4 }
 0x398   :  { %3220 = vmatmul.mubr.f32.gmra.mrb[70].mxu1 %v3007_v38  ;;  %v3021_v38 = vrot.slane %v8464_v31, 4 }
 0x399   :  { %5722 = vmatprep.mubr.msk.f32.mxu1 %vm2628_vm10, %v3015_v9  ;;  %6528 = vmatpush1.bf16.msra.mxu1 %v6527_v40  ;;  %v6533_v40 = vpack.c.bf16 %v5745_v6, %v5744_v18  ;;  %v3025_v9 = vsel %vm225_vm0, %v3023_v13, %v3024_v49  ;;  %v5748_v18 = vld [vmem:[%s10071_s3 + $0x220] sm:$0xff]  ;;  %v3033_v13 = vrot.slane %v8483_v42, 4 }
 0x39a   :  { %6529 = vmatprep.subr.bf16.mxu1 %v10104_v56  ;;  %v3022_v6 = vsel %vm225_vm0, %v3020_v8, %v3021_v38  ;;  %v3030_v8 = vrot.slane %v8487_v15, 4 }
 0x39c   :  { %3225 = vmatmul.mubr.f32.gmra.mrb[72].mxu1 %v3012_v30  ;;  %v3026_v30 = vrot.slane %v8472_v28, 4 }
 0x39d   :  { %5723 = vmatprep.mubr.msk.f32.mxu1 %vm2628_vm10, %v3019_v14  ;;  %6531 = vmatpush1.bf16.msra.mxu1 %v6530_v32  ;;  %v6536_v32 = vpack.c.bf16 %v5747_v16, %v5746_v23  ;;  %v3034_v14 = vrot.slane %v8492_v55, 4  ;;  %v5750_v23 = vld [vmem:[%s10071_s3 + $0x230] sm:$0xff]  ;;  %v5751_v16 = vld [vmem:[%s10071_s3 + $0x238] sm:$0x3] }
 0x39e   :  { %6532 = vmatprep.subr.bf16.mxu1 %v10104_v56  ;;  %v3027_v49 = vsel %vm225_vm0, %v3021_v38, %v3026_v30  ;;  %v3044_v30 = vrot.slane %v8521_v20, 4 }
 0x39f   :  { %v3039_v38 = vsel %vm225_vm0, %v3034_v14, %v3038_v45  ;;  %v10114_v45 = vld [vmem:[#allocation3_spill] sm:$0xff] }
 0x3a0   :  { %3230 = vmatmul.mubr.f32.gmra.mrb[74].mxu1 %v3017_v3  ;;  %v3031_v3 = vrot.slane %v8495_v53, 4 }
 0x3a1   :  { %5724 = vmatprep.mubr.msk.f32.mxu1 %vm2628_vm10, %v3025_v9  ;;  %6534 = vmatpush1.bf16.msra.mxu1 %v6533_v40  ;;  %v6539_v40 = vpack.c.bf16 %v5749_v29, %v5748_v18  ;;  %v3035_v9 = vsel %vm225_vm0, %v3033_v13, %v3034_v14  ;;  %v10112_v29 = vld [vmem:[#allocation7_spill] sm:$0xff]  ;;  %v3041_v13 = vrot.slane %v8530_v39, 4 }
 0x3a2   :  { %6535 = vmatprep.subr.bf16.mxu1 %v10104_v56  ;;  %v3032_v18 = vsel %vm225_vm0, %v3030_v8, %v3031_v3  ;;  %v3046_v8 = vrot.slane %v10114_v45, 4 }
 0x3a4   :  { %3235 = vmatmul.mubr.f32.gmra.mrb[76].mxu1 %v3022_v6  ;;  %v3036_v6 = vrot.slane %v10112_v29, 4 }
 0x3a5   :  { %5725 = vmatprep.mubr.msk.f32.mxu1 %vm2628_vm10, %v3029_v48  ;;  %6537 = vmatpush1.bf16.msra.mxu1 %v6536_v32  ;;  %v6542_v32 = vpack.c.bf16 %v5751_v16, %v5750_v23  ;;  %v3043_v48 = vrot.slane %v8517_v51, 4  ;;  %v10113_v16 = vld [vmem:[#allocation4_spill] sm:$0xff] }
 0x3a6   :  { %6538 = vmatprep.subr.bf16.mxu1 %v10104_v56  ;;  %v3048_v14 = vrot.slane %v10113_v16, 4 }
 0x3a7   :  { %v3045_v23 = vsel %vm225_vm0, %v3043_v48, %v3044_v30 }
 0x3a8   :  { %3240 = vmatmul.mubr.f32.gmra.mrb[78].mxu1 %v3027_v49  ;;  %v3040_v49 = vrot.slane %v8524_v36, 4 }
 0x3a9   :  { %5726 = vmatprep.mubr.msk.f32.mxu1 %vm2628_vm10, %v3035_v9  ;;  %6540 = vmatpush1.bf16.msra.mxu1 %v6539_v40  ;;  %v3037_v40 = vsel %vm225_vm0, %v3031_v3, %v3036_v6  ;;  %v3054_v3 = vrot.slane %v8558_v63, 4  ;;  %v3047_v6 = vsel %vm225_vm0, %v3041_v13, %v3046_v8 }
 0x3aa   :  { %6541 = vmatprep.subr.bf16.mxu1 %v10104_v56  ;;  %v3042_v9 = vsel %vm225_vm0, %v3040_v49, %v3041_v13  ;;  %v3064_v13 = vrot.slane %v8591_v50, 4 }
 0x3ac   :  { %3245 = vmatmul.mubr.f32.gmra.mrb[80].mxu1 %v3032_v18  ;;  %v3053_v18 = vrot.slane %v8549_v61, 4 }
 0x3ad   :  { %5727 = vmatprep.mubr.msk.f32.mxu1 %vm2628_vm10, %v3039_v38  ;;  %6544 = vmatpush1.bf16.msk.msra.mxu1 %vm8006_vm8, %v6542_v32  ;;  %v3049_v32 = vsel %vm225_vm0, %v3044_v30, %v3048_v14  ;;  %v3051_v38 = vrot.slane %v8561_v26, 4  ;;  %v3056_v14 = vrot.slane %v8576_v33, 4 }
 0x3ae   :  { %6545 = vmatprep.subr.bf16.mxu1 %v10104_v56  ;;  %v3055_v48 = vsel %vm225_vm0, %v3053_v18, %v3054_v3 }
 0x3af   :  { %v3057_v8 = vsel %vm225_vm0, %v3051_v38, %v3056_v14  ;;  %v3305_v14 = vrot.slane %v8290_v41, 6 }
 0x3b0   :  { %3250 = vmatmul.mubr.f32.gmra.mrb[82].mxu1 %v3037_v40  ;;  %v3058_v40 = vrot.slane %v8568_v24, 4 }
 0x3b1   :  { %5728 = vmatprep.mubr.msk.f32.mxu1 %vm2628_vm10, %v3045_v23  ;;  %v3050_v23 = vrot.slane %v8553_v19, 4 }
 0x3b2   :  { %v3059_v49 = vsel %vm225_vm0, %v3054_v3, %v3058_v40  ;;  %v3060_v3 = vrot.slane %v8586_v27, 4 }
 0x3b3   :  { %v3052_v30 = vsel %vm225_vm0, %v3050_v23, %v3051_v38 }
 0x3b4   :  { %3255 = vmatmul.mubr.f32.gmra.mrb[84].mxu1 %v3042_v9  ;;  %v3063_v9 = vrot.slane %v8583_v7, 4 }
 0x3b5   :  { %5729 = vmatprep.mubr.msk.f32.mxu1 %vm2628_vm10, %v3049_v32  ;;  %v3061_v32 = vrot.slane %v8594_v58, 4 }
 0x3b6   :  { %v3065_v18 = vsel %vm225_vm0, %v3063_v9, %v3064_v13  ;;  %v5769_v9 = vld [vmem:[%s10071_s3 + $0x240] sm:$0xff] }
 0x3b7   :  { %v3062_v23 = vsel %vm225_vm0, %v3060_v3, %v3061_v32  ;;  %v3301_v3 = vrot.slane %v8303_v60, 6  ;;  %v5772_v60 = vld [vmem:[%s10071_s3 + $0x258] sm:$0xff] }
 0x3b8   :  { %3260 = vmatmul.mubr.f32.gmra.mrb[86].mxu1 %v3047_v6  ;;  %v3068_v6 = vrot.slane %v8602_v17, 4 }
 0x3b9   :  { %5730 = vmatprep.mubr.msk.f32.mxu1 %vm2628_vm10, %v3055_v48 }
 0x3ba   :  { %v3069_v38 = vsel %vm225_vm0, %v3064_v13, %v3068_v6  ;;  %v3302_v13 = vrot.slane %v8306_v62, 6 }
 0x3bc   :  { %3265 = vmatmul.mubr.f32.gmra.mrb[88].mxu1 %v3052_v30  ;;  %v3066_v30 = vrot.slane %v8606_v59, 4 }
 0x3bd   :  { %5731 = vmatprep.mubr.msk.f32.mxu1 %vm2628_vm10, %v3059_v49  ;;  %v3304_v49 = vrot.slane %v8287_v43, 6 }
 0x3bf   :  { %v3306_v6 = vsel %vm2661_vm7, %v3304_v49, %v3305_v14 }
 0x3c0   :  { %3270 = vmatmul.mubr.f32.gmra.mrb[90].mxu1 %v3057_v8  ;;  %v5770_v8 = vld [vmem:[%s10071_s3 + $0x248] sm:$0xff] }
 0x3c1   :  { %v8882_v48 = vpop.f32.mrb[0].mxu1  ;;  %5732 = vmatprep.mubr.msk.f32.mxu1 %vm2628_vm10, %v3065_v18  ;;  %v3067_v18 = vsel %vm225_vm0, %v3061_v32, %v3066_v30  ;;  %v3303_v32 = vsel %vm2661_vm7, %v3301_v3, %v3302_v13  ;;  %v3307_v30 = vrot.slane %v8334_v12, 6  ;;  %v5774_v3 = vld [vmem:[%s10071_s3 + $0x268] sm:$0xff] }
 0x3c2   :  { %10115 = vst [vmem:[#allocation5_spill] sm:$0xff] %v8882_v48  ;;  %v2733_v40 = vpop.f32.mrb[1].mxu1  ;;  %v5771_v48 = vld [vmem:[%s10071_s3 + $0x250] sm:$0xff] }
 0x3c3   :  { %v3309_v40 = vrot.slane %v8310_v47, 6 }
 0x3c4   :  { %3275 = vmatmul.mubr.f32.gmra.mrb[92].mxu1 %v3062_v23  ;;  %v6546_v23 = vpack.c.bf16 %v5770_v8, %v5769_v9  ;;  %v6549_v9 = vpack.c.bf16 %v5772_v60, %v5771_v48  ;;  %v3314_v8 = vrot.slane %v8339_v37, 6  ;;  %v3319_v48 = vrot.slane %v8370_v54, 6 }
 0x3c5   :  { %5733 = vmatprep.mubr.msk.f32.mxu1 %vm2628_vm10, %v3069_v38  ;;  %v3310_v49 = vsel %vm2661_vm7, %v3305_v14, %v3309_v40  ;;  %v3308_v14 = vsel %vm2661_vm7, %v3302_v13, %v3307_v30  ;;  %v3312_v40 = vrot.slane %v8366_v10, 6  ;;  %v5775_v13 = vld [vmem:[%s10071_s3 + $0x270] sm:$0xff]  ;;  %v5776_v30 = vld [vmem:[%s10071_s3 + $0x278] sm:$0xff] }
 0x3c8   :  { %3280 = vmatmul.mubr.f32.gmra.mrb[94].mxu1 %v3067_v18  ;;  %v3315_v18 = vrot.slane %v8350_v25, 6 }
 0x3c9   :  { %v8903_v43 = vpop.f32.mrb[2].mxu1  ;;  %5753 = vmatprep.mubr.msk.f32.mxu1 %vm2628_vm10, %v3306_v6  ;;  %v5773_v6 = vld [vmem:[%s10071_s3 + $0x260] sm:$0xff] }
 0x3ca   :  { %v2738_v38 = vpop.f32.mrb[3].mxu1  ;;  %v6552_v60 = vpack.c.bf16 %v5774_v3, %v5773_v6  ;;  %v6555_v3 = vpack.c.bf16 %v5776_v30, %v5775_v13  ;;  %v3329_v13 = vrot.slane %v8425_v1, 6 }
 0x3cb   :  { %v3311_v38 = vrot.slane %v8353_v11, 6  ;;  %v3320_v11 = vsel %vm2661_vm7, %v3315_v18, %v3319_v48 }
 0x3cc   :  { %3516 = vmatmul.mubr.f32.vlgmr.msra.gmra.mrb[96].mxu1 %v3303_v32 }
 0x3cd   :  { %5754 = vmatprep.mubr.msk.f32.mxu1 %vm2628_vm10, %v3310_v49  ;;  %6547 = vmatpush1.bf16.msra.mxu1 %v6546_v23  ;;  %v3316_v23 = vsel %vm2661_vm7, %v3314_v8, %v3315_v18  ;;  %v3313_v49 = vsel %vm2661_vm7, %v3311_v38, %v3312_v40  ;;  %v3317_v8 = vrot.slane %v8374_v52, 6  ;;  %v5777_v38 = vld [vmem:[%s10071_s3 + $0x280] sm:$0xff]  ;;  %v5778_v18 = vld [vmem:[%s10071_s3 + $0x288] sm:$0xff] }
 0x3ce   :  { %6548 = vmatprep.subr.bf16.mxu1 %v10104_v56  ;;  %v6558_v30 = vpack.c.bf16 %v5778_v18, %v5777_v38  ;;  %v3334_v18 = vrot.slane %v8447_v44, 6 }
 0x3cf   :  { %v3318_v48 = vsel %vm2661_vm7, %v3312_v40, %v3317_v8  ;;  %v5780_v40 = vld [vmem:[%s10071_s3 + $0x298] sm:$0xff] }
 0x3d0   :  { %3521 = vmatmul.mubr.f32.gmra.mrb[98].mxu1 %v3308_v14 }
 0x3d1   :  { %v8929_v37 = vpop.f32.mrb[4].mxu1  ;;  %5755 = vmatprep.mubr.msk.f32.mxu1 %vm2628_vm10, %v3316_v23  ;;  %6550 = vmatpush1.bf16.msra.mxu1 %v6549_v9  ;;  %v3325_v9 = vrot.slane %v8408_v5, 6  ;;  %v3324_v23 = vrot.slane %v8392_v2, 6  ;;  %v3321_v2 = vrot.slane %v8403_v21, 6 }
 0x3d2   :  { %v2743_v32 = vpop.f32.mrb[5].mxu1  ;;  %6551 = vmatprep.subr.bf16.mxu1 %v10104_v56 }
 0x3d3   :  { %v3322_v32 = vrot.slane %v8411_v57, 6  ;;  %v3330_v21 = vsel %vm2661_vm7, %v3325_v9, %v3329_v13  ;;  %v3332_v13 = vrot.slane %v8464_v31, 6 }
 0x3d4   :  { %3526 = vmatmul.mubr.f32.gmra.mrb[100].mxu1 %v3313_v49  ;;  %v5779_v49 = vld [vmem:[%s10071_s3 + $0x290] sm:$0xff] }
 0x3d5   :  { %v8944_v6 = vpop.f32.mrb[6].mxu1  ;;  %5756 = vmatprep.mubr.msk.f32.mxu1 %vm2628_vm10, %v3320_v11  ;;  %6553 = vmatpush1.bf16.msra.mxu1 %v6552_v60  ;;  %v3326_v60 = vsel %vm2661_vm7, %v3324_v23, %v3325_v9  ;;  %v3323_v11 = vsel %vm2661_vm7, %v3321_v2, %v3322_v32  ;;  %v6561_v38 = vpack.c.bf16 %v5780_v40, %v5779_v49  ;;  %v3331_v49 = vrot.slane %v8455_v35, 6 }
 0x3d6   :  { %v2748_v14 = vpop.f32.mrb[7].mxu1  ;;  %6554 = vmatprep.subr.bf16.mxu1 %v10104_v56 }
 0x3d7   :  { %v3327_v14 = vrot.slane %v8440_v22, 6 }
 0x3d8   :  { %3531 = vmatmul.mubr.f32.gmra.mrb[102].mxu1 %v3318_v48  ;;  %v5781_v48 = vld [vmem:[%s10071_s3 + $0x2a0] sm:$0xff] }
 0x3d9   :  { %5757 = vmatprep.mubr.msk.f32.mxu1 %vm2628_vm10, %v3326_v60  ;;  %6556 = vmatpush1.bf16.msra.mxu1 %v6555_v3  ;;  %v3335_v3 = vrot.slane %v8452_v0, 6  ;;  %v5782_v60 = vld [vmem:[%s10071_s3 + $0x2a8] sm:$0xff]  ;;  %v3328_v9 = vsel %vm2661_vm7, %v3322_v32, %v3327_v14  ;;  %v5783_v32 = vld [vmem:[%s10071_s3 + $0x2b0] sm:$0xff]  ;;  %v5784_v14 = vld [vmem:[%s10071_s3 + $0x2b8] sm:$0xff] }
 0x3da   :  { %6557 = vmatprep.subr.bf16.mxu1 %v10104_v56  ;;  %v6564_v40 = vpack.c.bf16 %v5782_v60, %v5781_v48  ;;  %v3344_v48 = vrot.slane %v8483_v42, 6  ;;  %v5785_v60 = vld [vmem:[%s10071_s3 + $0x2c0] sm:$0xff] }
 0x3db   :  { %v8968_v8 = vpop.f32.mrb[8].mxu1  ;;  %v3336_v2 = vsel %vm2661_vm7, %v3334_v18, %v3335_v3  ;;  %v6567_v18 = vpack.c.bf16 %v5784_v14, %v5783_v32  ;;  %v3347_v14 = vrot.slane %v10112_v29, 6 }
 0x3dc   :  { %v2753_v23 = vpop.f32.mrb[9].mxu1  ;;  %3536 = vmatmul.mubr.f32.gmra.mrb[104].mxu1 %v3323_v11 }
 0x3dd   :  { %5758 = vmatprep.mubr.msk.f32.mxu1 %vm2628_vm10, %v3330_v21  ;;  %6559 = vmatpush1.bf16.msra.mxu1 %v6558_v30  ;;  %v3339_v30 = vrot.slane %v8468_v4, 6  ;;  %v3333_v23 = vsel %vm2661_vm7, %v3331_v49, %v3332_v13  ;;  %v3337_v21 = vrot.slane %v8472_v28, 6  ;;  %v3349_v49 = vrot.slane %v8502_v34, 6 }
 0x3de   :  { %6560 = vmatprep.subr.bf16.mxu1 %v10104_v56 }
 0x3df   :  { %v3340_v35 = vsel %vm2661_vm7, %v3335_v3, %v3339_v30  ;;  %v3338_v3 = vsel %vm2661_vm7, %v3332_v13, %v3337_v21  ;;  %v3355_v21 = vrot.slane %v8521_v20, 6 }
 0x3e0   :  { %3541 = vmatmul.mubr.f32.gmra.mrb[106].mxu1 %v3328_v9  ;;  %v5786_v9 = vld [vmem:[%s10071_s3 + $0x2c8] sm:$0x3]  ;;  %s7067_s3 = smov 116  }
 0x3e1   :  { %v8987_v44 = vpop.f32.mrb[10].mxu1  ;;  %5759 = vmatprep.mubr.msk.f32.mxu1 %vm2628_vm10, %v3336_v2  ;;  %6562 = vmatpush1.bf16.msra.mxu1 %v6561_v38  ;;  %v3345_v38 = vrot.slane %v8492_v55, 6  ;;  %v3342_v2 = vrot.slane %v8495_v53, 6 }
 0x3e2   :  { %v2758_v11 = vpop.f32.mrb[11].mxu1  ;;  %6563 = vmatprep.subr.bf16.mxu1 %v10104_v56 }
 0x3e3   :  { %v3346_v30 = vsel %vm2661_vm7, %v3344_v48, %v3345_v38  ;;  %v6570_v11 = vpack.c.bf16 %v5786_v9, %v5785_v60  ;;  %v3352_v48 = vrot.slane %v8530_v39, 6  ;;  %v3351_v9 = vrot.slane %v8524_v36, 6 }
 0x3e4   :  { %3546 = vmatmul.mubr.f32.gmra.mrb[108].mxu1 %v3333_v23  ;;  %v3350_v23 = vsel %vm2661_vm7, %v3345_v38, %v3349_v49  ;;  %v3359_v38 = vrot.slane %v10113_v16, 6  ;;  %v3365_v49 = vrot.slane %v8558_v63, 6  ;;  %v3362_v36 = vrot.slane %v8561_v26, 6 }
 0x3e5   :  { %5760 = vmatprep.mubr.msk.f32.mxu1 %vm2628_vm10, %v3340_v35  ;;  %6565 = vmatpush1.bf16.msra.mxu1 %v6564_v40  ;;  %v3341_v40 = vrot.slane %v8487_v15, 6  ;;  %v3353_v46 = vsel %vm2661_vm7, %v3351_v9, %v3352_v48  ;;  %v3379_v9 = vrot.slane %v8602_v17, 6 }
 0x3e6   :  { %6566 = vmatprep.subr.bf16.mxu1 %v10104_v56 }
 0x3e7   :  { %v3343_v13 = vsel %vm2661_vm7, %v3341_v40, %v3342_v2  ;;  %v3364_v40 = vrot.slane %v8549_v61, 6  ;;  %v3367_v61 = vrot.slane %v8576_v33, 6 }
 0x3e8   :  { %3551 = vmatmul.mubr.f32.gmra.mrb[110].mxu1 %v3338_v3 }
 0x3e9   :  { %v9015_v42 = vpop.f32.mrb[12].mxu1  ;;  %5761 = vmatprep.mubr.msk.f32.mxu1 %vm2628_vm10, %v3346_v30  ;;  %6568 = vmatpush1.bf16.msra.mxu1 %v6567_v18  ;;  %v3354_v18 = vrot.slane %v8517_v51, 6  ;;  %v3357_v30 = vrot.slane %v10114_v45, 6 }
 0x3ea   :  { %v2763_v32 = vpop.f32.mrb[13].mxu1  ;;  %6569 = vmatprep.subr.bf16.mxu1 %v10104_v56  ;;  %v3348_v56 = vsel %vm2661_vm7, %v3342_v2, %v3347_v14  ;;  %v3360_v2 = vsel %vm2661_vm7, %v3355_v21, %v3359_v38  ;;  %v3372_v38 = vrot.slane %v8594_v58, 6 }
 0x3eb   :  { %v3356_v60 = vsel %vm2661_vm7, %v3354_v18, %v3355_v21  ;;  %v3366_v32 = vsel %vm2661_vm7, %v3364_v40, %v3365_v49 }
 0x3ec   :  { %3556 = vmatmul.mubr.f32.gmra.mrb[112].mxu1 %v3343_v13  ;;  %v3369_v13 = vrot.slane %v8568_v24, 6 }
 0x3ed   :  { %v9024_v35 = vpop.f32.mrb[14].mxu1  ;;  %5762 = vmatprep.mubr.msk.f32.mxu1 %vm2628_vm10, %v3350_v23  ;;  %6572 = vmatpush1.bf16.msk.msra.mxu1 %vm8006_vm8, %v6570_v11  ;;  %v3358_v11 = vsel %vm2661_vm7, %v3352_v48, %v3357_v30  ;;  %v3361_v23 = vrot.slane %v8553_v19, 6  ;;  %v3374_v48 = vrot.slane %v8583_v7, 6  ;;  %v3371_v30 = vrot.slane %v8586_v27, 6 }
 0x3ee   :  { %v2768_v15 = vpop.f32.mrb[15].mxu1  ;;  %v3370_v18 = vsel %vm2661_vm7, %v3365_v49, %v3369_v13  ;;  %v3377_v7 = vrot.slane %v8606_v59, 6 }
 0x3ef   :  { %v3363_v15 = vsel %vm2661_vm7, %v3361_v23, %v3362_v36 }
 0x3f0   :  { %3561 = vmatmul.mubr.f32.gmra.mrb[114].mxu1 %v3348_v56  ;;  %v3375_v56 = vrot.slane %v8591_v50, 6 }
 0x3f1   :  { %5763 = vmatprep.mubr.msk.f32.mxu1 %vm2628_vm10, %v3356_v60  ;;  %v3368_v60 = vsel %vm2661_vm7, %v3362_v36, %v3367_v61  ;;  %v3378_v36 = vsel %vm2661_vm7, %v3372_v38, %v3377_v7 }
 0x3f2   :  { %v3376_v19 = vsel %vm2661_vm7, %v3374_v48, %v3375_v56  ;;  %v3380_v49 = vsel %vm2661_vm7, %v3375_v56, %v3379_v9 }
 0x3f3   :  { %v9036_v3 = vpop.f32.mrb[16].mxu1 }
 0x3f4   :  { %v2773_v51 = vpop.f32.mrb[17].mxu1  ;;  %3566 = vmatmul.mubr.f32.gmra.mrb[116].mxu1 %v3353_v46 }
 0x3f5   :  { %5764 = vmatprep.mubr.msk.f32.mxu1 %vm2628_vm10, %v3360_v2  ;;  %v3373_v2 = vsel %vm2661_vm7, %v3371_v30, %v3372_v38 }
 0x3f8   :  { %3571 = vmatmul.mubr.f32.gmra.mrb[118].mxu1 %v3358_v11 }
 0x3f9   :  { %v9048_v14 = vpop.f32.mrb[18].mxu1  ;;  %5765 = vmatprep.mubr.msk.f32.mxu1 %vm2628_vm10, %v3366_v32 }
 0x3fa   :  { %v2778_v21 = vpop.f32.mrb[19].mxu1 }
 0x3fc   :  { %3576 = vmatmul.mubr.f32.gmra.mrb[120].mxu1 %v3363_v15 }
 0x3fd   :  { %5766 = vmatprep.mubr.msk.f32.mxu1 %vm2628_vm10, %v3370_v18 }
 0x400   :  { %3581 = vmatmul.mubr.f32.gmra.mrb[122].mxu1 %v3368_v60 }
 0x401   :  { %v9062_v46 = vpop.f32.mrb[20].mxu1  ;;  %5767 = vmatprep.mubr.msk.f32.mxu1 %vm2628_vm10, %v3376_v19 }
 0x402   :  { %v2783_v51 = vpop.f32.mrb[21].mxu1 }
 0x404   :  { %3586 = vmatmul.mubr.f32.gmra.mrb[124].mxu1 %v3373_v2 }
 0x405   :  { %v9069_v40 = vpop.f32.mrb[22].mxu1  ;;  %5768 = vmatprep.mubr.msk.f32.mxu1 %vm2628_vm10, %v3380_v49 }
 0x406   :  { %v2788_v11 = vpop.f32.mrb[23].mxu1 }
 0x408   :  { %3591 = vmatmul.mubr.f32.gmra.mrb[126].mxu1 %v3378_v36 }
 0x409   :  { %5788 = vmatprep.mubr.msk.f32.mxu1 %vm2628_vm10, %v8290_v41 }
 0x40b   :  { %v9075_v27 = vpop.f32.mrb[24].mxu1 }
 0x40c   :  { %v2793_v32 = vpop.f32.mrb[25].mxu1  ;;  %3715 = vmatmul.mubr.f32.vlgmr.msra.gmra.mrb[128].mxu1 %v8306_v62 }
 0x40d   :  { %5789 = vmatprep.mubr.msk.f32.mxu1 %vm2628_vm10, %v8310_v47 }
 0x410   :  { %3720 = vmatmul.mubr.f32.gmra.mrb[130].mxu1 %v8334_v12 }
 0x411   :  { %v9081_v13 = vpop.f32.mrb[26].mxu1  ;;  %5790 = vmatprep.mubr.msk.f32.mxu1 %vm2628_vm10, %v8350_v25  ;;  %v10116_v25 = vld [vmem:[#allocation5_spill] sm:$0xff] }
 0x412   :  { %v2798_v23 = vpop.f32.mrb[27].mxu1 }
 0x414   :  { %3725 = vmatmul.mubr.f32.gmra.mrb[132].mxu1 %v8366_v10 }
 0x415   :  { %5791 = vmatprep.mubr.msk.f32.mxu1 %vm2628_vm10, %v8370_v54 }
 0x417   :  { %v9088_v41 = vpop.f32.mrb[28].mxu1 }
 0x418   :  { %v2803_v21 = vpop.f32.mrb[29].mxu1  ;;  %3730 = vmatmul.mubr.f32.gmra.mrb[134].mxu1 %v8374_v52 }
 0x419   :  { %5792 = vmatprep.mubr.msk.f32.mxu1 %vm2628_vm10, %v8408_v5 }
 0x41b   :  { %v9093_v62 = vpop.f32.mrb[30].mxu1 }
 0x41c   :  { %v2808_v47 = vpop.f32.mrb[31].mxu1  ;;  %3735 = vmatmul.mubr.f32.gmra.mrb[136].mxu1 %v8411_v57 }
 0x41d   :  { %5793 = vmatprep.mubr.msk.f32.mxu1 %vm2628_vm10, %v8425_v1 }
 0x41f   :  { %v2911_v12 = vpop.f32.mrb[32].mxu1 }
 0x420   :  { %v9099_v10 = vadd.f32 %v2911_v12, %v10116_v25  ;;  %v2913_v54 = vpop.f32.mrb[33].mxu1  ;;  %3740 = vmatmul.mubr.f32.gmra.mrb[138].mxu1 %v8440_v22 }
 0x421   :  { %5794 = vmatprep.mubr.msk.f32.mxu1 %vm2628_vm10, %v8452_v0 }
 0x423   :  { %v2916_v52 = vpop.f32.mrb[34].mxu1 }
 0x424   :  { %v9105_v5 = vadd.f32 %v2916_v52, %v8903_v43  ;;  %v2918_v15 = vpop.f32.mrb[35].mxu1  ;;  %3745 = vmatmul.mubr.f32.gmra.mrb[140].mxu1 %v8464_v31 }
 0x425   :  { %5795 = vmatprep.mubr.msk.f32.mxu1 %vm2628_vm10, %v8468_v4 }
 0x427   :  { %v2921_v57 = vpop.f32.mrb[36].mxu1 }
 0x428   :  { %v9111_v1 = vadd.f32 %v2921_v57, %v8929_v37  ;;  %v2923_v61 = vpop.f32.mrb[37].mxu1  ;;  %3750 = vmatmul.mubr.f32.gmra.mrb[142].mxu1 %v8472_v28 }
 0x429   :  { %5796 = vmatprep.mubr.msk.f32.mxu1 %vm2628_vm10, %v8492_v55 }
 0x42b   :  { %v2926_v22 = vpop.f32.mrb[38].mxu1 }
 0x42c   :  { %v9117_v0 = vadd.f32 %v2926_v22, %v8944_v6  ;;  %v2928_v43 = vpop.f32.mrb[39].mxu1  ;;  %3755 = vmatmul.mubr.f32.gmra.mrb[144].mxu1 %v8495_v53 }
 0x42d   :  { %5797 = vmatprep.mubr.msk.f32.mxu1 %vm2628_vm10, %v8502_v34 }
 0x42f   :  { %v2931_v31 = vpop.f32.mrb[40].mxu1 }
 0x430   :  { %v2932_v4 = vadd.f32 %v2931_v31, %v8968_v8  ;;  %v2933_v37 = vpop.f32.mrb[41].mxu1  ;;  %3760 = vmatmul.mubr.f32.gmra.mrb[146].mxu1 %v10112_v29 }
 0x431   :  { %5798 = vmatprep.mubr.msk.f32.mxu1 %vm2628_vm10, %v8521_v20 }
 0x433   :  { %v2936_v28 = vpop.f32.mrb[42].mxu1 }
 0x434   :  { %v2937_v55 = vadd.f32 %v2936_v28, %v8987_v44  ;;  %v2938_v6 = vpop.f32.mrb[43].mxu1  ;;  %3765 = vmatmul.mubr.f32.gmra.mrb[148].mxu1 %v8530_v39 }
 0x435   :  { %5799 = vmatprep.mubr.msk.f32.mxu1 %vm2628_vm10, %v10113_v16 }
 0x437   :  { %v2941_v53 = vpop.f32.mrb[44].mxu1 }
 0x438   :  { %v2942_v34 = vadd.f32 %v2941_v53, %v9015_v42  ;;  %v2943_v18 = vpop.f32.mrb[45].mxu1  ;;  %3770 = vmatmul.mubr.f32.gmra.mrb[150].mxu1 %v10114_v45 }
 0x439   :  { %5800 = vmatprep.mubr.msk.f32.mxu1 %vm2628_vm10, %v8558_v63 }
 0x43b   :  { %v2946_v29 = vpop.f32.mrb[46].mxu1 }
 0x43c   :  { %v2947_v20 = vadd.f32 %v2946_v29, %v9024_v35  ;;  %v2948_v8 = vpop.f32.mrb[47].mxu1  ;;  %3775 = vmatmul.mubr.f32.gmra.mrb[152].mxu1 %v8561_v26 }
 0x43d   :  { %5801 = vmatprep.mubr.msk.f32.mxu1 %vm2628_vm10, %v8568_v24 }
 0x43f   :  { %v2951_v39 = vpop.f32.mrb[48].mxu1 }
 0x440   :  { %v2952_v16 = vadd.f32 %v2951_v39, %v9036_v3  ;;  %v2953_v44 = vpop.f32.mrb[49].mxu1  ;;  %3780 = vmatmul.mubr.f32.gmra.mrb[154].mxu1 %v8576_v33 }
 0x441   :  { %5802 = vmatprep.mubr.msk.f32.mxu1 %vm2628_vm10, %v8591_v50 }
 0x443   :  { %v2956_v45 = vpop.f32.mrb[50].mxu1 }
 0x444   :  { %v2957_v63 = vadd.f32 %v2956_v45, %v9048_v14  ;;  %v2958_v42 = vpop.f32.mrb[51].mxu1  ;;  %3785 = vmatmul.mubr.f32.gmra.mrb[156].mxu1 %v8594_v58 }
 0x445   :  { %5803 = vmatprep.mubr.msk.f32.mxu1 %vm2628_vm10, %v8602_v17 }
 0x447   :  { %v2961_v26 = vpop.f32.mrb[52].mxu1 }
 0x448   :  { %v2962_v24 = vadd.f32 %v2961_v26, %v9062_v46  ;;  %v2963_v35 = vpop.f32.mrb[53].mxu1  ;;  %3790 = vmatmul.mubr.f32.gmra.mrb[158].mxu1 %v8606_v59 }
 0x44b   :  { %v2966_v3 = vpop.f32.mrb[54].mxu1 }
 0x44c   :  { %v2967_v33 = vadd.f32 %v2966_v3, %v9069_v40  ;;  %v2968_v56 = vpop.f32.mrb[55].mxu1 }
 0x44f   :  { %v2971_v50 = vpop.f32.mrb[56].mxu1 }
 0x450   :  { %v2972_v48 = vadd.f32 %v2971_v50, %v9075_v27  ;;  %v2973_v14 = vpop.f32.mrb[57].mxu1 }
 0x453   :  { %v2976_v60 = vpop.f32.mrb[58].mxu1 }
 0x454   :  { %v2977_v58 = vadd.f32 %v2976_v60, %v9081_v13  ;;  %v2978_v38 = vpop.f32.mrb[59].mxu1 }
 0x457   :  { %v2981_v19 = vpop.f32.mrb[60].mxu1 }
 0x458   :  { %v2982_v17 = vadd.f32 %v2981_v19, %v9088_v41  ;;  %v2983_v9 = vpop.f32.mrb[61].mxu1 }
 0x459   :  { %v5805_v9 = vld [vmem:[%s10073_s5 + $0x58] sm:$0xff] }
 0x45b   :  { %v2986_v46 = vpop.f32.mrb[62].mxu1 }
 0x45c   :  { %v2987_v30 = vadd.f32 %v2986_v46, %v9093_v62  ;;  %v2988_v59 = vpop.f32.mrb[63].mxu1  ;;  %v5806_v46 = vld [vmem:[%s10073_s5 + $0x60] sm:$0xff] }
 0x45d   :  { %v6573_v59 = vpack.c.bf16 %v5806_v46, %v5805_v9  ;;  %v5814_v46 = vld [vmem:[%s10073_s5 + $0xa0] sm:$0xff] }
 0x45f   :  { %v3206_v51 = vpop.f32.mrb[64].mxu1  ;;  %6574 = vmatprep.subr.bf16.mxu1 %v6573_v59 }
 0x460   :  { %v3285_v2 = vadd.f32 %v3206_v51, %v9099_v10  ;;  %v3208_v7 = vpop.f32.mrb[65].mxu1  ;;  %v5808_v51 = vld [vmem:[%s10073_s5 + $0x70] sm:$0xff]  ;;  %6576 = vmatpush3.bf16.msra.mxu1 %v6573_v59 }
 0x461   :  { %v5809_v7 = vld [vmem:[%s10073_s5 + $0x78] sm:$0xff] }
 0x463   :  { %v3211_v49 = vpop.f32.mrb[66].mxu1 }
 0x464   :  { %v3286_v40 = vadd.f32 %v3211_v49, %v9105_v5  ;;  %v3213_v11 = vpop.f32.mrb[67].mxu1  ;;  %v5810_v49 = vld [vmem:[%s10073_s5 + $0x80] sm:$0xff] }
 0x467   :  { %v3216_v36 = vpop.f32.mrb[68].mxu1 }
 0x468   :  { %v3287_v27 = vadd.f32 %v3216_v36, %v9111_v1  ;;  %v3218_v32 = vpop.f32.mrb[69].mxu1 }
 0x46b   :  { %v3221_v13 = vpop.f32.mrb[70].mxu1 }
 0x46c   :  { %v3288_v23 = vadd.f32 %v3221_v13, %v9117_v0  ;;  %v3223_v41 = vpop.f32.mrb[71].mxu1 }
 0x46f   :  { %v3226_v21 = vpop.f32.mrb[72].mxu1 }
 0x470   :  { %v3289_v47 = vadd.f32 %v3226_v21, %v2932_v4  ;;  %v3228_v62 = vpop.f32.mrb[73].mxu1 }
 0x473   :  { %v3231_v12 = vpop.f32.mrb[74].mxu1 }
 0x474   :  { %v3290_v25 = vadd.f32 %v3231_v12, %v2937_v55  ;;  %v3233_v54 = vpop.f32.mrb[75].mxu1 }
 0x477   :  { %v3236_v10 = vpop.f32.mrb[76].mxu1 }
 0x478   :  { %v9157_v52 = vadd.f32 %v3236_v10, %v2942_v34  ;;  %v3238_v15 = vpop.f32.mrb[77].mxu1 }
 0x47b   :  { %v3241_v5 = vpop.f32.mrb[78].mxu1 }
 0x47c   :  { %v9159_v57 = vadd.f32 %v3241_v5, %v2947_v20  ;;  %v3243_v61 = vpop.f32.mrb[79].mxu1 }
 0x47f   :  { %v3246_v1 = vpop.f32.mrb[80].mxu1 }
 0x480   :  { %v9161_v22 = vadd.f32 %v3246_v1, %v2952_v16  ;;  %v3248_v43 = vpop.f32.mrb[81].mxu1 }
 0x483   :  { %v3251_v0 = vpop.f32.mrb[82].mxu1 }
 0x484   :  { %v9163_v31 = vadd.f32 %v3251_v0, %v2957_v63  ;;  %v3253_v4 = vpop.f32.mrb[83].mxu1 }
 0x487   :  { %v3256_v37 = vpop.f32.mrb[84].mxu1 }
 0x488   :  { %v9165_v28 = vadd.f32 %v3256_v37, %v2962_v24  ;;  %v3258_v55 = vpop.f32.mrb[85].mxu1 }
 0x48b   :  { %v3261_v6 = vpop.f32.mrb[86].mxu1 }
 0x48c   :  { %v9167_v53 = vadd.f32 %v3261_v6, %v2967_v33  ;;  %v3263_v34 = vpop.f32.mrb[87].mxu1 }
 0x48f   :  { %v3266_v18 = vpop.f32.mrb[88].mxu1 }
 0x490   :  { %v9169_v29 = vadd.f32 %v3266_v18, %v2972_v48  ;;  %v3268_v20 = vpop.f32.mrb[89].mxu1 }
 0x493   :  { %v3271_v8 = vpop.f32.mrb[90].mxu1 }
 0x494   :  { %v9171_v39 = vadd.f32 %v3271_v8, %v2977_v58  ;;  %v3273_v16 = vpop.f32.mrb[91].mxu1 }
 0x497   :  { %v3276_v44 = vpop.f32.mrb[92].mxu1 }
 0x498   :  { %v9173_v45 = vadd.f32 %v3276_v44, %v2982_v17  ;;  %v3278_v63 = vpop.f32.mrb[93].mxu1 }
 0x49b   :  { %v3281_v42 = vpop.f32.mrb[94].mxu1 }
 0x49c   :  { %v9175_v26 = vadd.f32 %v3281_v42, %v2987_v30  ;;  %v3283_v24 = vpop.f32.mrb[95].mxu1  ;;  %v5807_v30 = vld [vmem:[%s10073_s5 + $0x68] sm:$0xff] }
 0x49f   :  { %v3517_v35 = vpop.f32.mrb[96].mxu1 }
 0x4a0   :  { %v9177_v3 = vadd.f32 %v3517_v35, %v3285_v2  ;;  %v3519_v33 = vpop.f32.mrb[97].mxu1  ;;  %v6577_v2 = vpack.c.bf16 %v5808_v51, %v5807_v30 }
 0x4a2   :  { %6578 = vmatprep.subr.bf16.mxu1 %v6577_v2 }
 0x4a3   :  { %v3522_v56 = vpop.f32.mrb[98].mxu1  ;;  %6580 = vmatpush3.bf16.msra.mxu1 %v6577_v2 }
 0x4a4   :  { %v9179_v50 = vadd.f32 %v3522_v56, %v3286_v40  ;;  %v3524_v48 = vpop.f32.mrb[99].mxu1  ;;  %v5812_v56 = vld [vmem:[%s10073_s5 + $0x90] sm:$0xff] }
 0x4a7   :  { %v3527_v14 = vpop.f32.mrb[100].mxu1 }
 0x4a8   :  { %v9181_v60 = vadd.f32 %v3527_v14, %v3287_v27  ;;  %v3529_v58 = vpop.f32.mrb[101].mxu1  ;;  %v6581_v27 = vpack.c.bf16 %v5810_v49, %v5809_v7 }
 0x4aa   :  { %6582 = vmatprep.subr.bf16.mxu1 %v6581_v27 }
 0x4ab   :  { %v3532_v38 = vpop.f32.mrb[102].mxu1  ;;  %6584 = vmatpush3.bf16.msra.mxu1 %v6581_v27 }
 0x4ac   :  { %v9183_v19 = vadd.f32 %v3532_v38, %v3288_v23  ;;  %v3534_v17 = vpop.f32.mrb[103].mxu1 }
 0x4af   :  { %v3537_v40 = vpop.f32.mrb[104].mxu1 }
 0x4b0   :  { %v9203_v11 = vadd.f32 %v3537_v40, %v3289_v47  ;;  %v3539_v36 = vpop.f32.mrb[105].mxu1 }
 0x4b3   :  { %v3542_v32 = vpop.f32.mrb[106].mxu1 }
 0x4b4   :  { %v9205_v13 = vadd.f32 %v3542_v32, %v3290_v25  ;;  %v3544_v23 = vpop.f32.mrb[107].mxu1  ;;  %v5815_v32 = vld [vmem:[%s10073_s5 + $0xa8] sm:$0xf] }
 0x4b7   :  { %v3547_v41 = vpop.f32.mrb[108].mxu1 }
 0x4b8   :  { %v9208_v21 = vadd.f32 %v3547_v41, %v9157_v52  ;;  %v3549_v62 = vpop.f32.mrb[109].mxu1 }
 0x4bb   :  { %v3552_v12 = vpop.f32.mrb[110].mxu1 }
 0x4bc   :  { %v9211_v47 = vadd.f32 %v3552_v12, %v9159_v57  ;;  %v3554_v54 = vpop.f32.mrb[111].mxu1 }
 0x4bf   :  { %v3557_v10 = vpop.f32.mrb[112].mxu1 }
 0x4c0   :  { %v9214_v15 = vadd.f32 %v3557_v10, %v9161_v22  ;;  %v3559_v25 = vpop.f32.mrb[113].mxu1 }
 0x4c3   :  { %v3562_v5 = vpop.f32.mrb[114].mxu1 }
 0x4c4   :  { %v9217_v61 = vadd.f32 %v3562_v5, %v9163_v31  ;;  %v3564_v1 = vpop.f32.mrb[115].mxu1 }
 0x4c7   :  { %v3567_v43 = vpop.f32.mrb[116].mxu1 }
 0x4c8   :  { %v9220_v52 = vadd.f32 %v3567_v43, %v9165_v28  ;;  %v3569_v0 = vpop.f32.mrb[117].mxu1 }
 0x4cb   :  { %v3572_v4 = vpop.f32.mrb[118].mxu1 }
 0x4cc   :  { %v9223_v57 = vadd.f32 %v3572_v4, %v9167_v53  ;;  %v3574_v37 = vpop.f32.mrb[119].mxu1 }
 0x4cf   :  { %v3577_v55 = vpop.f32.mrb[120].mxu1 }
 0x4d0   :  { %v9226_v22 = vadd.f32 %v3577_v55, %v9169_v29  ;;  %v3579_v6 = vpop.f32.mrb[121].mxu1  ;;  %v9240_v29 = vld [vmem:[%s10074_s4] ss:$0 sm:$0xff] }
 0x4d3   :  { %v3582_v34 = vpop.f32.mrb[122].mxu1 }
 0x4d4   :  { %v9229_v31 = vadd.f32 %v3582_v34, %v9171_v39  ;;  %v3584_v18 = vpop.f32.mrb[123].mxu1 }
 0x4d7   :  { %v3587_v20 = vpop.f32.mrb[124].mxu1 }
 0x4d8   :  { %v9232_v28 = vadd.f32 %v3587_v20, %v9173_v45  ;;  %v3589_v8 = vpop.f32.mrb[125].mxu1 }
 0x4db   :  { %v3592_v16 = vpop.f32.mrb[126].mxu1 }
 0x4dc   :  { %v9235_v53 = vadd.f32 %v3592_v16, %v9175_v26  ;;  %v3594_v44 = vpop.f32.mrb[127].mxu1  ;;  %v5811_v26 = vld [vmem:[%s10073_s5 + $0x88] sm:$0xff] }
 0x4dd   :  { %v6585_v48 = vpack.c.bf16 %v5812_v56, %v5811_v26 }
 0x4df   :  { %v3716_v63 = vpop.f32.mrb[128].mxu1  ;;  %6586 = vmatprep.subr.bf16.mxu1 %v6585_v48 }
 0x4e0   :  { %v3795_v39 = vadd.f32 %v3716_v63, %v9177_v3  ;;  %v3718_v42 = vpop.f32.mrb[129].mxu1  ;;  %6588 = vmatpush3.bf16.msra.mxu1 %v6585_v48 }
 0x4e2   :  { %v3818_v24 = vadd.f32 %v9240_v29, %v3795_v39 }
 0x4e3   :  { %v3721_v35 = vpop.f32.mrb[130].mxu1 }
 0x4e4   :  { %v3796_v45 = vadd.f32 %v3721_v35, %v9179_v50  ;;  %v3723_v33 = vpop.f32.mrb[131].mxu1  ;;  %v3834_v14 = vmax.f32 %v3818_v24, 0.0  ;;  %v5813_v50 = vld [vmem:[%s10073_s5 + $0x98] sm:$0xff] }
 0x4e5   :  { %v6589_v30 = vpack.c.bf16 %v5814_v46, %v5813_v50 }
 0x4e6   :  { %v3819_v58 = vadd.f32 %v9240_v29, %v3796_v45  ;;  %v9259_v59 = vrot.slane %v3834_v14, 2 }
 0x4e7   :  { %v3726_v3 = vpop.f32.mrb[132].mxu1  ;;  %6590 = vmatprep.subr.bf16.mxu1 %v6589_v30 }
 0x4e8   :  { %v3835_v38 = vmax.f32 %v3819_v58, 0.0  ;;  %v3797_v17 = vadd.f32 %v3726_v3, %v9181_v60  ;;  %v3728_v9 = vpop.f32.mrb[133].mxu1  ;;  %6592 = vmatpush3.bf16.msra.mxu1 %v6589_v30 }
 0x4e9   :  { %6125 = vmatprep.subr.msk.mxu1 %vm225_vm0, %v5815_v32 }
 0x4ea   :  { %v3867_v51 = vrot.slane %v3835_v38, 2  ;;  %v3820_v2 = vadd.f32 %v9240_v29, %v3797_v17 }
 0x4eb   :  { %v3731_v7 = vpop.f32.mrb[134].mxu1 }
 0x4ec   :  { %v3836_v49 = vmax.f32 %v3820_v2, 0.0  ;;  %v3798_v60 = vadd.f32 %v3731_v7, %v9183_v19  ;;  %v3733_v40 = vpop.f32.mrb[135].mxu1  ;;  %v3868_v36 = vsel %vm704_vm5, %v9259_v59, %v3867_v51  ;;  %v9265_v27 = vmax.f32 %v3835_v38, %v3867_v51  ;;  %6126 = vmatpush3.msk.msra.mxu1 %vm225_vm0, %v5815_v32 }
 0x4ed   :  { %v9270_v23 = vmax.f32 %v3834_v14, %v3868_v36 }
 0x4ee   :  { %v3869_v41 = vrot.slane %v3836_v49, 2  ;;  %v3821_v62 = vadd.f32 %v9240_v29, %v3798_v60 }
 0x4ef   :  { %v3736_v12 = vpop.f32.mrb[136].mxu1  ;;  %3949 = vrot.lane.b32.xlu1 %v9270_v23, %s7067_s3 }
 0x4f0   :  { %v3837_v19 = vmax.f32 %v3821_v62, 0.0  ;;  %v3799_v54 = vadd.f32 %v3736_v12, %v9203_v11  ;;  %v3738_v10 = vpop.f32.mrb[137].mxu1  ;;  %v3870_v25 = vsel %vm704_vm5, %v3867_v51, %v3869_v41  ;;  %v4018_v12 = vld [vmem:[%s10073_s5 + $0x8] sm:$0xff] }
 0x4f1   :  { %v9279_v5 = vmax.f32 %v3835_v38, %v3870_v25 }
 0x4f2   :  { %v3871_v1 = vrot.slane %v3837_v19, 2  ;;  %v3822_v43 = vadd.f32 %v9240_v29, %v3799_v54 }
 0x4f3   :  { %v3741_v0 = vpop.f32.mrb[138].mxu1  ;;  %3951 = vrot.lane.b32.xlu0 %v9279_v5, %s7067_s3 }
 0x4f4   :  { %v3838_v4 = vmax.f32 %v3822_v43, 0.0  ;;  %v3800_v37 = vadd.f32 %v3741_v0, %v9205_v13  ;;  %v3743_v55 = vpop.f32.mrb[139].mxu1  ;;  %v3872_v11 = vsel %vm704_vm5, %v3869_v41, %v3871_v1 }
 0x4f5   :  { %v9286_v6 = vmax.f32 %v3836_v49, %v3872_v11 }
 0x4f6   :  { %v3873_v34 = vrot.slane %v3838_v4, 2  ;;  %v3823_v18 = vadd.f32 %v9240_v29, %v3800_v37 }
 0x4f7   :  { %v3746_v20 = vpop.f32.mrb[140].mxu1  ;;  %3953 = vrot.lane.b32.xlu1 %v9286_v6, %s7067_s3 }
 0x4f8   :  { %v3839_v8 = vmax.f32 %v3823_v18, 0.0  ;;  %v3801_v16 = vadd.f32 %v3746_v20, %v9208_v21  ;;  %v3748_v44 = vpop.f32.mrb[141].mxu1  ;;  %v3874_v63 = vsel %vm704_vm5, %v3871_v1, %v3873_v34 }
 0x4f9   :  { %v9293_v39 = vmax.f32 %v3837_v19, %v3874_v63 }
 0x4fa   :  { %v3875_v13 = vrot.slane %v3839_v8, 2  ;;  %v3824_v42 = vadd.f32 %v9240_v29, %v3801_v16 }
 0x4fb   :  { %v3751_v24 = vpop.f32.mrb[142].mxu1  ;;  %3955 = vrot.lane.b32.xlu0 %v9293_v39, %s7067_s3 }
 0x4fc   :  { %v3840_v35 = vmax.f32 %v3824_v42, 0.0  ;;  %v3802_v45 = vadd.f32 %v3751_v24, %v9211_v47  ;;  %v3753_v33 = vpop.f32.mrb[143].mxu1  ;;  %v3876_v26 = vsel %vm704_vm5, %v3873_v34, %v3875_v13 }
 0x4fd   :  { %v9300_v56 = vmax.f32 %v3838_v4, %v3876_v26 }
 0x4fe   :  { %v3877_v21 = vrot.slane %v3840_v35, 2  ;;  %v3825_v48 = vadd.f32 %v9240_v29, %v3802_v45 }
 0x4ff   :  { %v3756_v14 = vpop.f32.mrb[144].mxu1  ;;  %3957 = vrot.lane.b32.xlu1 %v9300_v56, %s7067_s3 }
 0x500   :  { %v3841_v58 = vmax.f32 %v3825_v48, 0.0  ;;  %v3803_v3 = vadd.f32 %v3756_v14, %v9214_v15  ;;  %v3758_v38 = vpop.f32.mrb[145].mxu1  ;;  %v3878_v17 = vsel %vm704_vm5, %v3875_v13, %v3877_v21 }
 0x501   :  { %v9307_v9 = vmax.f32 %v3839_v8, %v3878_v17 }
 0x502   :  { %v3879_v47 = vrot.slane %v3841_v58, 2  ;;  %v3826_v50 = vadd.f32 %v9240_v29, %v3803_v3 }
 0x503   :  { %v3761_v46 = vpop.f32.mrb[146].mxu1  ;;  %3959 = vrot.lane.b32.xlu0 %v9307_v9, %s7067_s3 }
 0x504   :  { %v3842_v30 = vmax.f32 %v3826_v50, 0.0  ;;  %v3804_v51 = vadd.f32 %v3761_v46, %v9217_v61  ;;  %v3763_v2 = vpop.f32.mrb[147].mxu1  ;;  %v3880_v7 = vsel %vm704_vm5, %v3877_v21, %v3879_v47  ;;  %v4017_v61 = vld [vmem:[%s10073_s5] sm:$0xff] }
 0x505   :  { %v9314_v49 = vmax.f32 %v3840_v35, %v3880_v7  ;;  %v9329_v54 = vpack.c.bf16 %v4018_v12, %v4017_v61 }
 0x506   :  { %v3881_v15 = vrot.slane %v3842_v30, 2  ;;  %v3827_v60 = vadd.f32 %v9240_v29, %v3804_v51 }
 0x507   :  { %v3766_v40 = vpop.f32.mrb[148].mxu1  ;;  %3961 = vrot.lane.b32.xlu1 %v9314_v49, %s7067_s3  ;;  %6594 = vmatprep.subr.bf16.mxu1 %v9329_v54 }
 0x508   :  { %v3843_v36 = vmax.f32 %v3827_v60, 0.0  ;;  %v3805_v32 = vadd.f32 %v3766_v40, %v9220_v52  ;;  %v3768_v41 = vpop.f32.mrb[149].mxu1  ;;  %v3882_v62 = vsel %vm704_vm5, %v3879_v47, %v3881_v15 }
 0x509   :  { %v9327_v19 = vmax.f32 %v3841_v58, %v3882_v62 }
 0x50a   :  { %v3883_v10 = vrot.slane %v3843_v36, 2  ;;  %v3828_v25 = vadd.f32 %v9240_v29, %v3805_v32 }
 0x50b   :  { %v3771_v1 = vpop.f32.mrb[150].mxu1  ;;  %3963 = vrot.lane.b32.xlu0 %v9327_v19, %s7067_s3 }
 0x50c   :  { %v3844_v52 = vmax.f32 %v3828_v25, 0.0  ;;  %v3806_v43 = vadd.f32 %v3771_v1, %v9223_v57  ;;  %v3773_v0 = vpop.f32.mrb[151].mxu1  ;;  %v3884_v4 = vsel %vm704_vm5, %v3881_v15, %v3883_v10 }
 0x50d   :  { %v9337_v37 = vmax.f32 %v3842_v30, %v3884_v4 }
 0x50e   :  { %v3885_v55 = vrot.slane %v3844_v52, 2  ;;  %v3829_v11 = vadd.f32 %v9240_v29, %v3806_v43 }
 0x50f   :  { %v3776_v34 = vpop.f32.mrb[152].mxu1  ;;  %3965 = vrot.lane.b32.xlu1 %v9337_v37, %s7067_s3 }
 0x510   :  { %v3845_v18 = vmax.f32 %v3829_v11, 0.0  ;;  %v3807_v20 = vadd.f32 %v3776_v34, %v9226_v22  ;;  %v3778_v8 = vpop.f32.mrb[153].mxu1  ;;  %v3886_v16 = vsel %vm704_vm5, %v3883_v10, %v3885_v55  ;;  %v4021_v34 = vld [vmem:[%s10073_s5 + $0x20] sm:$0xff] }
 0x511   :  { %v9344_v44 = vmax.f32 %v3843_v36, %v3886_v16 }
 0x512   :  { %v3887_v57 = vrot.slane %v3845_v18, 2  ;;  %v3830_v63 = vadd.f32 %v9240_v29, %v3807_v20 }
 0x513   :  { %v3781_v13 = vpop.f32.mrb[154].mxu1  ;;  %3967 = vrot.lane.b32.xlu0 %v9344_v44, %s7067_s3 }
 0x514   :  { %v3846_v42 = vmax.f32 %v3830_v63, 0.0  ;;  %v3808_v24 = vadd.f32 %v3781_v13, %v9229_v31  ;;  %v3783_v35 = vpop.f32.mrb[155].mxu1  ;;  %v3888_v45 = vsel %vm704_vm5, %v3885_v55, %v3887_v57  ;;  %v4023_v63 = vld [vmem:[%s10073_s5 + $0x30] sm:$0xff]  ;;  %v4024_v13 = vld [vmem:[%s10073_s5 + $0x38] sm:$0xff] }
 0x515   :  { %v9351_v33 = vmax.f32 %v3844_v52, %v3888_v45  ;;  %v4025_v45 = vld [vmem:[%s10073_s5 + $0x40] sm:$0xff] }
 0x516   :  { %v3889_v22 = vrot.slane %v3846_v42, 2  ;;  %v3831_v26 = vadd.f32 %v9240_v29, %v3808_v24 }
 0x517   :  { %v3786_v21 = vpop.f32.mrb[156].mxu1  ;;  %3969 = vrot.lane.b32.xlu1 %v9351_v33, %s7067_s3 }
 0x518   :  { %v3847_v48 = vmax.f32 %v3831_v26, 0.0  ;;  %v3809_v14 = vadd.f32 %v3786_v21, %v9232_v28  ;;  %v3788_v58 = vpop.f32.mrb[157].mxu1  ;;  %v3890_v3 = vsel %vm704_vm5, %v3887_v57, %v3889_v22 }
 0x519   :  { %v9358_v38 = vmax.f32 %v3845_v18, %v3890_v3  ;;  %v4022_v18 = vld [vmem:[%s10073_s5 + $0x28] sm:$0xff] }
 0x51a   :  { %v3891_v31 = vrot.slane %v3847_v48, 2  ;;  %v3832_v17 = vadd.f32 %v9240_v29, %v3809_v14  ;;  %v6601_v8 = vpack.c.bf16 %v4022_v18, %v4021_v34 }
 0x51b   :  { %v3791_v47 = vpop.f32.mrb[158].mxu1  ;;  %3971 = vrot.lane.b32.xlu0 %v9358_v38, %s7067_s3 }
 0x51c   :  { %v3848_v50 = vmax.f32 %v3832_v17, 0.0  ;;  %v3810_v46 = vadd.f32 %v3791_v47, %v9235_v53  ;;  %v3793_v30 = vpop.f32.mrb[159].mxu1  ;;  %v3892_v51 = vsel %vm704_vm5, %v3889_v22, %v3891_v31  ;;  %v4026_v22 = vld [vmem:[%s10073_s5 + $0x48] sm:$0xff]  ;;  %v5850_v47 = vld [vmem:[%s10073_s5 + $0xb0] sm:$0xff] }
 0x51d   :  { %v9365_v2 = vmax.f32 %v3846_v42, %v3892_v51 }
 0x51e   :  { %v3893_v28 = vrot.slane %v3848_v50, 2  ;;  %v3833_v7 = vadd.f32 %v9240_v29, %v3810_v46 }
 0x51f   :  { %3973 = vrot.lane.b32.xlu1 %v9365_v2, %s7067_s3 }
 0x520   :  { %v3849_v15 = vmax.f32 %v3833_v7, 0.0  ;;  %v3894_v60 = vsel %vm704_vm5, %v3891_v31, %v3893_v28 }
 0x521   :  { %v9371_v40 = vmax.f32 %v3847_v48, %v3894_v60 }
 0x522   :  { %v3895_v36 = vrot.slane %v3849_v15, 2 }
 0x523   :  { %3975 = vrot.lane.b32.xlu0 %v9371_v40, %s7067_s3 }
 0x524   :  { %v3897_v53 = vsel %vm704_vm5, %v3895_v36, %v9259_v59  ;;  %v3896_v32 = vsel %vm704_vm5, %v3893_v28, %v3895_v36 }
 0x525   :  { %v9378_v41 = vmax.f32 %v3849_v15, %v3897_v53  ;;  %v9380_v29 = vmax.f32 %v3848_v50, %v3896_v32  ;;  %v5851_v50 = vld [vmem:[%s10073_s5 + $0xb8] sm:$0xff] }
 0x526   :  { %v6613_v30 = vpack.c.bf16 %v5851_v50, %v5850_v47  ;;  %v5860_v50 = vld [vmem:[%s10073_s5 + $0x100] sm:$0xf] }
 0x527   :  { %3979 = vrot.lane.b32.xlu0 %v9378_v41, %s7067_s3  ;;  %3977 = vrot.lane.b32.xlu1 %v9380_v29, %s7067_s3 }
 0x52b   :  { %3981 = vrot.lane.b32.xlu1 %v9265_v27, %s7067_s3 }
 0x561   :  { %v3950_v62 = vpop.permute.xlu1 %3949 }
 0x562   :  { %v9389_v61 = vmax.f32 %v9270_v23, %v3950_v62  ;;  %v4019_v23 = vld [vmem:[%s10073_s5 + $0x10] sm:$0xff] }
 0x564   :  { %v9395_v10 = vrot.slane %v9389_v61, 4 }
 0x565   :  { %v3952_v59 = vpop.permute.xlu0 %3951 }
 0x566   :  { %v9392_v12 = vmax.f32 %v9279_v5, %v3952_v59  ;;  %v4020_v5 = vld [vmem:[%s10073_s5 + $0x18] sm:$0xff] }
 0x567   :  { %v6597_v55 = vpack.c.bf16 %v4020_v5, %v4019_v23 }
 0x568   :  { %v4057_v25 = vrot.slane %v9392_v12, 4 }
 0x569   :  { %v3954_v1 = vpop.permute.xlu1 %3953 }
 0x56a   :  { %v9399_v52 = vmax.f32 %v9286_v6, %v3954_v1  ;;  %v4058_v43 = vsel %vm225_vm0, %v9395_v10, %v4057_v25 }
 0x56b   :  { %6127 = vmatprep.mubr.msk.f32.mxu1 %vm4088_vm11, %v4058_v43 }
 0x56c   :  { %v4059_v0 = vrot.slane %v9399_v52, 4 }
 0x56d   :  { %v3956_v4 = vpop.permute.xlu0 %3955 }
 0x56e   :  { %v9412_v6 = vmax.f32 %v9293_v39, %v3956_v4  ;;  %v9415_v11 = vsel %vm225_vm0, %v4057_v25, %v4059_v0 }
 0x56f   :  { %6128 = vmatmul.mubr.msk.f32.vlgmr.msra.gmra.mrb[160].mxu1 %vm4088_vm11, %v9415_v11 }
 0x570   :  { %v4061_v20 = vrot.slane %v9412_v6, 4  ;;  %6596 = vmatpush3.bf16.msra.mxu1 %v9329_v54 }
 0x571   :  { %v3958_v39 = vpop.permute.xlu1 %3957  ;;  %6598 = vmatprep.subr.bf16.mxu1 %v6597_v55 }
 0x572   :  { %v9428_v16 = vmax.f32 %v9300_v56, %v3958_v39  ;;  %v9431_v57 = vsel %vm225_vm0, %v4059_v0, %v4061_v20  ;;  %v6605_v56 = vpack.c.bf16 %v4024_v13, %v4023_v63 }
 0x573   :  { %6130 = vmatprep.mubr.msk.f32.mxu1 %vm4088_vm11, %v9431_v57 }
 0x574   :  { %v4063_v54 = vrot.slane %v9428_v16, 4  ;;  %6600 = vmatpush3.bf16.msra.mxu1 %v6597_v55 }
 0x575   :  { %v3960_v42 = vpop.permute.xlu0 %3959  ;;  %6602 = vmatprep.subr.bf16.mxu1 %v6601_v8 }
 0x576   :  { %v9443_v24 = vmax.f32 %v9307_v9, %v3960_v42  ;;  %v9446_v35 = vsel %vm225_vm0, %v4061_v20, %v4063_v54  ;;  %v6609_v9 = vpack.c.bf16 %v4026_v22, %v4025_v45  ;;  %v5853_v42 = vld [vmem:[%s10073_s5 + $0xc8] sm:$0xff]  ;;  %v5854_v45 = vld [vmem:[%s10073_s5 + $0xd0] sm:$0xff]  ;;  %v5855_v22 = vld [vmem:[%s10073_s5 + $0xd8] sm:$0xff] }
 0x577   :  { %6131 = vmatmul.mubr.msk.f32.gmra.mrb[162].mxu1 %vm4088_vm11, %v9446_v35 }
 0x578   :  { %v4065_v26 = vrot.slane %v9443_v24, 4  ;;  %6604 = vmatpush3.bf16.msra.mxu1 %v6601_v8 }
 0x579   :  { %v3962_v21 = vpop.permute.xlu1 %3961  ;;  %6606 = vmatprep.subr.bf16.mxu1 %v6605_v56 }
 0x57a   :  { %v9458_v48 = vmax.f32 %v9314_v49, %v3962_v21  ;;  %v9461_v14 = vsel %vm225_vm0, %v4063_v54, %v4065_v26  ;;  %v4027_v49 = vld [vmem:[%s10073_s5 + $0x50] sm:$0xf]  ;;  %v5856_v21 = vld [vmem:[%s10073_s5 + $0xe0] sm:$0xff] }
 0x57b   :  { %6133 = vmatprep.mubr.msk.f32.mxu1 %vm4088_vm11, %v9461_v14 }
 0x57c   :  { %v4067_v58 = vrot.slane %v9458_v48, 4  ;;  %6608 = vmatpush3.bf16.msra.mxu1 %v6605_v56 }
 0x57d   :  { %v3964_v3 = vpop.permute.xlu0 %3963  ;;  %6610 = vmatprep.subr.bf16.mxu1 %v6609_v9 }
 0x57e   :  { %v9467_v31 = vmax.f32 %v9327_v19, %v3964_v3  ;;  %v9470_v17 = vsel %vm225_vm0, %v4065_v26, %v4067_v58  ;;  %v6621_v26 = vpack.c.bf16 %v5855_v22, %v5854_v45  ;;  %v5858_v3 = vld [vmem:[%s10073_s5 + $0xf0] sm:$0xff]  ;;  %v5906_v22 = vld [vmem:[%s10077_s6] ss:$0 sm:$0xff] }
 0x57f   :  { %6134 = vmatmul.mubr.msk.f32.gmra.mrb[164].mxu1 %vm4088_vm11, %v9470_v17 }
 0x580   :  { %v4069_v19 = vrot.slane %v9467_v31, 4  ;;  %6612 = vmatpush3.bf16.msra.mxu1 %v6609_v9  ;;  %v5857_v9 = vld [vmem:[%s10073_s5 + $0xe8] sm:$0xff] }
 0x581   :  { %v3966_v46 = vpop.permute.xlu1 %3965  ;;  %6171 = vmatprep.subr.msk.mxu1 %vm225_vm0, %v4027_v49 }
 0x582   :  { %v9486_v51 = vmax.f32 %v9337_v37, %v3966_v46  ;;  %v9489_v28 = vsel %vm225_vm0, %v4067_v58, %v4069_v19  ;;  %v6625_v58 = vpack.c.bf16 %v5857_v9, %v5856_v21  ;;  %v5879_v46 = vld [vmem:[%s10073_s5 + $0x110] sm:$0xff] }
 0x583   :  { %6136 = vmatprep.mubr.msk.f32.mxu1 %vm4088_vm11, %v9489_v28 }
 0x584   :  { %v4071_v7 = vrot.slane %v9486_v51, 4  ;;  %6172 = vmatpush3.msk.msra.mxu1 %vm225_vm0, %v4027_v49  ;;  %v5859_v49 = vld [vmem:[%s10073_s5 + $0xf8] sm:$0xff] }
 0x585   :  { %v3968_v15 = vpop.permute.xlu0 %3967  ;;  %6614 = vmatprep.subr.bf16.mxu1 %v6613_v30  ;;  %v6629_v47 = vpack.c.bf16 %v5859_v49, %v5858_v3 }
 0x586   :  { %v9496_v60 = vmax.f32 %v9344_v44, %v3968_v15  ;;  %v9499_v36 = vsel %vm225_vm0, %v4069_v19, %v4071_v7  ;;  %v5878_v19 = vld [vmem:[%s10073_s5 + $0x108] sm:$0xff]  ;;  %v5881_v15 = vld [vmem:[%s10073_s5 + $0x120] sm:$0xff] }
 0x587   :  { %6137 = vmatmul.mubr.msk.f32.gmra.mrb[166].mxu1 %vm4088_vm11, %v9499_v36 }
 0x588   :  { %v4073_v37 = vrot.slane %v9496_v60, 4 }
 0x589   :  { %v3970_v53 = vpop.permute.xlu1 %3969 }
 0x58a   :  { %v9505_v32 = vmax.f32 %v9351_v33, %v3970_v53  ;;  %v9508_v62 = vsel %vm225_vm0, %v4071_v7, %v4073_v37  ;;  %v5880_v7 = vld [vmem:[%s10073_s5 + $0x118] sm:$0xff]  ;;  %v5882_v53 = vld [vmem:[%s10073_s5 + $0x128] sm:$0xff] }
 0x58b   :  { %6139 = vmatprep.mubr.msk.f32.mxu1 %vm4088_vm11, %v9508_v62 }
 0x58c   :  { %v4075_v44 = vrot.slane %v9505_v32, 4 }
 0x58d   :  { %v3972_v59 = vpop.permute.xlu0 %3971 }
 0x58e   :  { %v9514_v25 = vmax.f32 %v9358_v38, %v3972_v59  ;;  %v9517_v1 = vsel %vm225_vm0, %v4073_v37, %v4075_v44  ;;  %v6637_v37 = vpack.c.bf16 %v5881_v15, %v5880_v7 }
 0x58f   :  { %6140 = vmatmul.mubr.msk.f32.gmra.mrb[168].mxu1 %vm4088_vm11, %v9517_v1 }
 0x590   :  { %v4077_v33 = vrot.slane %v9514_v25, 4 }
 0x591   :  { %v3974_v43 = vpop.permute.xlu1 %3973 }
 0x592   :  { %v9523_v23 = vmax.f32 %v9365_v2, %v3974_v43  ;;  %v9526_v5 = vsel %vm225_vm0, %v4075_v44, %v4077_v33  ;;  %v5883_v44 = vld [vmem:[%s10073_s5 + $0x130] sm:$0xff] }
 0x593   :  { %6142 = vmatprep.mubr.msk.f32.mxu1 %vm4088_vm11, %v9526_v5  ;;  %v6641_v59 = vpack.c.bf16 %v5883_v44, %v5882_v53  ;;  %v5887_v43 = vld [vmem:[%s10073_s5 + $0x150] sm:$0xff] }
 0x594   :  { %v4079_v38 = vrot.slane %v9523_v23, 4 }
 0x595   :  { %v3976_v0 = vpop.permute.xlu0 %3975 }
 0x596   :  { %v9532_v4 = vmax.f32 %v9371_v40, %v3976_v0  ;;  %v9535_v55 = vsel %vm225_vm0, %v4077_v33, %v4079_v38  ;;  %v5885_v33 = vld [vmem:[%s10073_s5 + $0x140] sm:$0xff]  ;;  %v4852_v0 = vld [vmem:[%s10075_s7 + $0x38] sm:$0xff] }
 0x597   :  { %6143 = vmatmul.mubr.msk.f32.gmra.mrb[170].mxu1 %vm4088_vm11, %v9535_v55 }
 0x598   :  { %v4081_v2 = vrot.slane %v9532_v4, 4 }
 0x599   :  { %v3980_v34 = vpop.permute.xlu0 %3979  ;;  %v3978_v18 = vpop.permute.xlu1 %3977 }
 0x59a   :  { %v9541_v20 = vmax.f32 %v9378_v41, %v3980_v34  ;;  %v9544_v39 = vmax.f32 %v9380_v29, %v3978_v18  ;;  %v9547_v8 = vsel %vm225_vm0, %v4079_v38, %v4081_v2  ;;  %v5852_v29 = vld [vmem:[%s10073_s5 + $0xc0] sm:$0xff]  ;;  %v4850_v38 = vld [vmem:[%s10075_s7 + $0x28] sm:$0xff] }
 0x59b   :  { %6145 = vmatprep.mubr.msk.f32.mxu1 %vm4088_vm11, %v9547_v8  ;;  %v6617_v56 = vpack.c.bf16 %v5853_v42, %v5852_v29  ;;  %v4858_v34 = vld [vmem:[%s10075_s7 + $0x68] sm:$0xff]  ;;  %v5083_v29 = vld [vmem:[%s10076_s9 + $0x30] sm:$0xff]  ;;  %v5084_v42 = vld [vmem:[%s10076_s9 + $0x38] sm:$0xf] }
 0x59c   :  { %v4085_v40 = vrot.slane %v9541_v20, 4  ;;  %v4083_v63 = vrot.slane %v9544_v39, 4 }
 0x59d   :  { %v3982_v18 = vpop.permute.xlu1 %3981 }
 0x59e   :  { %v9554_v13 = vsel %vm225_vm0, %v4081_v2, %v4083_v63  ;;  %v9557_v54 = vsel %vm225_vm0, %v4083_v63, %v4085_v40  ;;  %v9565_v41 = vsel %vm225_vm0, %v4085_v40, %v9395_v10  ;;  %v4856_v2 = vld [vmem:[%s10075_s7 + $0x58] sm:$0xff] }
 0x59f   :  { %6146 = vmatmul.mubr.msk.f32.gmra.mrb[172].mxu1 %vm4088_vm11, %v9554_v13  ;;  %v5080_v40 = vld [vmem:[%s10076_s9 + $0x18] sm:$0xff] }
 0x5a0   :  { %6148 = vmatprep.mubr.msk.f32.mxu1 %vm4088_vm11, %v9557_v54 }
 0x5a3   :  { %6149 = vmatmul.mubr.msk.f32.gmra.mrb[174].mxu1 %vm4088_vm11, %v9565_v41 }
 0x5a4   :  { %6173 = vmatprep.mubr.msk.f32.mxu1 %vm4088_vm11, %v9389_v61 }
 0x5a7   :  { %6174 = vmatmul.mubr.msk.f32.vlgmr.msra.gmra.mrb[160].mxu1 %vm4088_vm11, %v9392_v12 }
 0x5a8   :  { %6176 = vmatprep.mubr.msk.f32.mxu1 %vm4088_vm11, %v9399_v52  ;;  %6616 = vmatpush3.bf16.msra.mxu1 %v6613_v30  ;;  %v6633_v30 = vpack.c.bf16 %v5879_v46, %v5878_v19 }
 0x5a9   :  { %6618 = vmatprep.subr.bf16.mxu1 %v6617_v56 }
 0x5ab   :  { %6177 = vmatmul.mubr.msk.f32.gmra.mrb[162].mxu1 %vm4088_vm11, %v9412_v6 }
 0x5ac   :  { %6179 = vmatprep.mubr.msk.f32.mxu1 %vm4088_vm11, %v9428_v16  ;;  %6620 = vmatpush3.bf16.msra.mxu1 %v6617_v56  ;;  %v6693_v56 = vpack.c.bf16 %v5084_v42, %v5083_v29 }
 0x5ad   :  { %6622 = vmatprep.subr.bf16.mxu1 %v6621_v26 }
 0x5af   :  { %6180 = vmatmul.mubr.msk.f32.gmra.mrb[164].mxu1 %vm4088_vm11, %v9443_v24 }
 0x5b0   :  { %6182 = vmatprep.mubr.msk.f32.mxu1 %vm4088_vm11, %v9458_v48  ;;  %6624 = vmatpush3.bf16.msra.mxu1 %v6621_v26 }
 0x5b1   :  { %6626 = vmatprep.subr.bf16.mxu1 %v6625_v58 }
 0x5b3   :  { %6183 = vmatmul.mubr.msk.f32.gmra.mrb[166].mxu1 %vm4088_vm11, %v9467_v31 }
 0x5b4   :  { %6185 = vmatprep.mubr.msk.f32.mxu1 %vm4088_vm11, %v9486_v51  ;;  %6628 = vmatpush3.bf16.msra.mxu1 %v6625_v58 }
 0x5b5   :  { %6630 = vmatprep.subr.bf16.mxu1 %v6629_v47 }
 0x5b7   :  { %6186 = vmatmul.mubr.msk.f32.gmra.mrb[168].mxu1 %vm4088_vm11, %v9496_v60 }
 0x5b8   :  { %6188 = vmatprep.mubr.msk.f32.mxu1 %vm4088_vm11, %v9505_v32  ;;  %6632 = vmatpush3.bf16.msra.mxu1 %v6629_v47 }
 0x5b9   :  { %6217 = vmatprep.subr.msk.mxu1 %vm225_vm0, %v5860_v50 }
 0x5bb   :  { %6189 = vmatmul.mubr.msk.f32.gmra.mrb[170].mxu1 %vm4088_vm11, %v9514_v25 }
 0x5bc   :  { %6191 = vmatprep.mubr.msk.f32.mxu1 %vm4088_vm11, %v9523_v23  ;;  %6218 = vmatpush3.msk.msra.mxu1 %vm225_vm0, %v5860_v50 }
 0x5bd   :  { %6634 = vmatprep.subr.bf16.mxu1 %v6633_v30 }
 0x5bf   :  { %6192 = vmatmul.mubr.msk.f32.gmra.mrb[172].mxu1 %vm4088_vm11, %v9532_v4 }
 0x5c0   :  { %6194 = vmatprep.mubr.msk.f32.mxu1 %vm4088_vm11, %v9544_v39 }
 0x5c3   :  { %6195 = vmatmul.mubr.msk.f32.gmra.mrb[174].mxu1 %vm4088_vm11, %v9541_v20 }
 0x5c4   :  { %6219 = vmatprep.mubr.msk.f32.mxu1 %vm4088_vm11, %v9392_v12  ;;  %v5884_v12 = vld [vmem:[%s10073_s5 + $0x138] sm:$0xff] }
 0x5c7   :  { %6220 = vmatmul.mubr.msk.f32.vlgmr.msra.gmra.mrb[160].mxu1 %vm4088_vm11, %v9399_v52  ;;  %v6645_v52 = vpack.c.bf16 %v5885_v33, %v5884_v12 }
 0x5c8   :  { %6222 = vmatprep.mubr.msk.f32.mxu1 %vm4088_vm11, %v9412_v6  ;;  %6636 = vmatpush3.bf16.msra.mxu1 %v6633_v30  ;;  %v5886_v6 = vld [vmem:[%s10073_s5 + $0x148] sm:$0xff] }
 0x5c9   :  { %6638 = vmatprep.subr.bf16.mxu1 %v6637_v37 }
 0x5cb   :  { %6223 = vmatmul.mubr.msk.f32.gmra.mrb[162].mxu1 %vm4088_vm11, %v9428_v16  ;;  %v6649_v16 = vpack.c.bf16 %v5887_v43, %v5886_v6 }
 0x5cc   :  { %6225 = vmatprep.mubr.msk.f32.mxu1 %vm4088_vm11, %v9443_v24  ;;  %6640 = vmatpush3.bf16.msra.mxu1 %v6637_v37  ;;  %v5888_v24 = vld [vmem:[%s10073_s5 + $0x158] sm:$0xf] }
 0x5cd   :  { %6642 = vmatprep.subr.bf16.mxu1 %v6641_v59 }
 0x5cf   :  { %6226 = vmatmul.mubr.msk.f32.gmra.mrb[164].mxu1 %vm4088_vm11, %v9458_v48  ;;  %v4845_v48 = vld [vmem:[%s10075_s7] sm:$0xff] }
 0x5d0   :  { %6228 = vmatprep.mubr.msk.f32.mxu1 %vm4088_vm11, %v9467_v31  ;;  %6644 = vmatpush3.bf16.msra.mxu1 %v6641_v59  ;;  %v4846_v31 = vld [vmem:[%s10075_s7 + $0x8] sm:$0xff] }
 0x5d1   :  { %6646 = vmatprep.subr.bf16.mxu1 %v6645_v52 }
 0x5d3   :  { %6229 = vmatmul.mubr.msk.f32.gmra.mrb[166].mxu1 %vm4088_vm11, %v9486_v51  ;;  %v6653_v51 = vpack.c.bf16 %v4846_v31, %v4845_v48 }
 0x5d4   :  { %6231 = vmatprep.mubr.msk.f32.mxu1 %vm4088_vm11, %v9496_v60  ;;  %6648 = vmatpush3.bf16.msra.mxu1 %v6645_v52  ;;  %v4847_v60 = vld [vmem:[%s10075_s7 + $0x10] sm:$0xff] }
 0x5d5   :  { %6650 = vmatprep.subr.bf16.mxu1 %v6649_v16 }
 0x5d7   :  { %6232 = vmatmul.mubr.msk.f32.gmra.mrb[168].mxu1 %vm4088_vm11, %v9505_v32  ;;  %v4848_v32 = vld [vmem:[%s10075_s7 + $0x18] sm:$0xff] }
 0x5d8   :  { %6234 = vmatprep.mubr.msk.f32.mxu1 %vm4088_vm11, %v9514_v25  ;;  %6652 = vmatpush3.bf16.msra.mxu1 %v6649_v16  ;;  %v6657_v25 = vpack.c.bf16 %v4848_v32, %v4847_v60 }
 0x5d9   :  { %6263 = vmatprep.subr.msk.mxu1 %vm225_vm0, %v5888_v24 }
 0x5db   :  { %6235 = vmatmul.mubr.msk.f32.gmra.mrb[170].mxu1 %vm4088_vm11, %v9523_v23  ;;  %v4849_v23 = vld [vmem:[%s10075_s7 + $0x20] sm:$0xff] }
 0x5dc   :  { %6237 = vmatprep.mubr.msk.f32.mxu1 %vm4088_vm11, %v9532_v4  ;;  %6264 = vmatpush3.msk.msra.mxu1 %vm225_vm0, %v5888_v24  ;;  %v4854_v4 = vld [vmem:[%s10075_s7 + $0x48] sm:$0xff] }
 0x5dd   :  { %6654 = vmatprep.subr.bf16.mxu1 %v6653_v51 }
 0x5df   :  { %6238 = vmatmul.mubr.msk.f32.gmra.mrb[172].mxu1 %vm4088_vm11, %v9544_v39  ;;  %v5078_v39 = vld [vmem:[%s10076_s9 + $0x8] sm:$0xff] }
 0x5e0   :  { %6240 = vmatprep.mubr.msk.f32.mxu1 %vm4088_vm11, %v9541_v20 }
 0x5e3   :  { %6241 = vmatmul.mubr.msk.f32.gmra.mrb[174].mxu1 %vm4088_vm11, %v9389_v61  ;;  %v6661_v61 = vpack.c.bf16 %v4850_v38, %v4849_v23 }
 0x5e4   :  { %6265 = vmatprep.mubr.msk.f32.mxu1 %vm4088_vm11, %v9415_v11  ;;  %v4851_v11 = vld [vmem:[%s10075_s7 + $0x30] sm:$0xff] }
 0x5e7   :  { %6266 = vmatmul.mubr.msk.f32.vlgmr.msra.gmra.mrb[160].mxu1 %vm4088_vm11, %v9431_v57  ;;  %v6665_v57 = vpack.c.bf16 %v4852_v0, %v4851_v11 }
 0x5e8   :  { %6268 = vmatprep.mubr.msk.f32.mxu1 %vm4088_vm11, %v9446_v35  ;;  %6656 = vmatpush3.bf16.msra.mxu1 %v6653_v51  ;;  %v4853_v35 = vld [vmem:[%s10075_s7 + $0x40] sm:$0xff] }
 0x5e9   :  { %6658 = vmatprep.subr.bf16.mxu1 %v6657_v25 }
 0x5eb   :  { %6269 = vmatmul.mubr.msk.f32.gmra.mrb[162].mxu1 %vm4088_vm11, %v9461_v14  ;;  %v6669_v14 = vpack.c.bf16 %v4854_v4, %v4853_v35 }
 0x5ec   :  { %6271 = vmatprep.mubr.msk.f32.mxu1 %vm4088_vm11, %v9470_v17  ;;  %6660 = vmatpush3.bf16.msra.mxu1 %v6657_v25  ;;  %v4855_v17 = vld [vmem:[%s10075_s7 + $0x50] sm:$0xff] }
 0x5ed   :  { %6662 = vmatprep.subr.bf16.mxu1 %v6661_v61 }
 0x5ef   :  { %6272 = vmatmul.mubr.msk.f32.gmra.mrb[164].mxu1 %vm4088_vm11, %v9489_v28  ;;  %v6673_v28 = vpack.c.bf16 %v4856_v2, %v4855_v17 }
 0x5f0   :  { %6274 = vmatprep.mubr.msk.f32.mxu1 %vm4088_vm11, %v9499_v36  ;;  %6664 = vmatpush3.bf16.msra.mxu1 %v6661_v61  ;;  %v4857_v36 = vld [vmem:[%s10075_s7 + $0x60] sm:$0xff] }
 0x5f1   :  { %6666 = vmatprep.subr.bf16.mxu1 %v6665_v57 }
 0x5f3   :  { %6275 = vmatmul.mubr.msk.f32.gmra.mrb[166].mxu1 %vm4088_vm11, %v9508_v62  ;;  %v6677_v62 = vpack.c.bf16 %v4858_v34, %v4857_v36 }
 0x5f4   :  { %6277 = vmatprep.mubr.msk.f32.mxu1 %vm4088_vm11, %v9517_v1  ;;  %6668 = vmatpush3.bf16.msra.mxu1 %v6665_v57  ;;  %v4016_v1 = vmax.f32 %v9265_v27, %v3982_v18  ;;  %v4859_v27 = vld [vmem:[%s10075_s7 + $0x70] sm:$0xff] }
 0x5f5   :  { %6670 = vmatprep.subr.bf16.mxu1 %v6669_v14 }
 0x5f6   :  { %v4638_v20 = vrot.slane %v4016_v1, 4 }
 0x5f7   :  { %6278 = vmatmul.mubr.msk.f32.gmra.mrb[168].mxu1 %vm4088_vm11, %v9526_v5 }
 0x5f8   :  { %6280 = vmatprep.mubr.msk.f32.mxu1 %vm4088_vm11, %v9535_v55  ;;  %6672 = vmatpush3.bf16.msra.mxu1 %v6669_v14  ;;  %v4639_v5 = vsel %vm225_vm0, %v9395_v10, %v4638_v20  ;;  %v5077_v55 = vld [vmem:[%s10076_s9] sm:$0xff]  ;;  %v5079_v10 = vld [vmem:[%s10076_s9 + $0x10] sm:$0xff] }
 0x5f9   :  { %6674 = vmatprep.subr.bf16.mxu1 %v6673_v28  ;;  %v6685_v63 = vpack.c.bf16 %v5080_v40, %v5079_v10 }
 0x5fb   :  { %6281 = vmatmul.mubr.msk.f32.gmra.mrb[170].mxu1 %vm4088_vm11, %v9547_v8  ;;  %v6681_v8 = vpack.c.bf16 %v5078_v39, %v5077_v55 }
 0x5fc   :  { %6283 = vmatprep.mubr.msk.f32.mxu1 %vm4088_vm11, %v9554_v13  ;;  %6676 = vmatpush3.bf16.msra.mxu1 %v6673_v28  ;;  %v5081_v13 = vld [vmem:[%s10076_s9 + $0x20] sm:$0xff] }
 0x5fd   :  { %6678 = vmatprep.subr.bf16.mxu1 %v6677_v62  ;;  %6682 = vmatprep.subr.bf16.mxu0 %v6681_v8 }
 0x5fe   :  { %6684 = vmatpush3.bf16.msra.mxu0 %v6681_v8 }
 0x5ff   :  { %6284 = vmatmul.mubr.msk.f32.gmra.mrb[172].mxu1 %vm4088_vm11, %v9557_v54  ;;  %v5082_v54 = vld [vmem:[%s10076_s9 + $0x28] sm:$0xff]  ;;  %6686 = vmatprep.subr.bf16.mxu0 %v6685_v63 }
 0x600   :  { %6286 = vmatprep.mubr.msk.f32.mxu1 %vm4088_vm11, %v9565_v41  ;;  %6680 = vmatpush3.bf16.msra.mxu1 %v6677_v62  ;;  %v6689_v41 = vpack.c.bf16 %v5082_v54, %v5081_v13 }
 0x601   :  { %6317 = vmatprep.subr.mxu1 %v4859_v27 }
 0x602   :  { %6688 = vmatpush3.bf16.msra.mxu0 %v6685_v63 }
 0x603   :  { %6287 = vmatmul.mubr.msk.f32.gmra.mrb[174].mxu1 %vm4088_vm11, %v4639_v5  ;;  %6690 = vmatprep.subr.bf16.mxu0 %v6689_v41  ;;  %v5907_v5 = vld [vmem:[%s10078_s8] ss:$0 sm:$0xff] }
 0x604   :  { %6318 = vmatpush3.msra.mxu1 %v4859_v27 }
 0x606   :  { %6692 = vmatpush3.bf16.msra.mxu0 %v6689_v41 }
 0x607   :  { %6695 = vmatprep.subr.msk.bf16.mxu0 %vm7149_vm2, %v6693_v56 }
 0x60a   :  { %6698 = vmatpush3.bf16.msk.msra.mxu0 %vm7149_vm2, %v6693_v56 }
 0x6ba   :  { %v6267_v26 = vpop.f32.mrb[160].mxu1 }
 0x6bb   :  { %v4814_v21 = vadd.f32 %v6267_v26, %v5906_v22  ;;  %v4711_v9 = vpop.f32.mrb[161].mxu1 }
 0x6bc   :  { %v4813_v58 = vadd.f32 %v5906_v22, %v4711_v9 }
 0x6bd   :  { %v4830_v47 = vmax.f32 %v4814_v21, 0.0 }
 0x6be   :  { %v4829_v3 = vmax.f32 %v4813_v58, 0.0  ;;  %v6270_v49 = vpop.f32.mrb[162].mxu1 }
 0x6bf   :  { %v4816_v50 = vadd.f32 %v6270_v49, %v5906_v22  ;;  %v4721_v19 = vpop.f32.mrb[163].mxu1 }
 0x6c0   :  { %v4815_v46 = vadd.f32 %v5906_v22, %v4721_v19  ;;  %6319 = vmatprep.mubr.msk.f32.mxu1 %vm4867_vm12, %v4829_v3 }
 0x6c1   :  { %6320 = vmatmul.mubr.msk.f32.vlgmr.msra.gmra.mrb[176].mxu1 %vm4867_vm12, %v4830_v47  ;;  %v4832_v15 = vmax.f32 %v4816_v50, 0.0 }
 0x6c2   :  { %v4831_v30 = vmax.f32 %v4815_v46, 0.0  ;;  %v6273_v7 = vpop.f32.mrb[164].mxu1 }
 0x6c3   :  { %v4818_v37 = vadd.f32 %v6273_v7, %v5906_v22  ;;  %v4731_v53 = vpop.f32.mrb[165].mxu1 }
 0x6c4   :  { %v4817_v44 = vadd.f32 %v5906_v22, %v4731_v53  ;;  %6322 = vmatprep.mubr.msk.f32.mxu1 %vm4867_vm12, %v4831_v30 }
 0x6c5   :  { %6323 = vmatmul.mubr.msk.f32.gmra.mrb[178].mxu1 %vm4867_vm12, %v4832_v15  ;;  %v4834_v33 = vmax.f32 %v4818_v37, 0.0 }
 0x6c6   :  { %v4833_v59 = vmax.f32 %v4817_v44, 0.0  ;;  %v6276_v12 = vpop.f32.mrb[166].mxu1 }
 0x6c7   :  { %v4820_v52 = vadd.f32 %v6276_v12, %v5906_v22  ;;  %v4741_v6 = vpop.f32.mrb[167].mxu1 }
 0x6c8   :  { %v4819_v43 = vadd.f32 %v5906_v22, %v4741_v6  ;;  %6325 = vmatprep.mubr.msk.f32.mxu1 %vm4867_vm12, %v4833_v59 }
 0x6c9   :  { %6326 = vmatmul.mubr.msk.f32.gmra.mrb[180].mxu1 %vm4867_vm12, %v4834_v33  ;;  %v4836_v48 = vmax.f32 %v4820_v52, 0.0 }
 0x6ca   :  { %v4835_v16 = vmax.f32 %v4819_v43, 0.0  ;;  %v6279_v24 = vpop.f32.mrb[168].mxu1 }
 0x6cb   :  { %v4822_v31 = vadd.f32 %v6279_v24, %v5906_v22  ;;  %v4751_v51 = vpop.f32.mrb[169].mxu1 }
 0x6cc   :  { %v4821_v60 = vadd.f32 %v5906_v22, %v4751_v51  ;;  %6328 = vmatprep.mubr.msk.f32.mxu1 %vm4867_vm12, %v4835_v16 }
 0x6cd   :  { %6329 = vmatmul.mubr.msk.f32.gmra.mrb[182].mxu1 %vm4867_vm12, %v4836_v48  ;;  %v4838_v23 = vmax.f32 %v4822_v31, 0.0 }
 0x6ce   :  { %v4837_v32 = vmax.f32 %v4821_v60, 0.0  ;;  %v6282_v25 = vpop.f32.mrb[170].mxu1 }
 0x6cf   :  { %v4824_v38 = vadd.f32 %v6282_v25, %v5906_v22  ;;  %v4761_v61 = vpop.f32.mrb[171].mxu1 }
 0x6d0   :  { %v4823_v11 = vadd.f32 %v5906_v22, %v4761_v61  ;;  %6331 = vmatprep.mubr.msk.f32.mxu1 %vm4867_vm12, %v4837_v32 }
 0x6d1   :  { %6332 = vmatmul.mubr.msk.f32.gmra.mrb[184].mxu1 %vm4867_vm12, %v4838_v23  ;;  %v4840_v35 = vmax.f32 %v4824_v38, 0.0 }
 0x6d2   :  { %v4839_v0 = vmax.f32 %v4823_v11, 0.0  ;;  %v6285_v57 = vpop.f32.mrb[172].mxu1  ;;  %v5924_v11 = vld [vmem:[%s10079_s10] ss:$0 sm:$0xff] }
 0x6d3   :  { %v4826_v4 = vadd.f32 %v6285_v57, %v5906_v22  ;;  %v4771_v14 = vpop.f32.mrb[173].mxu1 }
 0x6d4   :  { %v4825_v17 = vadd.f32 %v5906_v22, %v4771_v14  ;;  %6334 = vmatprep.mubr.msk.f32.mxu1 %vm4867_vm12, %v4839_v0 }
 0x6d5   :  { %6335 = vmatmul.mubr.msk.f32.gmra.mrb[186].mxu1 %vm4867_vm12, %v4840_v35  ;;  %v4842_v36 = vmax.f32 %v4826_v4, 0.0 }
 0x6d6   :  { %v4841_v2 = vmax.f32 %v4825_v17, 0.0  ;;  %v6288_v28 = vpop.f32.mrb[174].mxu1 }
 0x6d7   :  { %v4828_v34 = vadd.f32 %v6288_v28, %v5906_v22  ;;  %v4781_v18 = vpop.f32.mrb[175].mxu1 }
 0x6d8   :  { %v4827_v62 = vadd.f32 %v5906_v22, %v4781_v18  ;;  %6337 = vmatprep.mubr.msk.f32.mxu1 %vm4867_vm12, %v4841_v2 }
 0x6d9   :  { %6338 = vmatmul.mubr.msk.f32.gmra.mrb[188].mxu1 %vm4867_vm12, %v4842_v36  ;;  %v4844_v20 = vmax.f32 %v4828_v34, 0.0 }
 0x6da   :  { %v4843_v1 = vmax.f32 %v4827_v62, 0.0 }
 0x6dc   :  { %6340 = vmatprep.mubr.msk.f32.mxu1 %vm4867_vm12, %v4843_v1 }
 0x6dd   :  { %6341 = vmatmul.mubr.msk.f32.gmra.mrb[190].mxu1 %vm4867_vm12, %v4844_v20 }
 0x794   :  { %v6321_v27 = vpop.f32.mrb[176].mxu1 }
 0x795   :  { %v4988_v55 = vadd.f32 %v6321_v27, %v5907_v5  ;;  %v4982_v39 = vpop.f32.mrb[177].mxu1 }
 0x796   :  { %v4983_v10 = vadd.f32 %v5907_v5, %v4982_v39 }
 0x797   :  { %v5062_v63 = vmax.f32 %v4988_v55, 0.0 }
 0x798   :  { %v5061_v8 = vmax.f32 %v4983_v10, 0.0  ;;  %v6324_v40 = vpop.f32.mrb[178].mxu1 }
 0x799   :  { %v4998_v13 = vadd.f32 %v6324_v40, %v5907_v5  ;;  %v4992_v54 = vpop.f32.mrb[179].mxu1 }
 0x79a   :  { %v4993_v41 = vadd.f32 %v5907_v5, %v4992_v54  ;;  %6359 = vmatprep.mubr.msk.f32.mxu0 %vm5092_vm13, %v5061_v8 }
 0x79b   :  { %6360 = vmatmul.mubr.msk.f32.vlgmr.msra.gmra.mrb[48].mxu0 %vm5092_vm13, %v5062_v63  ;;  %v5064_v56 = vmax.f32 %v4998_v13, 0.0 }
 0x79c   :  { %v5063_v29 = vmax.f32 %v4993_v41, 0.0  ;;  %v6327_v42 = vpop.f32.mrb[180].mxu1 }
 0x79d   :  { %v5008_v45 = vadd.f32 %v6327_v42, %v5907_v5  ;;  %v5002_v22 = vpop.f32.mrb[181].mxu1 }
 0x79e   :  { %v5003_v26 = vadd.f32 %v5907_v5, %v5002_v22  ;;  %6362 = vmatprep.mubr.msk.f32.mxu0 %vm5092_vm13, %v5063_v29 }
 0x79f   :  { %6363 = vmatmul.mubr.msk.f32.gmra.mrb[50].mxu0 %vm5092_vm13, %v5064_v56  ;;  %v5066_v58 = vmax.f32 %v5008_v45, 0.0 }
 0x7a0   :  { %v5065_v21 = vmax.f32 %v5003_v26, 0.0  ;;  %v6330_v9 = vpop.f32.mrb[182].mxu1 }
 0x7a1   :  { %v5018_v3 = vadd.f32 %v6330_v9, %v5907_v5  ;;  %v5012_v49 = vpop.f32.mrb[183].mxu1 }
 0x7a2   :  { %v5013_v47 = vadd.f32 %v5907_v5, %v5012_v49  ;;  %6365 = vmatprep.mubr.msk.f32.mxu0 %vm5092_vm13, %v5065_v21 }
 0x7a3   :  { %6366 = vmatmul.mubr.msk.f32.gmra.mrb[52].mxu0 %vm5092_vm13, %v5066_v58  ;;  %v5068_v46 = vmax.f32 %v5018_v3, 0.0 }
 0x7a4   :  { %v5067_v50 = vmax.f32 %v5013_v47, 0.0  ;;  %v6333_v19 = vpop.f32.mrb[184].mxu1 }
 0x7a5   :  { %v5028_v30 = vadd.f32 %v6333_v19, %v5907_v5  ;;  %v5022_v7 = vpop.f32.mrb[185].mxu1 }
 0x7a6   :  { %v5023_v15 = vadd.f32 %v5907_v5, %v5022_v7  ;;  %6368 = vmatprep.mubr.msk.f32.mxu0 %vm5092_vm13, %v5067_v50 }
 0x7a7   :  { %6369 = vmatmul.mubr.msk.f32.gmra.mrb[54].mxu0 %vm5092_vm13, %v5068_v46  ;;  %v5070_v44 = vmax.f32 %v5028_v30, 0.0 }
 0x7a8   :  { %v5069_v37 = vmax.f32 %v5023_v15, 0.0  ;;  %v6336_v53 = vpop.f32.mrb[186].mxu1 }
 0x7a9   :  { %v5038_v59 = vadd.f32 %v6336_v53, %v5907_v5  ;;  %v5032_v12 = vpop.f32.mrb[187].mxu1 }
 0x7aa   :  { %v5033_v33 = vadd.f32 %v5907_v5, %v5032_v12  ;;  %6371 = vmatprep.mubr.msk.f32.mxu0 %vm5092_vm13, %v5069_v37 }
 0x7ab   :  { %6372 = vmatmul.mubr.msk.f32.gmra.mrb[56].mxu0 %vm5092_vm13, %v5070_v44  ;;  %v5072_v43 = vmax.f32 %v5038_v59, 0.0 }
 0x7ac   :  { %v5071_v52 = vmax.f32 %v5033_v33, 0.0  ;;  %v6339_v6 = vpop.f32.mrb[188].mxu1 }
 0x7ad   :  { %v5048_v16 = vadd.f32 %v6339_v6, %v5907_v5  ;;  %v5042_v24 = vpop.f32.mrb[189].mxu1 }
 0x7ae   :  { %v5043_v48 = vadd.f32 %v5907_v5, %v5042_v24  ;;  %6374 = vmatprep.mubr.msk.f32.mxu0 %vm5092_vm13, %v5071_v52 }
 0x7af   :  { %6375 = vmatmul.mubr.msk.f32.gmra.mrb[58].mxu0 %vm5092_vm13, %v5072_v43  ;;  %v5074_v60 = vmax.f32 %v5048_v16, 0.0 }
 0x7b0   :  { %v5073_v31 = vmax.f32 %v5043_v48, 0.0  ;;  %v6342_v51 = vpop.f32.mrb[190].mxu1 }
 0x7b1   :  { %v5058_v32 = vadd.f32 %v6342_v51, %v5907_v5  ;;  %v5052_v25 = vpop.f32.mrb[191].mxu1 }
 0x7b2   :  { %v5053_v23 = vadd.f32 %v5907_v5, %v5052_v25  ;;  %6377 = vmatprep.mubr.msk.f32.mxu0 %vm5092_vm13, %v5073_v31 }
 0x7b3   :  { %6378 = vmatmul.mubr.msk.f32.gmra.mrb[60].mxu0 %vm5092_vm13, %v5074_v60  ;;  %v5076_v61 = vmax.f32 %v5058_v32, 0.0 }
 0x7b4   :  { %v5075_v38 = vmax.f32 %v5053_v23, 0.0 }
 0x7b6   :  { %6380 = vmatprep.mubr.msk.f32.mxu0 %vm5092_vm13, %v5075_v38 }
 0x7b7   :  { %6381 = vmatmul.mubr.msk.f32.gmra.mrb[62].mxu0 %vm5092_vm13, %v5076_v61 }
 0x86e   :  { %v6361_v0 = vpop.f32.mrb[48].mxu0 }
 0x86f   :  { %v9845_v57 = vadd.f32 %v6361_v0, %v5924_v11  ;;  %v5210_v35 = vpop.f32.mrb[49].mxu0 }
 0x870   :  { %v9847_v4 = vadd.f32 %v5924_v11, %v5210_v35 }
 0x871   :  { %v5292_v14 = vsel %vm2628_vm10, %v9845_v57, -inf }
 0x872   :  { %5293 = vmax.xlane.f32.xlu1 %v5292_v14  ;;  %v6364_v17 = vpop.f32.mrb[50].mxu0  ;;  %v5289_v2 = vsel %vm2628_vm10, %v9847_v4, -inf }
 0x873   :  { %v9853_v28 = vadd.f32 %v6364_v17, %v5924_v11  ;;  %v5220_v36 = vpop.f32.mrb[51].mxu0  ;;  %5290 = vmax.xlane.f32.xlu0 %v5289_v2 }
 0x874   :  { %v9857_v18 = vadd.f32 %v5924_v11, %v5220_v36 }
 0x875   :  { %v5298_v34 = vsel %vm2628_vm10, %v9853_v28, -inf }
 0x876   :  { %v6367_v62 = vpop.f32.mrb[52].mxu0  ;;  %v5295_v39 = vsel %vm2628_vm10, %v9857_v18, -inf }
 0x877   :  { %v5230_v1 = vpop.f32.mrb[53].mxu0  ;;  %5299 = vmax.xlane.f32.xlu0 %v5298_v34  ;;  %v9861_v5 = vadd.f32 %v6367_v62, %v5924_v11 }
 0x878   :  { %v9859_v20 = vadd.f32 %v5924_v11, %v5230_v1 }
 0x879   :  { %v5304_v54 = vsel %vm2628_vm10, %v9861_v5, -inf }
 0x87a   :  { %v6370_v27 = vpop.f32.mrb[54].mxu0  ;;  %v5301_v55 = vsel %vm2628_vm10, %v9859_v20, -inf }
 0x87b   :  { %v5240_v10 = vpop.f32.mrb[55].mxu0  ;;  %5302 = vmax.xlane.f32.xlu1 %v5301_v55  ;;  %5296 = vmax.xlane.f32.xlu0 %v5295_v39  ;;  %v9869_v40 = vadd.f32 %v6370_v27, %v5924_v11 }
 0x87c   :  { %v9867_v8 = vadd.f32 %v5924_v11, %v5240_v10 }
 0x87d   :  { %v5310_v22 = vsel %vm2628_vm10, %v9869_v40, -inf }
 0x87e   :  { %v6373_v63 = vpop.f32.mrb[56].mxu0  ;;  %v5307_v13 = vsel %vm2628_vm10, %v9867_v8, -inf }
 0x87f   :  { %v5250_v41 = vpop.f32.mrb[57].mxu0  ;;  %5308 = vmax.xlane.f32.xlu1 %v5307_v13  ;;  %5305 = vmax.xlane.f32.xlu0 %v5304_v54  ;;  %v9877_v42 = vadd.f32 %v6373_v63, %v5924_v11 }
 0x880   :  { %v9875_v29 = vadd.f32 %v5924_v11, %v5250_v41 }
 0x881   :  { %v5316_v49 = vsel %vm2628_vm10, %v9877_v42, -inf }
 0x882   :  { %v6376_v56 = vpop.f32.mrb[58].mxu0  ;;  %v5313_v45 = vsel %vm2628_vm10, %v9875_v29, -inf }
 0x883   :  { %v5260_v26 = vpop.f32.mrb[59].mxu0  ;;  %5314 = vmax.xlane.f32.xlu1 %v5313_v45  ;;  %5311 = vmax.xlane.f32.xlu0 %v5310_v22  ;;  %v9885_v9 = vadd.f32 %v6376_v56, %v5924_v11 }
 0x884   :  { %v9883_v21 = vadd.f32 %v5924_v11, %v5260_v26 }
 0x885   :  { %v5322_v7 = vsel %vm2628_vm10, %v9885_v9, -inf }
 0x886   :  { %v6379_v58 = vpop.f32.mrb[60].mxu0  ;;  %v5319_v3 = vsel %vm2628_vm10, %v9883_v21, -inf }
 0x887   :  { %v5270_v47 = vpop.f32.mrb[61].mxu0  ;;  %5320 = vmax.xlane.f32.xlu1 %v5319_v3  ;;  %5317 = vmax.xlane.f32.xlu0 %v5316_v49  ;;  %v9893_v19 = vadd.f32 %v6379_v58, %v5924_v11 }
 0x888   :  { %v9891_v50 = vadd.f32 %v5924_v11, %v5270_v47 }
 0x889   :  { %v5328_v44 = vsel %vm2628_vm10, %v9893_v19, -inf }
 0x88a   :  { %v6382_v46 = vpop.f32.mrb[62].mxu0  ;;  %v5325_v30 = vsel %vm2628_vm10, %v9891_v50, -inf }
 0x88b   :  { %5326 = vmax.xlane.f32.xlu1 %v5325_v30  ;;  %5323 = vmax.xlane.f32.xlu0 %v5322_v7  ;;  %v5280_v15 = vpop.f32.mrb[63].mxu0  ;;  %v9901_v53 = vadd.f32 %v6382_v46, %v5924_v11 }
 0x88c   :  { %v9899_v37 = vadd.f32 %v5924_v11, %v5280_v15 }
 0x88d   :  { %v5334_v12 = vsel %vm2628_vm10, %v9901_v53, -inf }
 0x88e   :  { %v5331_v59 = vsel %vm2628_vm10, %v9899_v37, -inf }
 0x88f   :  { %5329 = vmax.xlane.f32.xlu0 %v5328_v44  ;;  %5332 = vmax.xlane.f32.xlu1 %v5331_v59 }
 0x893   :  { %5335 = vmax.xlane.f32.xlu0 %v5334_v12 }
 0x8ff   :  { %v5294_v33 = vpop.xlane.xlu1 %5293 }
 0x900   :  { %v5338_v52 = vsub.f32 %v9845_v57, %v5294_v33  ;;  %v5291_v6 = vpop.xlane.xlu0 %5290 }
 0x901   :  { %v5337_v43 = vsub.f32 %v9847_v4, %v5291_v6 }
 0x902   :  { %v5355_v16 = vmul.f32 1.442695, %v5338_v52 }
 0x903   :  { %v5353_v24 = vmul.f32 1.442695, %v5337_v43 }
 0x904   :  { %6999 = vpow2.f32 %v5355_v16  ;;  %v5300_v48 = vpop.xlane.xlu0 %5299 }
 0x905   :  { %7001 = vpow2.f32 %v5353_v24  ;;  %v5340_v31 = vsub.f32 %v9853_v28, %v5300_v48 }
 0x907   :  { %v5359_v51 = vmul.f32 1.442695, %v5340_v31 }
 0x908   :  { %v5303_v60 = vpop.xlane.xlu1 %5302  ;;  %v5297_v32 = vpop.xlane.xlu0 %5296 }
 0x909   :  { %7003 = vpow2.f32 %v5359_v51  ;;  %v5341_v25 = vsub.f32 %v9859_v20, %v5303_v60  ;;  %v5339_v23 = vsub.f32 %v9857_v18, %v5297_v32 }
 0x90b   :  { %v5357_v38 = vmul.f32 1.442695, %v5339_v23  ;;  %v5361_v61 = vmul.f32 1.442695, %v5341_v25 }
 0x90c   :  { %v5309_v11 = vpop.xlane.xlu1 %5308  ;;  %v5306_v0 = vpop.xlane.xlu0 %5305 }
 0x90d   :  { %v5343_v57 = vsub.f32 %v9867_v8, %v5309_v11  ;;  %v5342_v35 = vsub.f32 %v9861_v5, %v5306_v0  ;;  %7005 = vpow2.f32 %v5357_v38 }
 0x90e   :  { %v9916_v4 = vpop.eup %6999  ;;  %7007 = vpow2.f32 %v5361_v61 }
 0x90f   :  { %v9918_v14 = vpop.eup %7001  ;;  %v5363_v17 = vmul.f32 1.442695, %v5342_v35  ;;  %v5388_v2 = vsel %vm2628_vm10, %v9916_v4, 0.0  ;;  %v5365_v28 = vmul.f32 1.442695, %v5343_v57 }
 0x910   :  { %v5315_v36 = vpop.xlane.xlu1 %5314  ;;  %v5312_v34 = vpop.xlane.xlu0 %5311  ;;  %5389 = vadd.xlane.f32.xlu0 %v5388_v2  ;;  %v5385_v18 = vsel %vm2628_vm10, %v9918_v14, 0.0 }
 0x911   :  { %v5345_v62 = vsub.f32 %v9875_v29, %v5315_v36  ;;  %v5344_v1 = vsub.f32 %v9869_v40, %v5312_v34  ;;  %5386 = vadd.xlane.f32.xlu1 %v5385_v18  ;;  %7009 = vpow2.f32 %v5363_v17 }
 0x912   :  { %7011 = vpow2.f32 %v5365_v28 }
 0x913   :  { %v9926_v20 = vpop.eup %7003  ;;  %v5367_v5 = vmul.f32 1.442695, %v5344_v1  ;;  %v5369_v27 = vmul.f32 1.442695, %v5345_v62 }
 0x914   :  { %v5321_v55 = vpop.xlane.xlu1 %5320  ;;  %v5318_v39 = vpop.xlane.xlu0 %5317  ;;  %v5394_v10 = vsel %vm2628_vm10, %v9926_v20, 0.0 }
 0x915   :  { %v5347_v8 = vsub.f32 %v9883_v21, %v5321_v55  ;;  %v5346_v63 = vsub.f32 %v9877_v42, %v5318_v39  ;;  %5395 = vadd.xlane.f32.xlu0 %v5394_v10  ;;  %7013 = vpow2.f32 %v5367_v5 }
 0x916   :  { %7015 = vpow2.f32 %v5369_v27 }
 0x917   :  { %v5371_v13 = vmul.f32 1.442695, %v5346_v63  ;;  %v9932_v40 = vpop.eup %7005  ;;  %v5373_v54 = vmul.f32 1.442695, %v5347_v8 }
 0x918   :  { %v5327_v41 = vpop.xlane.xlu1 %5326  ;;  %v5324_v29 = vpop.xlane.xlu0 %5323  ;;  %v5391_v22 = vsel %vm2628_vm10, %v9932_v40, 0.0 }
 0x919   :  { %v5349_v56 = vsub.f32 %v9891_v50, %v5327_v41  ;;  %v5348_v45 = vsub.f32 %v9885_v9, %v5324_v29  ;;  %v9938_v26 = vpop.eup %7007  ;;  %7017 = vpow2.f32 %v5371_v13  ;;  %5392 = vadd.xlane.f32.xlu1 %v5391_v22 }
 0x91a   :  { %7019 = vpow2.f32 %v5373_v54  ;;  %v5397_v46 = vsel %vm2628_vm10, %v9938_v26, 0.0 }
 0x91b   :  { %v5375_v42 = vmul.f32 1.442695, %v5348_v45  ;;  %v9940_v21 = vpop.eup %7009  ;;  %v5377_v58 = vmul.f32 1.442695, %v5349_v56 }
 0x91c   :  { %v5330_v3 = vpop.xlane.xlu0 %5329  ;;  %v5333_v49 = vpop.xlane.xlu1 %5332  ;;  %v5400_v9 = vsel %vm2628_vm10, %v9940_v21, 0.0 }
 0x91d   :  { %v5350_v47 = vsub.f32 %v9893_v19, %v5330_v3  ;;  %v5351_v50 = vsub.f32 %v9899_v37, %v5333_v49  ;;  %v9948_v30 = vpop.eup %7011  ;;  %7021 = vpow2.f32 %v5375_v42  ;;  %5401 = vadd.xlane.f32.xlu0 %v5400_v9  ;;  %5398 = vadd.xlane.f32.xlu1 %v5397_v46 }
 0x91e   :  { %7023 = vpow2.f32 %v5377_v58  ;;  %v5403_v12 = vsel %vm2628_vm10, %v9948_v30, 0.0 }
 0x91f   :  { %v5379_v7 = vmul.f32 1.442695, %v5350_v47  ;;  %v9950_v15 = vpop.eup %7013  ;;  %v5381_v44 = vmul.f32 1.442695, %v5351_v50 }
 0x920   :  { %v5336_v59 = vpop.xlane.xlu0 %5335  ;;  %v5406_v37 = vsel %vm2628_vm10, %v9950_v15, 0.0  ;;  %v9957_v33 = vpop.eup %7015 }
 0x921   :  { %7025 = vpow2.f32 %v5379_v7  ;;  %v5352_v19 = vsub.f32 %v9901_v53, %v5336_v59  ;;  %5407 = vadd.xlane.f32.xlu0 %v5406_v37  ;;  %5404 = vadd.xlane.f32.xlu1 %v5403_v12  ;;  %v5409_v53 = vsel %vm2628_vm10, %v9957_v33, 0.0 }
 0x922   :  { %7027 = vpow2.f32 %v5381_v44 }
 0x923   :  { %v5383_v52 = vmul.f32 1.442695, %v5352_v19  ;;  %v9959_v6 = vpop.eup %7017 }
 0x924   :  { %v5412_v43 = vsel %vm2628_vm10, %v9959_v6, 0.0  ;;  %v9965_v16 = vpop.eup %7019 }
 0x925   :  { %7029 = vpow2.f32 %v5383_v52  ;;  %5413 = vadd.xlane.f32.xlu0 %v5412_v43  ;;  %5410 = vadd.xlane.f32.xlu1 %v5409_v53  ;;  %v5415_v31 = vsel %vm2628_vm10, %v9965_v16, 0.0 }
 0x927   :  { %v9967_v24 = vpop.eup %7021 }
 0x928   :  { %v5418_v48 = vsel %vm2628_vm10, %v9967_v24, 0.0  ;;  %v9973_v51 = vpop.eup %7023 }
 0x929   :  { %5419 = vadd.xlane.f32.xlu0 %v5418_v48  ;;  %5416 = vadd.xlane.f32.xlu1 %v5415_v31  ;;  %v5421_v25 = vsel %vm2628_vm10, %v9973_v51, 0.0 }
 0x92b   :  { %v9975_v60 = vpop.eup %7025 }
 0x92c   :  { %v5424_v32 = vsel %vm2628_vm10, %v9975_v60, 0.0  ;;  %v9981_v23 = vpop.eup %7027 }
 0x92d   :  { %5425 = vadd.xlane.f32.xlu0 %v5424_v32  ;;  %5422 = vadd.xlane.f32.xlu1 %v5421_v25  ;;  %v5427_v11 = vsel %vm2628_vm10, %v9981_v23, 0.0 }
 0x92f   :  { %v9983_v38 = vpop.eup %7029 }
 0x930   :  { %v5430_v61 = vsel %vm2628_vm10, %v9983_v38, 0.0 }
 0x931   :  { %5431 = vadd.xlane.f32.xlu0 %v5430_v61  ;;  %5428 = vadd.xlane.f32.xlu1 %v5427_v11 }
 0x99d   :  { %v5390_v0 = vpop.xlane.xlu0 %5389 }
 0x99e   :  { %7031 = vrcp.f32 %v5390_v0  ;;  %v5387_v57 = vpop.xlane.xlu1 %5386 }
 0x99f   :  { %7033 = vrcp.f32 %v5387_v57 }
 0x9a2   :  { %v5396_v35 = vpop.xlane.xlu0 %5395 }
 0x9a3   :  { %7035 = vrcp.f32 %v5396_v35 }
 0x9a6   :  { %v5393_v17 = vpop.xlane.xlu1 %5392 }
 0x9a7   :  { %7037 = vrcp.f32 %v5393_v17 }
 0x9a8   :  { %v7032_v2 = vpop.eup %7031 }
 0x9a9   :  { %v7034_v28 = vpop.eup %7033  ;;  %v5450_v36 = vmul.f32 %v7032_v2, %v9916_v4 }
 0x9aa   :  { %v5449_v34 = vmul.f32 %v7034_v28, %v9918_v14  ;;  %v5402_v18 = vpop.xlane.xlu0 %5401  ;;  %v5399_v62 = vpop.xlane.xlu1 %5398 }
 0x9ab   :  { %5466 = vst.msk [vmem:[%s10080_s11 + $0x8] sm:$0xff] %vm2628_vm10, %v5450_v36  ;;  %7039 = vrcp.f32 %v5402_v18 }
 0x9ac   :  { %5465 = vst.msk [vmem:[%s10080_s11] sm:$0xff] %vm2628_vm10, %v5449_v34  ;;  %7041 = vrcp.f32 %v5399_v62 }
 0x9ad   :  { %v7036_v1 = vpop.eup %7035 }
 0x9ae   :  { %v5452_v5 = vmul.f32 %v7036_v1, %v9926_v20  ;;  %v5408_v4 = vpop.xlane.xlu0 %5407  ;;  %v5405_v27 = vpop.xlane.xlu1 %5404 }
 0x9af   :  { %7043 = vrcp.f32 %v5408_v4 }
 0x9b0   :  { %5468 = vst.msk [vmem:[%s10080_s11 + $0x18] sm:$0xff] %vm2628_vm10, %v5452_v5  ;;  %7045 = vrcp.f32 %v5405_v27 }
 0x9b1   :  { %v7038_v14 = vpop.eup %7037 }
 0x9b2   :  { %v5451_v55 = vmul.f32 %v7038_v14, %v9932_v40  ;;  %v5414_v39 = vpop.xlane.xlu0 %5413  ;;  %v5411_v10 = vpop.xlane.xlu1 %5410 }
 0x9b3   :  { %7047 = vrcp.f32 %v5414_v39 }
 0x9b4   :  { %5467 = vst.msk [vmem:[%s10080_s11 + $0x10] sm:$0xff] %vm2628_vm10, %v5451_v55  ;;  %7049 = vrcp.f32 %v5411_v10 }
 0x9b5   :  { %v7040_v20 = vpop.eup %7039 }
 0x9b6   :  { %v7042_v8 = vpop.eup %7041  ;;  %v5454_v63 = vmul.f32 %v7040_v20, %v9940_v21  ;;  %v5420_v13 = vpop.xlane.xlu0 %5419 }
 0x9b7   :  { %v5417_v54 = vpop.xlane.xlu1 %5416  ;;  %v5453_v41 = vmul.f32 %v7042_v8, %v9938_v26  ;;  %7051 = vrcp.f32 %v5420_v13 }
 0x9b8   :  { %5470 = vst.msk [vmem:[%s10080_s11 + $0x28] sm:$0xff] %vm2628_vm10, %v5454_v63  ;;  %7053 = vrcp.f32 %v5417_v54 }
 0x9b9   :  { %v7044_v40 = vpop.eup %7043  ;;  %5469 = vst.msk [vmem:[%s10080_s11 + $0x20] sm:$0xff] %vm2628_vm10, %v5453_v41 }
 0x9ba   :  { %v7046_v29 = vpop.eup %7045  ;;  %v5456_v56 = vmul.f32 %v7044_v40, %v9950_v15  ;;  %v5426_v45 = vpop.xlane.xlu0 %5425 }
 0x9bb   :  { %v5423_v22 = vpop.xlane.xlu1 %5422  ;;  %v5455_v26 = vmul.f32 %v7046_v29, %v9948_v30  ;;  %7055 = vrcp.f32 %v5426_v45 }
 0x9bc   :  { %5472 = vst.msk [vmem:[%s10080_s11 + $0x38] sm:$0xff] %vm2628_vm10, %v5456_v56  ;;  %7057 = vrcp.f32 %v5423_v22 }
 0x9bd   :  { %v7048_v42 = vpop.eup %7047  ;;  %5471 = vst.msk [vmem:[%s10080_s11 + $0x30] sm:$0xff] %vm2628_vm10, %v5455_v26 }
 0x9be   :  { %v7050_v21 = vpop.eup %7049  ;;  %v5458_v58 = vmul.f32 %v7048_v42, %v9959_v6  ;;  %v5432_v3 = vpop.xlane.xlu0 %5431 }
 0x9bf   :  { %v5429_v49 = vpop.xlane.xlu1 %5428  ;;  %v5457_v47 = vmul.f32 %v7050_v21, %v9957_v33  ;;  %7059 = vrcp.f32 %v5432_v3 }
 0x9c0   :  { %5474 = vst.msk [vmem:[%s10080_s11 + $0x48] sm:$0xff] %vm2628_vm10, %v5458_v58  ;;  %7061 = vrcp.f32 %v5429_v49 }
 0x9c1   :  { %v7052_v50 = vpop.eup %7051  ;;  %5473 = vst.msk [vmem:[%s10080_s11 + $0x40] sm:$0xff] %vm2628_vm10, %v5457_v47 }
 0x9c2   :  { %v7054_v9 = vpop.eup %7053  ;;  %v5460_v46 = vmul.f32 %v7052_v50, %v9967_v24 }
 0x9c3   :  { %v5459_v30 = vmul.f32 %v7054_v9, %v9965_v16 }
 0x9c4   :  { %5476 = vst.msk [vmem:[%s10080_s11 + $0x58] sm:$0xff] %vm2628_vm10, %v5460_v46 }
 0x9c5   :  { %v7056_v7 = vpop.eup %7055  ;;  %5475 = vst.msk [vmem:[%s10080_s11 + $0x50] sm:$0xff] %vm2628_vm10, %v5459_v30 }
 0x9c6   :  { %v7058_v15 = vpop.eup %7057  ;;  %v5462_v44 = vmul.f32 %v7056_v7, %v9975_v60 }
 0x9c7   :  { %v5461_v59 = vmul.f32 %v7058_v15, %v9973_v51 }
 0x9c8   :  { %5478 = vst.msk [vmem:[%s10080_s11 + $0x68] sm:$0xff] %vm2628_vm10, %v5462_v44 }
 0x9c9   :  { %v7060_v19 = vpop.eup %7059  ;;  %5477 = vst.msk [vmem:[%s10080_s11 + $0x60] sm:$0xff] %vm2628_vm10, %v5461_v59 }
 0x9ca   :  { %v7062_v37 = vpop.eup %7061  ;;  %v5464_v12 = vmul.f32 %v7060_v19, %v9983_v38 }
 0x9cb   :  { %v5463_v33 = vmul.f32 %v7062_v37, %v9981_v23 }
 0x9cc   :  { %5480 = vst.msk [vmem:[%s10080_s11 + $0x78] sm:$0xff] %vm2628_vm10, %v5464_v12 }
 0x9cd   :  { %5479 = vst.msk [vmem:[%s10080_s11 + $0x70] sm:$0xff] %vm2628_vm10, %v5463_v33 }

</bundles_post_ra>
